<compile_context>
chip_gen: v7x
topology: tpu7x:2x2x1
jax: 0.10.0
libtpu: 0.0.40
codegen_flags: <defaults>
</compile_context>

<pallas_src>
import functools

import jax
import jax.numpy as jnp
from jax.experimental import pallas as pl
from jax.experimental.pallas import tpu as pltpu

EPS = 1e-5


def _residual_block_kernel(x_ref, w1_ref, w2_ref, alpha_ref, out_ref, *, H, W):
    """One batch element per grid step.

    x_ref    : (1, C, H*W) f32   activation, spatial flattened onto lanes
    w1_ref   : (C, 9*C)    bf16  conv1 weights, [c_out, tap*C_in + c_in]
    w2_ref   : (C, 9*C)    bf16  conv2 weights
    alpha_ref: (C, 1)      f32   shared PReLU per-channel slope
    out_ref  : (1, C, H*W) f32
    """
    C = x_ref.shape[1]
    HW = H * W

    x = x_ref[0].astype(jnp.float32)          # (C, HW)
    alpha = alpha_ref[...]                    # (C, 1) -> broadcasts over lanes

    # Column index of every flattened spatial position. Only the dx = +-1 taps
    # need a mask (row out-of-range reads hit the zero extension instead).
    col = jax.lax.broadcasted_iota(jnp.int32, (1, HW), 1) % W
    ok_right = col < (W - 1)   # source column col+1 is in range
    ok_left = col > 0          # source column col-1 is in range
    zext = jnp.zeros((C, W + 1), jnp.float32)

    def conv3x3_in_prelu(a, w_ref):
        # Flat zero extension: flattened source index (p + dy*W + dx) + (W+1)
        # is always in range and reads 0 whenever the source row is outside
        # [0, H). Column wrap-around is removed with ok_left / ok_right.
        aext = jnp.concatenate([zext, a, zext], axis=1)      # (C, HW + 2W + 2)
        parts = []
        for k in range(9):
            dy, dx = k // 3 - 1, k % 3 - 1
            start = (W + 1) + dy * W + dx
            p = aext[:, start:start + HW]                    # (C, HW)
            if dx == 1:
                p = jnp.where(ok_right, p, 0.0)
            elif dx == -1:
                p = jnp.where(ok_left, p, 0.0)
            parts.append(p.astype(jnp.bfloat16))
        patches = jnp.concatenate(parts, axis=0)             # (9C, HW) bf16
        acc = jnp.dot(w_ref[...], patches,
                      preferred_element_type=jnp.float32)    # (C, HW) f32

        # InstanceNorm (biased variance over HW), single-pass statistics.
        s = jnp.sum(acc, axis=1, keepdims=True)
        ss = jnp.sum(acc * acc, axis=1, keepdims=True)
        mean = s * (1.0 / HW)
        var = ss * (1.0 / HW) - mean * mean
        y = (acc - mean) * jax.lax.rsqrt(var + EPS)
        return jnp.where(y > 0, y, alpha * y)                # PReLU

    y1 = conv3x3_in_prelu(x, w1_ref)
    y2 = conv3x3_in_prelu(y1, w2_ref)
    z = x + y2
    z = jnp.where(z > 0, z, alpha * z)                       # final PReLU
    out_ref[...] = z.reshape(out_ref.shape).astype(out_ref.dtype)


def _pack_conv_weight(w_hwio):
    """(3,3,Cin,Cout) HWIO -> (Cout, 9*Cin) bf16, tap-major to match im2col."""
    _, _, cin, cout = w_hwio.shape
    w9 = w_hwio.reshape(9, cin, cout)                        # [ky*3+kx, i, o]
    return jnp.transpose(w9, (2, 0, 1)).reshape(cout, 9 * cin).astype(jnp.bfloat16)


@jax.jit
def residual_block(x_nchw, w1_hwio, w2_hwio, alpha):
    """x_nchw: (N, C, H, W) f32; conv weights HWIO (3,3,C,C); alpha: (C,)."""
    N, C, H, W = x_nchw.shape
    HW = H * W
    x = x_nchw.reshape(N, C, HW)        # free reshape: no transpose, no pad
    w1 = _pack_conv_weight(w1_hwio)
    w2 = _pack_conv_weight(w2_hwio)
    alpha2d = alpha.reshape(C, 1)

    kernel = functools.partial(_residual_block_kernel, H=H, W=W)
    out = pl.pallas_call(
        kernel,
        out_shape=jax.ShapeDtypeStruct((N, C, HW), x_nchw.dtype),
        grid_spec=pltpu.PrefetchScalarGridSpec(
            num_scalar_prefetch=0,
            grid=(N,),
            in_specs=[
                pl.BlockSpec((1, C, HW), lambda n: (n, 0, 0)),
                pl.BlockSpec((C, 9 * C), lambda n: (0, 0)),   # grid-resident
                pl.BlockSpec((C, 9 * C), lambda n: (0, 0)),   # grid-resident
                pl.BlockSpec((C, 1), lambda n: (0, 0)),
            ],
            out_specs=pl.BlockSpec((1, C, HW), lambda n: (n, 0, 0)),
        ),
        compiler_params=pltpu.CompilerParams(
            dimension_semantics=("parallel",)),
        # NOTE: for production-size RAFT feature maps (v7x 64 MiB VMEM) add an
        # H-tile grid axis with a 1-row halo + two-pass IN statistics and set
        # vmem_limit_bytes; the shapes used here fit the default scoped limit.
    )(x, w1, w2, alpha2d)

    return out.reshape(N, C, H, W)


# ---------------------------------------------------------------------------
# Pure-JAX references (PyTorch semantics) for correctness checks.
def _instance_norm(y):                      # y: NHWC
    m = jnp.mean(y, axis=(1, 2), keepdims=True)
    v = jnp.mean((y - m) ** 2, axis=(1, 2), keepdims=True)
    return (y - m) * jax.lax.rsqrt(v + EPS)


def _prelu(y, a):                           # y: NHWC, a: (C,)
    return jnp.where(y > 0, y, a[None, None, None, :] * y)


def _conv3x3_ref(x, w_hwio, conv_dtype):    # x: NHWC
    dn = jax.lax.conv_dimension_numbers(x.shape, w_hwio.shape,
                                        ("NHWC", "HWIO", "NHWC"))
    precision = jax.lax.Precision.HIGHEST if conv_dtype == jnp.float32 else None
    return jax.lax.conv_general_dilated(
        x.astype(conv_dtype), w_hwio.astype(conv_dtype), (1, 1),
        ((1, 1), (1, 1)), dimension_numbers=dn,
        preferred_element_type=jnp.float32, precision=precision)


def residual_block_ref(x_nchw, w1_hwio, w2_hwio, alpha, conv_dtype=jnp.float32):
    x = jnp.transpose(x_nchw, (0, 2, 3, 1))
    y = _prelu(_instance_norm(_conv3x3_ref(x, w1_hwio, conv_dtype)), alpha)
    y = _prelu(_instance_norm(_conv3x3_ref(y, w2_hwio, conv_dtype)), alpha)
    out = _prelu(x + y, alpha)
    return jnp.transpose(out, (0, 3, 1, 2))


if __name__ == "__main__":
    # Shapes consistent with the CNNEncoder residual blocks with identity skip
    # (layer1 uses ResidualBlock(64, 64, stride=1)); H*W = 256 keeps lanes dense.
    N, C, H, W = 2, 64, 16, 16

    key = jax.random.PRNGKey(0)
    kx, k1, k2, ka = jax.random.split(key, 4)
    x = jax.random.normal(kx, (N, C, H, W), dtype=jnp.float32)
    w1 = jax.random.normal(k1, (3, 3, C, C), dtype=jnp.float32) * 0.1
    w2 = jax.random.normal(k2, (3, 3, C, C), dtype=jnp.float32) * 0.1
    alpha = 0.25 + 0.05 * jax.random.normal(ka, (C,), dtype=jnp.float32)

    out = jax.block_until_ready(residual_block(x, w1, w2, alpha))
    assert out.shape == (N, C, H, W)

    # Tight check: reference that uses the same bf16 conv operands (f32 accum).
    ref_bf16 = jax.block_until_ready(
        residual_block_ref(x, w1, w2, alpha, conv_dtype=jnp.bfloat16))
    err_bf16 = float(jnp.max(jnp.abs(out - ref_bf16)))
    assert err_bf16 < 2e-2, f"max abs err vs bf16-operand reference {err_bf16}"

    # Fidelity check vs the full-f32 (PyTorch-semantics) reference; the gap is
    # the bf16 rounding of the conv operands only.
    ref_f32 = jax.block_until_ready(
        residual_block_ref(x, w1, w2, alpha, conv_dtype=jnp.float32))
    err_f32 = float(jnp.max(jnp.abs(out - ref_f32)))
    assert err_f32 < 8e-2, f"max abs err vs f32 reference {err_f32}"

    print("KERNEL_OK")
</pallas_src>

<mosaic_0001>
module attributes {stable_mosaic.version = 11 : i64} {
  func.func @_residual_block_kernel(%arg0: i32, %arg1: memref<1x64x256xf32, #tpu.memory_space<vmem>>, %arg2: memref<64x576xbf16, #tpu.memory_space<vmem>>, %arg3: memref<64x576xbf16, #tpu.memory_space<vmem>>, %arg4: memref<64x1xf32, #tpu.memory_space<vmem>>, %arg5: memref<1x64x256xf32, #tpu.memory_space<vmem>>) attributes {dimension_semantics = [#tpu.dimension_semantics<parallel>], iteration_bounds = array<i64: 2>, scalar_prefetch = 0 : i64, scratch_operands = 0 : i64, tpu.core_type = #tpu.core_type<tc>, window_params = [{transform_indices = @transform_0, window_bounds = array<i64: 1, 64, 256>}, {pipeline_mode = #tpu.pipeline_mode<synchronous>, transform_indices = @transform_1, window_bounds = array<i64: 64, 576>}, {pipeline_mode = #tpu.pipeline_mode<synchronous>, transform_indices = @transform_2, window_bounds = array<i64: 64, 576>}, {pipeline_mode = #tpu.pipeline_mode<synchronous>, transform_indices = @transform_3, window_bounds = array<i64: 64, 1>}, {transform_indices = @transform_4, window_bounds = array<i64: 1, 64, 256>}]} {
    %c0 = arith.constant 0 : index
    %c0_0 = arith.constant 0 : index
    %c0_1 = arith.constant 0 : index
    %0 = vector.load %arg1[%c0, %c0_0, %c0_1] : memref<1x64x256xf32, #tpu.memory_space<vmem>>, vector<1x64x256xf32>
    %1 = vector.shape_cast %0 : vector<1x64x256xf32> to vector<64x256xf32>
    %c0_2 = arith.constant 0 : index
    %c0_3 = arith.constant 0 : index
    %2 = vector.load %arg4[%c0_2, %c0_3] : memref<64x1xf32, #tpu.memory_space<vmem>>, vector<64x1xf32>
    %3 = tpu.iota {dimensions = array<i32: 1>} : vector<1x256xi32>
    %c16_i32 = arith.constant 16 : i32
    %c0_i32 = arith.constant 0 : i32
    %4 = arith.cmpi eq, %c16_i32, %c0_i32 : i32
    %c1_i32 = arith.constant 1 : i32
    %5 = arith.select %4, %c1_i32, %c16_i32 : i32
    %6 = vector.broadcast %5 : i32 to vector<1x256xi32>
    %7 = arith.remsi %3, %6 : vector<1x256xi32>
    %c0_i32_4 = arith.constant 0 : i32
    %8 = vector.broadcast %c0_i32_4 : i32 to vector<1x256xi32>
    %9 = arith.cmpi ne, %7, %8 : vector<1x256xi32>
    %c0_i32_5 = arith.constant 0 : i32
    %10 = vector.broadcast %c0_i32_5 : i32 to vector<1x256xi32>
    %11 = arith.cmpi slt, %7, %10 : vector<1x256xi32>
    %c0_i32_6 = arith.constant 0 : i32
    %12 = arith.cmpi slt, %5, %c0_i32_6 : i32
    %13 = vector.broadcast %12 : i1 to vector<1x256xi1>
    %14 = vector.broadcast %13 : vector<1x256xi1> to vector<1x256xi1>
    %15 = arith.xori %11, %14 : vector<1x256xi1>
    %16 = arith.andi %15, %9 : vector<1x256xi1>
    %17 = vector.broadcast %5 : i32 to vector<1x256xi32>
    %18 = arith.addi %7, %17 : vector<1x256xi32>
    %19 = arith.select %16, %18, %7 : vector<1x256xi1>, vector<1x256xi32>
    %c15_i32 = arith.constant 15 : i32
    %20 = vector.broadcast %c15_i32 : i32 to vector<1x256xi32>
    %21 = arith.cmpi slt, %19, %20 : vector<1x256xi32>
    %c0_i32_7 = arith.constant 0 : i32
    %22 = vector.broadcast %c0_i32_7 : i32 to vector<1x256xi32>
    %23 = arith.cmpi sgt, %19, %22 : vector<1x256xi32>
    %cst = arith.constant 0.000000e+00 : f32
    %24 = vector.broadcast %cst : f32 to vector<64x17xf32>
    %25 = tpu.concatenate %24, %1, %24 in 1 : vector<64x17xf32>, vector<64x256xf32>, vector<64x17xf32> -> vector<64x290xf32>
    %26 = vector.extract_strided_slice %25 {offsets = [0, 0], sizes = [64, 256], strides = [1, 1]} : vector<64x290xf32> to vector<64x256xf32>
    %cst_8 = arith.constant 0.000000e+00 : f32
    %27 = vector.shape_cast %23 : vector<1x256xi1> to vector<1x256xi1>
    %28 = vector.broadcast %27 : vector<1x256xi1> to vector<64x256xi1>
    %29 = vector.broadcast %cst_8 : f32 to vector<64x256xf32>
    %30 = arith.select %28, %26, %29 : vector<64x256xi1>, vector<64x256xf32>
    %31 = arith.truncf %30 : vector<64x256xf32> to vector<64x256xbf16>
    %32 = vector.extract_strided_slice %25 {offsets = [0, 1], sizes = [64, 256], strides = [1, 1]} : vector<64x290xf32> to vector<64x256xf32>
    %33 = arith.truncf %32 : vector<64x256xf32> to vector<64x256xbf16>
    %34 = vector.extract_strided_slice %25 {offsets = [0, 2], sizes = [64, 256], strides = [1, 1]} : vector<64x290xf32> to vector<64x256xf32>
    %cst_9 = arith.constant 0.000000e+00 : f32
    %35 = vector.shape_cast %21 : vector<1x256xi1> to vector<1x256xi1>
    %36 = vector.broadcast %35 : vector<1x256xi1> to vector<64x256xi1>
    %37 = vector.broadcast %cst_9 : f32 to vector<64x256xf32>
    %38 = arith.select %36, %34, %37 : vector<64x256xi1>, vector<64x256xf32>
    %39 = arith.truncf %38 : vector<64x256xf32> to vector<64x256xbf16>
    %40 = vector.extract_strided_slice %25 {offsets = [0, 16], sizes = [64, 256], strides = [1, 1]} : vector<64x290xf32> to vector<64x256xf32>
    %cst_10 = arith.constant 0.000000e+00 : f32
    %41 = vector.shape_cast %23 : vector<1x256xi1> to vector<1x256xi1>
    %42 = vector.broadcast %41 : vector<1x256xi1> to vector<64x256xi1>
    %43 = vector.broadcast %cst_10 : f32 to vector<64x256xf32>
    %44 = arith.select %42, %40, %43 : vector<64x256xi1>, vector<64x256xf32>
    %45 = arith.truncf %44 : vector<64x256xf32> to vector<64x256xbf16>
    %46 = vector.extract_strided_slice %25 {offsets = [0, 17], sizes = [64, 256], strides = [1, 1]} : vector<64x290xf32> to vector<64x256xf32>
    %47 = arith.truncf %46 : vector<64x256xf32> to vector<64x256xbf16>
    %48 = vector.extract_strided_slice %25 {offsets = [0, 18], sizes = [64, 256], strides = [1, 1]} : vector<64x290xf32> to vector<64x256xf32>
    %cst_11 = arith.constant 0.000000e+00 : f32
    %49 = vector.shape_cast %21 : vector<1x256xi1> to vector<1x256xi1>
    %50 = vector.broadcast %49 : vector<1x256xi1> to vector<64x256xi1>
    %51 = vector.broadcast %cst_11 : f32 to vector<64x256xf32>
    %52 = arith.select %50, %48, %51 : vector<64x256xi1>, vector<64x256xf32>
    %53 = arith.truncf %52 : vector<64x256xf32> to vector<64x256xbf16>
    %54 = vector.extract_strided_slice %25 {offsets = [0, 32], sizes = [64, 256], strides = [1, 1]} : vector<64x290xf32> to vector<64x256xf32>
    %cst_12 = arith.constant 0.000000e+00 : f32
    %55 = vector.shape_cast %23 : vector<1x256xi1> to vector<1x256xi1>
    %56 = vector.broadcast %55 : vector<1x256xi1> to vector<64x256xi1>
    %57 = vector.broadcast %cst_12 : f32 to vector<64x256xf32>
    %58 = arith.select %56, %54, %57 : vector<64x256xi1>, vector<64x256xf32>
    %59 = arith.truncf %58 : vector<64x256xf32> to vector<64x256xbf16>
    %60 = vector.extract_strided_slice %25 {offsets = [0, 33], sizes = [64, 256], strides = [1, 1]} : vector<64x290xf32> to vector<64x256xf32>
    %61 = arith.truncf %60 : vector<64x256xf32> to vector<64x256xbf16>
    %62 = vector.extract_strided_slice %25 {offsets = [0, 34], sizes = [64, 256], strides = [1, 1]} : vector<64x290xf32> to vector<64x256xf32>
    %cst_13 = arith.constant 0.000000e+00 : f32
    %63 = vector.shape_cast %21 : vector<1x256xi1> to vector<1x256xi1>
    %64 = vector.broadcast %63 : vector<1x256xi1> to vector<64x256xi1>
    %65 = vector.broadcast %cst_13 : f32 to vector<64x256xf32>
    %66 = arith.select %64, %62, %65 : vector<64x256xi1>, vector<64x256xf32>
    %67 = arith.truncf %66 : vector<64x256xf32> to vector<64x256xbf16>
    %68 = tpu.concatenate %31, %33, %39, %45, %47, %53, %59, %61, %67 in 0 : vector<64x256xbf16>, vector<64x256xbf16>, vector<64x256xbf16>, vector<64x256xbf16>, vector<64x256xbf16>, vector<64x256xbf16>, vector<64x256xbf16>, vector<64x256xbf16>, vector<64x256xbf16> -> vector<576x256xbf16>
    %c0_14 = arith.constant 0 : index
    %c0_15 = arith.constant 0 : index
    %69 = vector.load %arg2[%c0_14, %c0_15] : memref<64x576xbf16, #tpu.memory_space<vmem>>, vector<64x576xbf16>
    %cst_16 = arith.constant dense<0.000000e+00> : vector<64x256xf32>
    %70 = tpu.matmul %69, %68, %cst_16 {dimension_numbers = #tpu.dot_dimension_numbers<[1], [0], [0], [1], [0, 0, 1, 1], [], []>} : vector<64x576xbf16>, vector<576x256xbf16>, vector<64x256xf32> -> vector<64x256xf32>
    %cst_17 = arith.constant dense<0.000000e+00> : vector<64xf32>
    %71 = vector.multi_reduction <add>, %70, %cst_17 [1] : vector<64x256xf32> to vector<64xf32>
    %72 = vector.shape_cast %71 : vector<64xf32> to vector<64x1xf32>
    %73 = arith.mulf %70, %70 : vector<64x256xf32>
    %cst_18 = arith.constant dense<0.000000e+00> : vector<64xf32>
    %74 = vector.multi_reduction <add>, %73, %cst_18 [1] : vector<64x256xf32> to vector<64xf32>
    %75 = vector.shape_cast %74 : vector<64xf32> to vector<64x1xf32>
    %cst_19 = arith.constant 3.906250e-03 : f32
    %76 = vector.broadcast %cst_19 : f32 to vector<64x1xf32>
    %77 = arith.mulf %72, %76 : vector<64x1xf32>
    %cst_20 = arith.constant 3.906250e-03 : f32
    %78 = vector.broadcast %cst_20 : f32 to vector<64x1xf32>
    %79 = arith.mulf %75, %78 : vector<64x1xf32>
    %80 = arith.mulf %77, %77 : vector<64x1xf32>
    %81 = arith.subf %79, %80 : vector<64x1xf32>
    %82 = vector.broadcast %77 : vector<64x1xf32> to vector<64x256xf32>
    %83 = arith.subf %70, %82 : vector<64x256xf32>
    %cst_21 = arith.constant 9.99999974E-6 : f32
    %84 = vector.broadcast %cst_21 : f32 to vector<64x1xf32>
    %85 = arith.addf %81, %84 : vector<64x1xf32>
    %86 = math.rsqrt %85 : vector<64x1xf32>
    %87 = vector.broadcast %86 : vector<64x1xf32> to vector<64x256xf32>
    %88 = arith.mulf %83, %87 : vector<64x256xf32>
    %cst_22 = arith.constant 0.000000e+00 : f32
    %89 = vector.broadcast %cst_22 : f32 to vector<64x256xf32>
    %90 = arith.cmpf ogt, %88, %89 : vector<64x256xf32>
    %91 = vector.broadcast %2 : vector<64x1xf32> to vector<64x256xf32>
    %92 = arith.mulf %91, %88 : vector<64x256xf32>
    %93 = arith.select %90, %88, %92 : vector<64x256xi1>, vector<64x256xf32>
    %94 = tpu.concatenate %24, %93, %24 in 1 : vector<64x17xf32>, vector<64x256xf32>, vector<64x17xf32> -> vector<64x290xf32>
    %95 = vector.extract_strided_slice %94 {offsets = [0, 0], sizes = [64, 256], strides = [1, 1]} : vector<64x290xf32> to vector<64x256xf32>
    %cst_23 = arith.constant 0.000000e+00 : f32
    %96 = vector.shape_cast %23 : vector<1x256xi1> to vector<1x256xi1>
    %97 = vector.broadcast %96 : vector<1x256xi1> to vector<64x256xi1>
    %98 = vector.broadcast %cst_23 : f32 to vector<64x256xf32>
    %99 = arith.select %97, %95, %98 : vector<64x256xi1>, vector<64x256xf32>
    %100 = arith.truncf %99 : vector<64x256xf32> to vector<64x256xbf16>
    %101 = vector.extract_strided_slice %94 {offsets = [0, 1], sizes = [64, 256], strides = [1, 1]} : vector<64x290xf32> to vector<64x256xf32>
    %102 = arith.truncf %101 : vector<64x256xf32> to vector<64x256xbf16>
    %103 = vector.extract_strided_slice %94 {offsets = [0, 2], sizes = [64, 256], strides = [1, 1]} : vector<64x290xf32> to vector<64x256xf32>
    %cst_24 = arith.constant 0.000000e+00 : f32
    %104 = vector.shape_cast %21 : vector<1x256xi1> to vector<1x256xi1>
    %105 = vector.broadcast %104 : vector<1x256xi1> to vector<64x256xi1>
    %106 = vector.broadcast %cst_24 : f32 to vector<64x256xf32>
    %107 = arith.select %105, %103, %106 : vector<64x256xi1>, vector<64x256xf32>
    %108 = arith.truncf %107 : vector<64x256xf32> to vector<64x256xbf16>
    %109 = vector.extract_strided_slice %94 {offsets = [0, 16], sizes = [64, 256], strides = [1, 1]} : vector<64x290xf32> to vector<64x256xf32>
    %cst_25 = arith.constant 0.000000e+00 : f32
    %110 = vector.shape_cast %23 : vector<1x256xi1> to vector<1x256xi1>
    %111 = vector.broadcast %110 : vector<1x256xi1> to vector<64x256xi1>
    %112 = vector.broadcast %cst_25 : f32 to vector<64x256xf32>
    %113 = arith.select %111, %109, %112 : vector<64x256xi1>, vector<64x256xf32>
    %114 = arith.truncf %113 : vector<64x256xf32> to vector<64x256xbf16>
    %115 = vector.extract_strided_slice %94 {offsets = [0, 17], sizes = [64, 256], strides = [1, 1]} : vector<64x290xf32> to vector<64x256xf32>
    %116 = arith.truncf %115 : vector<64x256xf32> to vector<64x256xbf16>
    %117 = vector.extract_strided_slice %94 {offsets = [0, 18], sizes = [64, 256], strides = [1, 1]} : vector<64x290xf32> to vector<64x256xf32>
    %cst_26 = arith.constant 0.000000e+00 : f32
    %118 = vector.shape_cast %21 : vector<1x256xi1> to vector<1x256xi1>
    %119 = vector.broadcast %118 : vector<1x256xi1> to vector<64x256xi1>
    %120 = vector.broadcast %cst_26 : f32 to vector<64x256xf32>
    %121 = arith.select %119, %117, %120 : vector<64x256xi1>, vector<64x256xf32>
    %122 = arith.truncf %121 : vector<64x256xf32> to vector<64x256xbf16>
    %123 = vector.extract_strided_slice %94 {offsets = [0, 32], sizes = [64, 256], strides = [1, 1]} : vector<64x290xf32> to vector<64x256xf32>
    %cst_27 = arith.constant 0.000000e+00 : f32
    %124 = vector.shape_cast %23 : vector<1x256xi1> to vector<1x256xi1>
    %125 = vector.broadcast %124 : vector<1x256xi1> to vector<64x256xi1>
    %126 = vector.broadcast %cst_27 : f32 to vector<64x256xf32>
    %127 = arith.select %125, %123, %126 : vector<64x256xi1>, vector<64x256xf32>
    %128 = arith.truncf %127 : vector<64x256xf32> to vector<64x256xbf16>
    %129 = vector.extract_strided_slice %94 {offsets = [0, 33], sizes = [64, 256], strides = [1, 1]} : vector<64x290xf32> to vector<64x256xf32>
    %130 = arith.truncf %129 : vector<64x256xf32> to vector<64x256xbf16>
    %131 = vector.extract_strided_slice %94 {offsets = [0, 34], sizes = [64, 256], strides = [1, 1]} : vector<64x290xf32> to vector<64x256xf32>
    %cst_28 = arith.constant 0.000000e+00 : f32
    %132 = vector.shape_cast %21 : vector<1x256xi1> to vector<1x256xi1>
    %133 = vector.broadcast %132 : vector<1x256xi1> to vector<64x256xi1>
    %134 = vector.broadcast %cst_28 : f32 to vector<64x256xf32>
    %135 = arith.select %133, %131, %134 : vector<64x256xi1>, vector<64x256xf32>
    %136 = arith.truncf %135 : vector<64x256xf32> to vector<64x256xbf16>
    %137 = tpu.concatenate %100, %102, %108, %114, %116, %122, %128, %130, %136 in 0 : vector<64x256xbf16>, vector<64x256xbf16>, vector<64x256xbf16>, vector<64x256xbf16>, vector<64x256xbf16>, vector<64x256xbf16>, vector<64x256xbf16>, vector<64x256xbf16>, vector<64x256xbf16> -> vector<576x256xbf16>
    %c0_29 = arith.constant 0 : index
    %c0_30 = arith.constant 0 : index
    %138 = vector.load %arg3[%c0_29, %c0_30] : memref<64x576xbf16, #tpu.memory_space<vmem>>, vector<64x576xbf16>
    %cst_31 = arith.constant dense<0.000000e+00> : vector<64x256xf32>
    %139 = tpu.matmul %138, %137, %cst_31 {dimension_numbers = #tpu.dot_dimension_numbers<[1], [0], [0], [1], [0, 0, 1, 1], [], []>} : vector<64x576xbf16>, vector<576x256xbf16>, vector<64x256xf32> -> vector<64x256xf32>
    %cst_32 = arith.constant dense<0.000000e+00> : vector<64xf32>
    %140 = vector.multi_reduction <add>, %139, %cst_32 [1] : vector<64x256xf32> to vector<64xf32>
    %141 = vector.shape_cast %140 : vector<64xf32> to vector<64x1xf32>
    %142 = arith.mulf %139, %139 : vector<64x256xf32>
    %cst_33 = arith.constant dense<0.000000e+00> : vector<64xf32>
    %143 = vector.multi_reduction <add>, %142, %cst_33 [1] : vector<64x256xf32> to vector<64xf32>
    %144 = vector.shape_cast %143 : vector<64xf32> to vector<64x1xf32>
    %cst_34 = arith.constant 3.906250e-03 : f32
    %145 = vector.broadcast %cst_34 : f32 to vector<64x1xf32>
    %146 = arith.mulf %141, %145 : vector<64x1xf32>
    %cst_35 = arith.constant 3.906250e-03 : f32
    %147 = vector.broadcast %cst_35 : f32 to vector<64x1xf32>
    %148 = arith.mulf %144, %147 : vector<64x1xf32>
    %149 = arith.mulf %146, %146 : vector<64x1xf32>
    %150 = arith.subf %148, %149 : vector<64x1xf32>
    %151 = vector.broadcast %146 : vector<64x1xf32> to vector<64x256xf32>
    %152 = arith.subf %139, %151 : vector<64x256xf32>
    %cst_36 = arith.constant 9.99999974E-6 : f32
    %153 = vector.broadcast %cst_36 : f32 to vector<64x1xf32>
    %154 = arith.addf %150, %153 : vector<64x1xf32>
    %155 = math.rsqrt %154 : vector<64x1xf32>
    %156 = vector.broadcast %155 : vector<64x1xf32> to vector<64x256xf32>
    %157 = arith.mulf %152, %156 : vector<64x256xf32>
    %cst_37 = arith.constant 0.000000e+00 : f32
    %158 = vector.broadcast %cst_37 : f32 to vector<64x256xf32>
    %159 = arith.cmpf ogt, %157, %158 : vector<64x256xf32>
    %160 = vector.broadcast %2 : vector<64x1xf32> to vector<64x256xf32>
    %161 = arith.mulf %160, %157 : vector<64x256xf32>
    %162 = arith.select %159, %157, %161 : vector<64x256xi1>, vector<64x256xf32>
    %163 = arith.addf %1, %162 : vector<64x256xf32>
    %cst_38 = arith.constant 0.000000e+00 : f32
    %164 = vector.broadcast %cst_38 : f32 to vector<64x256xf32>
    %165 = arith.cmpf ogt, %163, %164 : vector<64x256xf32>
    %166 = vector.broadcast %2 : vector<64x1xf32> to vector<64x256xf32>
    %167 = arith.mulf %166, %163 : vector<64x256xf32>
    %168 = arith.select %165, %163, %167 : vector<64x256xi1>, vector<64x256xf32>
    %169 = vector.shape_cast %168 : vector<64x256xf32> to vector<1x64x256xf32>
    %c0_39 = arith.constant 0 : index
    %c0_40 = arith.constant 0 : index
    %c0_41 = arith.constant 0 : index
    %170 = vector.load %arg5[%c0_39, %c0_40, %c0_41] : memref<1x64x256xf32, #tpu.memory_space<vmem>>, vector<1x64x256xf32>
    tpu.vector_store %arg5[%c0_39, %c0_40, %c0_41], %169 {strides = array<i32>} : memref<1x64x256xf32, #tpu.memory_space<vmem>>, vector<1x64x256xf32>,
    return
  }
  func.func @transform_0(%arg0: i32) -> (i32, i32, i32) {
    %c0_i32 = arith.constant 0 : i32
    %c0_i32_0 = arith.constant 0 : i32
    %c0_i32_1 = arith.constant 0 : i32
    return %arg0, %c0_i32, %c0_i32_0 : i32, i32, i32
  }
  func.func @transform_1(%arg0: i32) -> (i32, i32) {
    %c0_i32 = arith.constant 0 : i32
    %c0_i32_0 = arith.constant 0 : i32
    %c0_i32_1 = arith.constant 0 : i32
    return %c0_i32, %c0_i32_0 : i32, i32
  }
  func.func @transform_2(%arg0: i32) -> (i32, i32) {
    %c0_i32 = arith.constant 0 : i32
    %c0_i32_0 = arith.constant 0 : i32
    %c0_i32_1 = arith.constant 0 : i32
    return %c0_i32, %c0_i32_0 : i32, i32
  }
  func.func @transform_3(%arg0: i32) -> (i32, i32) {
    %c0_i32 = arith.constant 0 : i32
    %c0_i32_0 = arith.constant 0 : i32
    %c0_i32_1 = arith.constant 0 : i32
    return %c0_i32, %c0_i32_0 : i32, i32
  }
  func.func @transform_4(%arg0: i32) -> (i32, i32, i32) {
    %c0_i32 = arith.constant 0 : i32
    %c0_i32_0 = arith.constant 0 : i32
    %c0_i32_1 = arith.constant 0 : i32
    return %arg0, %c0_i32, %c0_i32_0 : i32, i32, i32
  }
}

</mosaic_0001>

<bundles_post_ra>
// kernel: residual_block.1
= control target key start
LH: loop header
LB: loop body
LE: loop exit
PB: predicated region body
PF: predicated region fallthrough
CT: control target
= control target key end

     0   :  { %s4401_s15 = smov 0   ;;  %s6339_s0 = inlined_call_operand.vmem [shape: f32[2,64,256], index: 0, kind: input, shape index: {}]   ;;  %s6340_s1 = inlined_call_operand.vmem [shape: bf16[64,576], index: 1, kind: input, shape index: {}]   ;;  %s6341_s2 = inlined_call_operand.vmem [shape: bf16[64,576], index: 2, kind: input, shape index: {}]   ;;  %s6342_s3 = inlined_call_operand.vmem [shape: f32[64,1], index: 3, kind: input, shape index: {}]   ;;  %s6343_s4 = inlined_call_operand.vmem [shape: f32[2,64,256], index: 4, kind: output, shape index: {}]  }
   0x1 LB: > { %s3141_s16 = sadd.s32 4294967295, %s4364_s15   ;;  %p3145_p0 = scmp.ge.s32.totalorder %s4364_s15, 1  ;;  %s4364_s15 = sphi %s4401_s15, %s14_s15  }
   0x2   : > { %p162_p1 = scmp.lt.s32.totalorder %s4364_s15, 3 }
   0x4   : > { %p163_p2 = pnand %p3145_p0, %p162_p1 }
   0x5   : > { %p188_p3 = scmp.lt.s32.totalorder (!%p163_p2), %s3141_s16, 1  ;;  %s4366_s21 = smov (!%p163_p2), 17   ;;  %v223_v24 = vlaneseq (!%p163_p2)  ;;  %vm302_vm0 = vcmask (!%p163_p2), 138240   ;;  %vm972_vm5 = vcmask (!%p163_p2), 1039360   ;;  %vm459_vm6 = vcmask (!%p163_p2), 1031168  }
   0x6   : > { %166 = sbr.rel (%p163_p2) target bundleno = 1727 (0x6bf), region = 36  ;;  %s4367_s22 = smov (!%p163_p2), 126   ;;  %vm564_vm11 = vcmask (!%p163_p2), 916480   ;;  %vm1013_vm12 = vcmask (!%p163_p2), 908288   ;;  %vm669_vm13 = vcmask (!%p163_p2), 900096   ;;  %vm774_vm14 = vcmask (!%p163_p2), 785408  }
   0x7   : > { %v4443_v25 = vand.u32 (!%p163_p2), 127, %v223_v24  ;;  %s4368_s23 = smov (!%p163_p2), 112   ;;  %s4369_s24 = smov (!%p163_p2), 127   ;;  %vm1054_vm15 = vcmask (!%p163_p2), 777216  }
   0x8   : > { %s4370_s25 = smov (!%p163_p2), 110   ;;  %s4371_s26 = smov (!%p163_p2), 111  }
   0x9   : > { %v4446_v26 = vadd.s32 (!%p163_p2), 128, %v4443_v25  ;;  %v230_v32 = vand.u32 (!%p163_p2), 15, %v4443_v25  ;;  %s4372_s29 = smov (!%p163_p2), 96   ;;  %s4373_s30 = smov (!%p163_p2), 95  }
   0xa   : > { %s4374_s5 = smov (!%p163_p2), 94  }
   0xb   : > { %v237_v31 = vand.u32 (!%p163_p2), 15, %v4446_v26  ;;  %vm4465_vm2 = vcmp.gt.s32.totalorder (!%p163_p2), %v230_v32, 0  ;;  %vm4844_vm8 = vcmp.lt.s32.totalorder (!%p163_p2), %v230_v32, 15 }
   0xc   : > { %vm4500_vm4 = vmpackc.low (!%p163_p2), %vm4465_vm2, %vm4465_vm2  ;;  %vm6344_vm2 = vcmask (!%p163_p2), 523264  }
   0xd   : > { %s6380_s16 = smov (!%p188_p3, %s3141_s16), 1  ;;  %vm253_vm1 = vcmp.gt.s32.totalorder %v237_v31, 0  ;;  %vm4838_vm7 = vcmp.lt.s32.totalorder %v237_v31, 15  ;;  %vm4886_vm10 = vmpackc.low %vm4844_vm8, %vm4844_vm8 }
   0xe   : > { %s3488_s17 = sshll.u32 %s6380_s16, 7  ;;  %vm4487_vm3 = vmpackc.low %vm253_vm1, %vm253_vm1  ;;  %vm6345_vm1 = vcmask 769024  }
   0xf   : > { %s4417_s20 = scalar_lea.vmem %s6339_s0, %s3488_s17  ;;  %vm4865_vm9 = vmpackc.low %vm4838_vm7, %vm4838_vm7  ;;  %s6256_s6 = scalar_lea.vmem %s6343_s4, %s3488_s17 }
  0x10   : > { %v199_v0 = vld [vmem:[%s4417_s20] sm:$0xff]  ;;  %v200_v1 = vld [vmem:[%s4417_s20 + $0x8] sm:$0xff]  ;;  %v201_v5 = vld [vmem:[%s4417_s20 + $0x10] sm:$0xff] }
  0x11   : > { %v203_v2 = vld [vmem:[%s4417_s20 + $0x20] sm:$0xff]  ;;  %v3572_v3 = vpack.i.bf16 %v200_v1, %v199_v0  ;;  %v204_v4 = vld [vmem:[%s4417_s20 + $0x28] sm:$0xff]  ;;  %v202_v6 = vld [vmem:[%s4417_s20 + $0x18] sm:$0xff] }
  0x12   : > { %v3582_v7 = vpack.i.bf16 %v204_v4, %v203_v2  ;;  %v205_v8 = vld [vmem:[%s4417_s20 + $0x30] sm:$0xff]  ;;  %v206_v9 = vld [vmem:[%s4417_s20 + $0x38] sm:$0xff]  ;;  %v3577_v10 = vpack.i.bf16 %v202_v6, %v201_v5  ;;  %v207_v12 = vld [vmem:[%s4417_s20 + $0x40] sm:$0xff] }
  0x13   : > { %3573 = vrot.lane.b32.xlu0 %v3572_v3, %s4366_s21  ;;  %v3587_v11 = vpack.i.bf16 %v206_v9, %v205_v8  ;;  %v208_v13 = vld [vmem:[%s4417_s20 + $0x48] sm:$0xff]  ;;  %v209_v14 = vld [vmem:[%s4417_s20 + $0x50] sm:$0xff]  ;;  %v210_v15 = vld [vmem:[%s4417_s20 + $0x58] sm:$0xff] }
  0x14   : > { %3583 = vrot.lane.b32.xlu1 %v3582_v7, %s4366_s21  ;;  %v211_v16 = vld [vmem:[%s4417_s20 + $0x60] sm:$0xff]  ;;  %v212_v17 = vld [vmem:[%s4417_s20 + $0x68] sm:$0xff]  ;;  %v3592_v18 = vpack.i.bf16 %v208_v13, %v207_v12  ;;  %v213_v19 = vld [vmem:[%s4417_s20 + $0x70] sm:$0xff]  ;;  %v3597_v21 = vpack.i.bf16 %v210_v15, %v209_v14 }
  0x15   : > { %v214_v20 = vld [vmem:[%s4417_s20 + $0x78] sm:$0xff]  ;;  %v3602_v22 = vpack.i.bf16 %v212_v17, %v211_v16 }
  0x16   : > { %v3607_v23 = vpack.i.bf16 %v214_v20, %v213_v19 }
  0x17   : > { %3578 = vrot.lane.b32.xlu0 %v3577_v10, %s4366_s21 }
  0x18   : > { %3588 = vrot.lane.b32.xlu1 %v3587_v11, %s4366_s21 }
  0x1b   : > { %3593 = vrot.lane.b32.xlu0 %v3592_v18, %s4366_s21 }
  0x1c   : > { %3598 = vrot.lane.b32.xlu1 %v3597_v21, %s4366_s21 }
  0x1f   : > { %3603 = vrot.lane.b32.xlu0 %v3602_v22, %s4366_s21 }
  0x20   : > { %3608 = vrot.lane.b32.xlu1 %v3607_v23, %s4366_s21 }
  0x85   : > { %v3574_v27 = vpop.permute.xlu0 %3573 }
  0x86   : > { %v3576_v28 = vunpack.i.h.bf16 %v3574_v27  ;;  %v3575_v29 = vunpack.i.l.bf16 %v3574_v27  ;;  %v3584_v30 = vpop.permute.xlu1 %3583 }
  0x87   : > { %v3586_v33 = vunpack.i.h.bf16 %v3584_v30  ;;  %v3585_v34 = vunpack.i.l.bf16 %v3584_v30 }
  0x88   : > { %v4451_v35 = vsel %vm302_vm0, %v3576_v28, 0.0  ;;  %v303_v36 = vsel %vm302_vm0, %v3575_v29, %v3576_v28  ;;  %v335_v45 = vsel %vm302_vm0, 0.0, %v3575_v29 }
  0x89   : > { %v4455_v37 = vsel %vm302_vm0, %v3586_v33, 0.0  ;;  %v305_v38 = vsel %vm302_vm0, %v3585_v34, %v3586_v33  ;;  %v3579_v39 = vpop.permute.xlu0 %3578  ;;  %v4459_v40 = vpack.i.bf16 %v4451_v35, %v303_v36  ;;  %v337_v3 = vsel %vm302_vm0, 0.0, %v3585_v34 }
  0x8a   : > { %v3581_v41 = vunpack.i.h.bf16 %v3579_v39  ;;  %v3580_v42 = vunpack.i.l.bf16 %v3579_v39  ;;  %v3589_v43 = vpop.permute.xlu1 %3588  ;;  %v4478_v51 = vpack.i.bf16 %v4455_v37, %v305_v38 }
  0x8b   : > { %v3591_v46 = vunpack.i.h.bf16 %v3589_v43  ;;  %v3590_v47 = vunpack.i.l.bf16 %v3589_v43  ;;  %3613 = vrot.lane.b32.xlu0 %v4459_v40, %s4367_s22 }
  0x8c   : > { %v4473_v48 = vsel %vm302_vm0, %v3581_v41, 0.0  ;;  %v304_v49 = vsel %vm302_vm0, %v3580_v42, %v3581_v41  ;;  %v336_v50 = vsel %vm302_vm0, 0.0, %v3580_v42 }
  0x8d   : > { %v4481_v52 = vsel %vm302_vm0, %v3591_v46, 0.0  ;;  %v306_v53 = vsel %vm302_vm0, %v3590_v47, %v3591_v46  ;;  %v4485_v54 = vpack.i.bf16 %v4473_v48, %v304_v49  ;;  %v3594_v56 = vpop.permute.xlu0 %3593  ;;  %v4491_v57 = vpack.i.bf16 %v336_v50, %v335_v45 }
  0x8e   : > { %v4493_v58 = vpack.c.bf16 %v304_v49, %v303_v36  ;;  %v4495_v59 = vpack.c.bf16 %v336_v50, %v335_v45  ;;  %v3599_v61 = vpop.permute.xlu1 %3598  ;;  %v3596_v62 = vunpack.i.h.bf16 %v3594_v56  ;;  %v3595_v1 = vunpack.i.l.bf16 %v3594_v56  ;;  %v4256_v45 = vld [vmem:[%s6340_s1 + $0x4] ss:$20 sps:$4 sm:$0xff]  }
  0x8f   : > { %3618 = vrot.lane.b32.xlu1 %v4485_v54, %s4367_s22  ;;  %v3601_v63 = vunpack.i.h.bf16 %v3599_v61  ;;  %v3600_v0 = vunpack.i.l.bf16 %v3599_v61  ;;  %v4506_v2 = vpack.c.bf16 %v306_v53, %v305_v38  ;;  %v338_v4 = vsel %vm302_vm0, 0.0, %v3590_v47  ;;  %3623 = vrot.lane.b32.xlu0 %v4491_v57, %s4367_s22 }
  0x90   : > { %3172 = vmatprep.subr.msk.bf16.mxu0 %vm4487_vm3, %v4493_v58  ;;  %v4516_v5 = vpack.i.bf16 %v4481_v52, %v306_v53  ;;  %v4523_v7 = vsel %vm302_vm0, %v3596_v62, 0.0  ;;  %v307_v8 = vsel %vm302_vm0, %v3595_v1, %v3596_v62  ;;  %v339_v11 = vsel %vm302_vm0, 0.0, %v3595_v1  ;;  %1240 = vmatprep.mubr.bf16.mxu0 %v4256_v45 }
  0x91   : > { %3175 = vmatpush1.bf16.msk.msra.mxu0 %vm4500_vm4, %v4495_v59  ;;  %v308_v6 = vsel %vm302_vm0, %v3600_v0, %v3601_v63  ;;  %v3604_v9 = vpop.permute.xlu0 %3603  ;;  %v340_v10 = vsel %vm302_vm0, 0.0, %v3600_v0  ;;  %v4535_v15 = vpack.c.bf16 %v338_v4, %v337_v3  ;;  %v348_v19 = vsel %vm302_vm0, %v3601_v63, 0.0 }
  0x92   : > { %3178 = vmatprep.subr.msk.bf16.mxu0 %vm4487_vm3, %v4506_v2  ;;  %v4531_v12 = vpack.c.bf16 %v308_v6, %v307_v8  ;;  %v3609_v13 = vpop.permute.xlu1 %3608  ;;  %v3606_v14 = vunpack.i.h.bf16 %v3604_v9  ;;  %v3605_v18 = vunpack.i.l.bf16 %v3604_v9  ;;  %v4541_v20 = vpack.i.bf16 %v4523_v7, %v307_v8 }
  0x93   : > { %3628 = vrot.lane.b32.xlu1 %v4478_v51, %s4367_s22  ;;  %v3611_v16 = vunpack.i.h.bf16 %v3609_v13  ;;  %v3610_v17 = vunpack.i.l.bf16 %v3609_v13  ;;  %3633 = vrot.lane.b32.xlu0 %v4516_v5, %s4367_s22  ;;  %v4546_v21 = vpack.i.bf16 %v338_v4, %v337_v3  ;;  %v4550_v24 = vpack.c.bf16 %v340_v10, %v339_v11 }
  0x94   : > { %v309_v23 = vsel %vm302_vm0, %v3605_v18, %v3606_v14  ;;  %v341_v28 = vsel %vm302_vm0, 0.0, %v3605_v18  ;;  %v349_v33 = vsel %vm302_vm0, %v3606_v14, 0.0  ;;  %v4563_v34 = vpack.i.bf16 %v348_v19, %v308_v6 }
  0x95   : > { %3181 = vmatpush1.bf16.msk.msra.mxu0 %vm4500_vm4, %v4535_v15  ;;  %v310_v22 = vsel %vm302_vm0, %v3610_v17, %v3611_v16  ;;  %v342_v27 = vsel %vm302_vm0, 0.0, %v3610_v17  ;;  %v350_v30 = vsel %vm302_vm0, %v3611_v16, 0.0  ;;  %v4567_v36 = vpack.i.bf16 %v340_v10, %v339_v11 }
  0x96   : > { %3184 = vmatprep.subr.msk.bf16.mxu0 %vm4487_vm3, %v4531_v12  ;;  %v4557_v29 = vpack.c.bf16 %v310_v22, %v309_v23  ;;  %v4572_v38 = vpack.c.bf16 %v342_v27, %v341_v28  ;;  %v4577_v39 = vpack.i.bf16 %v349_v33, %v309_v23  ;;  %v4579_v41 = vpack.i.bf16 %v350_v30, %v310_v22 }
  0x97   : > { %3638 = vrot.lane.b32.xlu1 %v4546_v21, %s4367_s22  ;;  %3643 = vrot.lane.b32.xlu0 %v4541_v20, %s4367_s22  ;;  %v4588_v42 = vpack.i.bf16 %v342_v27, %v341_v28  ;;  %v4624_v43 = vpack.c.bf16 %v4473_v48, %v4451_v35  ;;  %v4632_v44 = vpack.c.bf16 %v4481_v52, %v4455_v37 }
  0x98   : > { %v4643_v35 = vpack.c.bf16 %v348_v19, %v4523_v7  ;;  %v4649_v37 = vpack.c.bf16 %v350_v30, %v349_v33 }
  0x99   : > { %3187 = vmatpush1.bf16.msk.msra.mxu0 %vm4500_vm4, %v4550_v24 }
  0x9a   : > { %3190 = vmatprep.subr.msk.bf16.mxu0 %vm4487_vm3, %v4557_v29 }
  0x9b   : > { %3648 = vrot.lane.b32.xlu1 %v4563_v34, %s4367_s22  ;;  %3653 = vrot.lane.b32.xlu0 %v4567_v36, %s4367_s22 }
  0x9d   : > { %3193 = vmatpush1.bf16.msk.msra.mxu0 %vm4500_vm4, %v4572_v38 }
  0x9f   : > { %3658 = vrot.lane.b32.xlu1 %v4577_v39, %s4367_s22  ;;  %3663 = vrot.lane.b32.xlu0 %v4579_v41, %s4367_s22 }
  0xa3   : > { %3668 = vrot.lane.b32.xlu1 %v4588_v42, %s4367_s22  ;;  %3673 = vrot.lane.b32.xlu0 %v4459_v40, %s4368_s23 }
  0xa7   : > { %3678 = vrot.lane.b32.xlu1 %v4485_v54, %s4368_s23  ;;  %3683 = vrot.lane.b32.xlu0 %v4491_v57, %s4368_s23 }
  0xab   : > { %3688 = vrot.lane.b32.xlu1 %v4478_v51, %s4368_s23  ;;  %3693 = vrot.lane.b32.xlu0 %v4516_v5, %s4368_s23 }
  0xaf   : > { %3698 = vrot.lane.b32.xlu1 %v4546_v21, %s4368_s23  ;;  %3703 = vrot.lane.b32.xlu0 %v4541_v20, %s4368_s23 }
  0xb3   : > { %3708 = vrot.lane.b32.xlu1 %v4563_v34, %s4368_s23  ;;  %3713 = vrot.lane.b32.xlu0 %v4567_v36, %s4368_s23 }
  0xb7   : > { %3718 = vrot.lane.b32.xlu1 %v4577_v39, %s4368_s23  ;;  %3723 = vrot.lane.b32.xlu0 %v4579_v41, %s4368_s23 }
  0xbb   : > { %3728 = vrot.lane.b32.xlu1 %v4588_v42, %s4368_s23  ;;  %950 = vrot.lane.b32.xlu0 %v4493_v58, %s4369_s24 }
  0xbf   : > { %952 = vrot.lane.b32.xlu1 %v4624_v43, %s4369_s24  ;;  %948 = vrot.lane.b32.xlu0 %v4495_v59, %s4369_s24 }
  0xc3   : > { %956 = vrot.lane.b32.xlu1 %v4506_v2, %s4369_s24  ;;  %958 = vrot.lane.b32.xlu0 %v4632_v44, %s4369_s24 }
  0xc7   : > { %954 = vrot.lane.b32.xlu1 %v4535_v15, %s4369_s24  ;;  %962 = vrot.lane.b32.xlu0 %v4531_v12, %s4369_s24 }
  0xcb   : > { %964 = vrot.lane.b32.xlu1 %v4643_v35, %s4369_s24  ;;  %960 = vrot.lane.b32.xlu0 %v4550_v24, %s4369_s24 }
  0xcf   : > { %968 = vrot.lane.b32.xlu1 %v4557_v29, %s4369_s24  ;;  %970 = vrot.lane.b32.xlu0 %v4649_v37, %s4369_s24 }
  0xd3   : > { %966 = vrot.lane.b32.xlu1 %v4572_v38, %s4369_s24  ;;  %3733 = vrot.lane.b32.xlu0 %v4459_v40, %s4370_s25 }
  0xd7   : > { %3738 = vrot.lane.b32.xlu1 %v4485_v54, %s4370_s25  ;;  %3743 = vrot.lane.b32.xlu0 %v4491_v57, %s4370_s25 }
  0xdb   : > { %3748 = vrot.lane.b32.xlu1 %v4478_v51, %s4370_s25  ;;  %3753 = vrot.lane.b32.xlu0 %v4516_v5, %s4370_s25 }
  0xdf   : > { %3758 = vrot.lane.b32.xlu1 %v4546_v21, %s4370_s25  ;;  %3763 = vrot.lane.b32.xlu0 %v4541_v20, %s4370_s25 }
  0xe3   : > { %3768 = vrot.lane.b32.xlu1 %v4563_v34, %s4370_s25  ;;  %991 = vrot.lane.b32.xlu0 %v4493_v58, %s4371_s26 }
  0xe7   : > { %993 = vrot.lane.b32.xlu1 %v4624_v43, %s4371_s26  ;;  %989 = vrot.lane.b32.xlu0 %v4495_v59, %s4371_s26 }
  0xeb   : > { %997 = vrot.lane.b32.xlu1 %v4506_v2, %s4371_s26  ;;  %999 = vrot.lane.b32.xlu0 %v4632_v44, %s4371_s26 }
  0xef   : > { %995 = vrot.lane.b32.xlu1 %v4535_v15, %s4371_s26  ;;  %1003 = vrot.lane.b32.xlu0 %v4531_v12, %s4371_s26 }
  0xf3   : > { %1005 = vrot.lane.b32.xlu1 %v4643_v35, %s4371_s26  ;;  %1001 = vrot.lane.b32.xlu0 %v4550_v24, %s4371_s26 }
  0xf7   : > { %1009 = vrot.lane.b32.xlu1 %v4557_v29, %s4371_s26  ;;  %1011 = vrot.lane.b32.xlu0 %v4649_v37, %s4371_s26 }
  0xfb   : > { %1007 = vrot.lane.b32.xlu1 %v4572_v38, %s4371_s26  ;;  %3773 = vrot.lane.b32.xlu0 %v4567_v36, %s4370_s25 }
  0xfd   : > { %v4702_v46 = vpop.permute.xlu0 %3613 }
  0xfe   : > { %v3615_v28 = vunpack.i.l.bf16 %v4702_v46 }
  0xff   : > { %3778 = vrot.lane.b32.xlu1 %v4577_v39, %s4370_s25  ;;  %3783 = vrot.lane.b32.xlu0 %v4579_v41, %s4370_s25 }
 0x101   : > { %v4708_v47 = vpop.permute.xlu1 %3618  ;;  %v4710_v48 = vpop.permute.xlu0 %3623 }
 0x102   : > { %v3621_v27 = vunpack.i.h.bf16 %v4708_v47 }
 0x103   : > { %3788 = vrot.lane.b32.xlu1 %v4588_v42, %s4370_s25  ;;  %3793 = vrot.lane.b32.xlu0 %v4459_v40, %s4372_s29 }
 0x105   : > { %v4716_v49 = vpop.permute.xlu1 %3628  ;;  %v4718_v50 = vpop.permute.xlu0 %3633 }
 0x107   : > { %3798 = vrot.lane.b32.xlu1 %v4485_v54, %s4372_s29  ;;  %3803 = vrot.lane.b32.xlu0 %v4491_v57, %s4372_s29 }
 0x109   : > { %v4724_v52 = vpop.permute.xlu1 %3638  ;;  %v4726_v53 = vpop.permute.xlu0 %3643 }
 0x10a   : > { %v3641_v25 = vunpack.i.h.bf16 %v4724_v52  ;;  %v3640_v32 = vunpack.i.l.bf16 %v4724_v52 }
 0x10b   : > { %3808 = vrot.lane.b32.xlu1 %v4478_v51, %s4372_s29  ;;  %3813 = vrot.lane.b32.xlu0 %v4516_v5, %s4372_s29 }
 0x10d   : > { %v4732_v56 = vpop.permute.xlu1 %3648  ;;  %v4734_v61 = vpop.permute.xlu0 %3653 }
 0x10e   : > { %v3656_v52 = vunpack.i.h.bf16 %v4734_v61 }
 0x10f   : > { %3818 = vrot.lane.b32.xlu1 %v4546_v21, %s4372_s29  ;;  %3823 = vrot.lane.b32.xlu0 %v4541_v20, %s4372_s29 }
 0x111   : > { %v4740_v62 = vpop.permute.xlu1 %3658  ;;  %v4742_v63 = vpop.permute.xlu0 %3663 }
 0x113   : > { %3828 = vrot.lane.b32.xlu1 %v4563_v34, %s4372_s29  ;;  %3833 = vrot.lane.b32.xlu0 %v4567_v36, %s4372_s29 }
 0x115   : > { %v4748_v0 = vpop.permute.xlu1 %3668  ;;  %v4750_v1 = vpop.permute.xlu0 %3673 }
 0x117   : > { %3838 = vrot.lane.b32.xlu1 %v4577_v39, %s4372_s29  ;;  %3843 = vrot.lane.b32.xlu0 %v4579_v41, %s4372_s29 }
 0x119   : > { %v4756_v3 = vpop.permute.xlu1 %3678  ;;  %v4758_v4 = vpop.permute.xlu0 %3683 }
 0x11b   : > { %3848 = vrot.lane.b32.xlu1 %v4588_v42, %s4372_s29  ;;  %1032 = vrot.lane.b32.xlu0 %v4493_v58, %s4373_s30 }
 0x11d   : > { %v4764_v6 = vpop.permute.xlu1 %3688  ;;  %v4766_v7 = vpop.permute.xlu0 %3693 }
 0x11f   : > { %1034 = vrot.lane.b32.xlu1 %v4624_v43, %s4373_s30  ;;  %1030 = vrot.lane.b32.xlu0 %v4495_v59, %s4373_s30  ;;  %v3625_v43 = vunpack.i.l.bf16 %v4710_v48 }
 0x121   : > { %v4772_v8 = vpop.permute.xlu1 %3698  ;;  %v4774_v9 = vpop.permute.xlu0 %3703 }
 0x123   : > { %1038 = vrot.lane.b32.xlu1 %v4506_v2, %s4373_s30  ;;  %1040 = vrot.lane.b32.xlu0 %v4632_v44, %s4373_s30  ;;  %v3630_v44 = vunpack.i.l.bf16 %v4716_v49 }
 0x125   : > { %v4780_v58 = vpop.permute.xlu1 %3708  ;;  %v4782_v10 = vpop.permute.xlu0 %3713 }
 0x127   : > { %1036 = vrot.lane.b32.xlu1 %v4535_v15, %s4373_s30  ;;  %1044 = vrot.lane.b32.xlu0 %v4531_v12, %s4373_s30 }
 0x129   : > { %v4788_v59 = vpop.permute.xlu1 %3718  ;;  %v4790_v11 = vpop.permute.xlu0 %3723 }
 0x12b   : > { %1046 = vrot.lane.b32.xlu1 %v4643_v35, %s4373_s30  ;;  %1042 = vrot.lane.b32.xlu0 %v4550_v24, %s4373_s30  ;;  %v3636_v35 = vunpack.i.h.bf16 %v4718_v50 }
 0x12d   : > { %v4796_v2 = vpop.permute.xlu1 %3728  ;;  %v951_v13 = vpop.permute.xlu0 %950 }
 0x12f   : > { %1050 = vrot.lane.b32.xlu1 %v4557_v29, %s4373_s30  ;;  %1052 = vrot.lane.b32.xlu0 %v4649_v37, %s4373_s30  ;;  %v3635_v37 = vunpack.i.l.bf16 %v4718_v50 }
 0x131   : > { %v953_v12 = vpop.permute.xlu1 %952  ;;  %v949_v14 = vpop.permute.xlu0 %948 }
 0x132   : > { %v974_v15 = vsel %vm972_vm5, %v951_v13, %v953_v12  ;;  %v973_v16 = vsel %vm972_vm5, %v949_v14, %v951_v13  ;;  %v467_v13 = vsel %vm459_vm6, %v3635_v37, %v3636_v35  ;;  %v3646_v12 = vunpack.i.h.bf16 %v4726_v53 }
 0x133   : > { %1048 = vrot.lane.b32.xlu1 %v4572_v38, %s4373_s30  ;;  %1216 = vmatprep.subr.bf16.mxu0 %v974_v15  ;;  %v3626_v38 = vunpack.i.h.bf16 %v4710_v48  ;;  %v3645_v14 = vunpack.i.l.bf16 %v4726_v53  ;;  %v3655_v53 = vunpack.i.l.bf16 %v4734_v61  ;;  %v464_v61 = vsel %vm459_vm6, %v3640_v32, %v3630_v44 }
 0x134   : > { %3853 = vrot.lane.b32.xlu0 %v4459_v40, %s4374_s5  ;;  %1217 = vmatpush1.bf16.msra.mxu0 %v973_v16  ;;  %v3620_v40 = vunpack.i.l.bf16 %v4708_v47  ;;  %v3685_v48 = vunpack.i.l.bf16 %v4758_v4  ;;  %v4307_v16 = vld [vmem:[%s6341_s2 + $0x38] ss:$20 sps:$4 sm:$0xff]  }
 0x135   : > { %v957_v17 = vpop.permute.xlu1 %956  ;;  %v959_v18 = vpop.permute.xlu0 %958 }
 0x136   : > { %v976_v19 = vsel %vm972_vm5, %v957_v17, %v959_v18  ;;  %v463_v33 = vsel %vm459_vm6, %v3620_v40, %v3621_v27 }
 0x137   : > { %3858 = vrot.lane.b32.xlu1 %v4485_v54, %s4374_s5  ;;  %1218 = vmatprep.subr.bf16.mxu0 %v976_v19 }
 0x138   : > { %3863 = vrot.lane.b32.xlu0 %v4491_v57, %s4374_s5  ;;  %v3616_v57 = vunpack.i.h.bf16 %v4702_v46 }
 0x139   : > { %v955_v22 = vpop.permute.xlu1 %954  ;;  %v963_v23 = vpop.permute.xlu0 %962 }
 0x13a   : > { %v975_v24 = vsel %vm972_vm5, %v955_v22, %v957_v17  ;;  %v461_v46 = vsel %vm459_vm6, %v3615_v28, %v3616_v57  ;;  %v4375_v17 = vmov 0   ;;  %v466_v22 = vsel %vm459_vm6, %v3641_v25, %v3635_v37 }
 0x13b   : > { %3868 = vrot.lane.b32.xlu1 %v4478_v51, %s4374_s5  ;;  %1219 = vmatpush1.bf16.msra.mxu0 %v975_v24  ;;  %v3195_v26 = vpack.c.bf16 %v463_v33, %v461_v46  ;;  %v3665_v33 = vunpack.i.l.bf16 %v4742_v63  ;;  %v3675_v46 = vunpack.i.l.bf16 %v4750_v1 }
 0x13c   : > { %3873 = vrot.lane.b32.xlu0 %v4516_v5, %s4374_s5  ;;  %v3631_v5 = vunpack.i.h.bf16 %v4716_v49  ;;  %v462_v49 = vsel %vm459_vm6, %v3626_v38, %v3620_v40  ;;  %3912 = vset.pattern.permute.xlu1 %v4375_v17  ;;  %v3671_v38 = vunpack.i.h.bf16 %v4748_v0 }
 0x13d   : > { %v965_v54 = vpop.permute.xlu1 %964  ;;  %v961_v29 = vpop.permute.xlu0 %960  ;;  %3913 = vset.pattern.permute.xlu0 %v4375_v17 }
 0x13e   : > { %v978_v30 = vsel %vm972_vm5, %v963_v23, %v965_v54  ;;  %v977_v51 = vsel %vm972_vm5, %v961_v29, %v963_v23  ;;  %v465_v31 = vsel %vm459_vm6, %v3630_v44, %v3631_v5  ;;  %v468_v54 = vsel %vm459_vm6, %v3655_v53, %v3645_v14 }
 0x13f   : > { %3878 = vrot.lane.b32.xlu1 %v4546_v21, %s4374_s5  ;;  %1220 = vmatprep.subr.bf16.mxu0 %v978_v30  ;;  %v3201_v24 = vpack.c.bf16 %v467_v13, %v465_v31  ;;  %v3660_v29 = vunpack.i.l.bf16 %v4740_v62  ;;  %v3666_v30 = vunpack.i.h.bf16 %v4742_v63  ;;  %v3681_v5 = vunpack.i.h.bf16 %v4756_v3 }
 0x140   : > { %3883 = vrot.lane.b32.xlu0 %v4541_v20, %s4374_s5  ;;  %1221 = vmatpush1.bf16.msra.mxu0 %v977_v51  ;;  %v460_v20 = vsel %vm459_vm6, %v3625_v43, %v3615_v28  ;;  %v3661_v28 = vunpack.i.h.bf16 %v4740_v62  ;;  %v3670_v43 = vunpack.i.l.bf16 %v4748_v0  ;;  %v3204_v62 = vpack.c.bf16 %v466_v22, %v464_v61 }
 0x141   : > { %v969_v45 = vpop.permute.xlu1 %968  ;;  %v971_v47 = vpop.permute.xlu0 %970  ;;  %v3680_v63 = vunpack.i.l.bf16 %v4756_v3  ;;  %v3676_v0 = vunpack.i.h.bf16 %v4750_v1  ;;  %v474_v21 = vsel %vm459_vm6, %v3671_v38, %v3665_v33  ;;  %v3686_v3 = vunpack.i.h.bf16 %v4758_v4 }
 0x142   : > { %v980_v50 = vsel %vm972_vm5, %v969_v45, %v971_v47  ;;  %v473_v37 = vsel %vm459_vm6, %v3660_v29, %v3661_v28  ;;  %v472_v47 = vsel %vm459_vm6, %v3670_v43, %v3660_v29  ;;  %v3696_v1 = vunpack.i.h.bf16 %v4766_v7 }
 0x143   : > { %3888 = vrot.lane.b32.xlu1 %v4563_v34, %s4374_s5  ;;  %1222 = vmatprep.subr.bf16.mxu0 %v980_v50  ;;  %v3651_v34 = vunpack.i.h.bf16 %v4732_v56  ;;  %v3695_v50 = vunpack.i.l.bf16 %v4766_v7  ;;  %v568_v31 = vsel %vm564_vm11, %v3680_v63, %v3681_v5  ;;  %v566_v4 = vsel %vm564_vm11, %v3675_v46, %v3676_v0 }
 0x144   : > { %3893 = vrot.lane.b32.xlu0 %v4567_v36, %s4374_s5  ;;  %v3650_v36 = vunpack.i.l.bf16 %v4732_v56  ;;  %v567_v32 = vsel %vm564_vm11, %v3686_v3, %v3680_v63  ;;  %v565_v7 = vsel %vm564_vm11, %v3685_v48, %v3675_v46  ;;  %v3711_v53 = vunpack.i.h.bf16 %v4780_v58  ;;  %v215_v48 = vld [vmem:[%s6342_s3] sm:$0xff] }
 0x145   : > { %v967_v15 = vpop.permute.xlu1 %966  ;;  %v4874_v18 = vpop.permute.xlu0 %3733  ;;  %v3222_v22 = vpack.c.bf16 %v567_v32, %v565_v7  ;;  %v3715_v28 = vunpack.i.l.bf16 %v4782_v10  ;;  %v3726_v38 = vunpack.i.h.bf16 %v4790_v11  ;;  %v4308_v56 = vld [vmem:[%s6341_s2 + $0x60] ss:$20 sps:$4 sm:$0xff]  }
 0x146   : > { %v979_v19 = vsel %vm972_vm5, %v967_v15, %v969_v45  ;;  %v471_v27 = vsel %vm459_vm6, %v3650_v36, %v3651_v34  ;;  %v470_v40 = vsel %vm459_vm6, %v3656_v52, %v3650_v36  ;;  %v475_v45 = vsel %vm459_vm6, %v3665_v33, %v3666_v30 }
 0x147   : > { %3898 = vrot.lane.b32.xlu1 %v4577_v39, %s4374_s5  ;;  %1223 = vmatpush1.bf16.msra.mxu0 %v979_v19  ;;  %v3198_v39 = vpack.c.bf16 %v462_v49, %v460_v20  ;;  %v3210_v35 = vpack.c.bf16 %v470_v40, %v468_v54  ;;  %v3691_v49 = vunpack.i.h.bf16 %v4764_v6  ;;  %v3690_v20 = vunpack.i.l.bf16 %v4764_v6 }
 0x148   : > { %3903 = vrot.lane.b32.xlu0 %v4579_v41, %s4374_s5  ;;  %3196 = vmatprep.subr.msk.bf16.mxu0 %vm4865_vm9, %v3195_v26  ;;  %v469_v41 = vsel %vm459_vm6, %v3645_v14, %v3646_v12  ;;  %v3213_v25 = vpack.c.bf16 %v475_v45, %v473_v37  ;;  %v3216_v6 = vpack.c.bf16 %v474_v21, %v472_v47  ;;  %v3701_v36 = vunpack.i.h.bf16 %v4772_v8 }
 0x149   : > { %v4892_v23 = vpop.permute.xlu1 %3738  ;;  %v4898_v57 = vpop.permute.xlu0 %3743  ;;  %v570_v12 = vsel %vm564_vm11, %v3690_v20, %v3691_v49  ;;  %v572_v14 = vsel %vm564_vm11, %v3695_v50, %v3696_v1  ;;  %v3219_v15 = vpack.c.bf16 %v568_v31, %v566_v4  ;;  %v3700_v52 = vunpack.i.l.bf16 %v4772_v8 }
 0x14a   : > { %v3710_v19 = vunpack.i.l.bf16 %v4780_v58  ;;  %v3225_v8 = vpack.c.bf16 %v572_v14, %v570_v12  ;;  %v571_v58 = vsel %vm564_vm11, %v3701_v36, %v3695_v50  ;;  %v3721_v30 = vunpack.i.h.bf16 %v4788_v59  ;;  %v4254_v50 = vld [vmem:[%s6340_s1] ss:$20 sps:$4 sm:$0xff]  }
 0x14b   : > { %3908 = vrot.lane.b32.xlu1 %v4588_v42, %s4374_s5  ;;  %3199 = vmatpush1.bf16.msk.msra.mxu0 %vm4886_vm10, %v3198_v39  ;;  %v3207_v42 = vpack.c.bf16 %v471_v27, %v469_v41  ;;  %v3706_v39 = vunpack.i.h.bf16 %v4774_v9  ;;  %v3716_v41 = vunpack.i.h.bf16 %v4782_v10  ;;  %v569_v40 = vsel %vm564_vm11, %v3700_v52, %v3690_v20 }
 0x14c   : > { %3202 = vmatprep.subr.msk.bf16.mxu0 %vm4865_vm9, %v3201_v24  ;;  %v3705_v24 = vunpack.i.l.bf16 %v4774_v9  ;;  %v576_v54 = vsel %vm564_vm11, %v3710_v19, %v3711_v53  ;;  %v3720_v33 = vunpack.i.l.bf16 %v4788_v59  ;;  %v3725_v9 = vunpack.i.l.bf16 %v4790_v11  ;;  %v4259_v53 = vld [vmem:[%s6340_s1 + $0x28] ss:$20 sps:$4 sm:$0xff]  }
 0x14d   : > { %v4912_v51 = vpop.permute.xlu1 %3748  ;;  %v4916_v44 = vpop.permute.xlu0 %3753  ;;  %v3228_v5 = vpack.c.bf16 %v571_v58, %v569_v40  ;;  %v3731_v59 = vunpack.i.h.bf16 %v4796_v2  ;;  %v3741_v12 = vunpack.i.h.bf16 %v4892_v23  ;;  %v3740_v14 = vunpack.i.l.bf16 %v4892_v23  ;;  %v4260_v23 = vld [vmem:[%s6340_s1 + $0x54] ss:$20 sps:$4 sm:$0xff]  }
 0x14e   : > { %v574_v43 = vsel %vm564_vm11, %v3705_v24, %v3706_v39  ;;  %v573_v63 = vsel %vm564_vm11, %v3715_v28, %v3705_v24  ;;  %v578_v37 = vsel %vm564_vm11, %v3720_v33, %v3721_v30  ;;  %v580_v45 = vsel %vm564_vm11, %v3725_v9, %v3726_v38 }
 0x14f   : > { %3205 = vmatpush1.bf16.msk.msra.mxu0 %vm4886_vm10, %v3204_v62  ;;  %v575_v62 = vsel %vm564_vm11, %v3716_v41, %v3710_v19  ;;  %v3231_v11 = vpack.c.bf16 %v576_v54, %v574_v43  ;;  %v579_v21 = vsel %vm564_vm11, %v3731_v59, %v3725_v9  ;;  %1589 = vperm.xlu1 %3912, %v215_v48   ;;  %v3736_v19 = vunpack.i.h.bf16 %v4874_v18 }
 0x150   : > { %3208 = vmatprep.subr.msk.bf16.mxu0 %vm4865_vm9, %v3207_v42  ;;  %v3730_v42 = vunpack.i.l.bf16 %v4796_v2  ;;  %v3234_v46 = vpack.c.bf16 %v575_v62, %v573_v63  ;;  %v3237_v2 = vpack.c.bf16 %v580_v45, %v578_v37  ;;  %v3746_v39 = vunpack.i.h.bf16 %v4898_v57 }
 0x151   : > { %v4934_v26 = vpop.permute.xlu1 %3758  ;;  %v4937_v13 = vpop.permute.xlu0 %3763  ;;  %v3745_v24 = vunpack.i.l.bf16 %v4898_v57  ;;  %v3751_v41 = vunpack.i.h.bf16 %v4912_v51  ;;  %v3755_v40 = vunpack.i.l.bf16 %v4916_v44 }
 0x152   : > { %v577_v47 = vsel %vm564_vm11, %v3730_v42, %v3720_v33  ;;  %v3761_v9 = vunpack.i.h.bf16 %v4934_v26  ;;  %v3760_v43 = vunpack.i.l.bf16 %v4934_v26  ;;  %v4263_v26 = vld [vmem:[%s6340_s1 + $0x7c] ss:$20 sps:$4 sm:$0xff]   ;;  %v3765_v37 = vunpack.i.l.bf16 %v4937_v13 }
 0x153   : > { %3211 = vmatpush1.bf16.msk.msra.mxu0 %vm4886_vm10, %v3210_v35  ;;  %v3240_v20 = vpack.c.bf16 %v579_v21, %v577_v47 }
 0x154   : > { %3214 = vmatprep.subr.msk.bf16.mxu0 %vm4865_vm9, %v3213_v25  ;;  %v4257_v25 = vld [vmem:[%s6340_s1 + $0x2c] ss:$20 sps:$4 sm:$0xff]   ;;  %v676_v21 = vsel %vm669_vm13, %v3761_v9, %v3755_v40 }
 0x155   : > { %v4948_v34 = vpop.permute.xlu1 %3768  ;;  %v992_v61 = vpop.permute.xlu0 %991 }
 0x156   : > { %v3771_v62 = vunpack.i.h.bf16 %v4948_v34 }
 0x157   : > { %3217 = vmatpush1.bf16.msk.msra.mxu0 %vm4886_vm10, %v3216_v6 }
 0x158   : > { %3220 = vmatprep.subr.msk.bf16.mxu0 %vm4487_vm3, %v3219_v15 }
 0x159   : > { %v994_v27 = vpop.permute.xlu1 %993  ;;  %v990_v29 = vpop.permute.xlu0 %989 }
 0x15a   : > { %v1015_v31 = vsel %vm1013_vm12, %v992_v61, %v994_v27  ;;  %v1014_v32 = vsel %vm1013_vm12, %v990_v29, %v992_v61  ;;  %v3735_v61 = vunpack.i.l.bf16 %v4874_v18  ;;  %v3750_v27 = vunpack.i.l.bf16 %v4912_v51 }
 0x15b   : > { %3223 = vmatpush1.bf16.msk.msra.mxu0 %vm4500_vm4, %v3222_v22  ;;  %v3756_v18 = vunpack.i.h.bf16 %v4916_v44  ;;  %v672_v51 = vsel %vm669_vm13, %v3746_v39, %v3740_v14 }
 0x15c   : > { %3226 = vmatprep.subr.msk.bf16.mxu0 %vm4487_vm3, %v3225_v8  ;;  %v673_v8 = vsel %vm669_vm13, %v3740_v14, %v3741_v12  ;;  %v671_v57 = vsel %vm669_vm13, %v3735_v61, %v3736_v19  ;;  %v670_v30 = vsel %vm669_vm13, %v3745_v24, %v3735_v61  ;;  %v675_v33 = vsel %vm669_vm13, %v3750_v27, %v3751_v41 }
 0x15d   : > { %v998_v10 = vpop.permute.xlu1 %997  ;;  %v1000_v35 = vpop.permute.xlu0 %999  ;;  %v3243_v44 = vpack.c.bf16 %v673_v8, %v671_v57  ;;  %v677_v38 = vsel %vm669_vm13, %v3755_v40, %v3756_v18  ;;  %v674_v45 = vsel %vm669_vm13, %v3760_v43, %v3750_v27 }
 0x15e   : > { %v1017_v7 = vsel %vm1013_vm12, %v998_v10, %v1000_v35  ;;  %v3249_v47 = vpack.c.bf16 %v677_v38, %v675_v33 }
 0x15f   : > { %3229 = vmatpush1.bf16.msk.msra.mxu0 %vm4500_vm4, %v3228_v5  ;;  %v3770_v5 = vunpack.i.l.bf16 %v4948_v34  ;;  %v3246_v34 = vpack.c.bf16 %v672_v51, %v670_v30 }
 0x160   : > { %3232 = vmatprep.subr.msk.bf16.mxu0 %vm4487_vm3, %v3231_v11  ;;  %v4262_v11 = vld [vmem:[%s6340_s1 + $0x50] ss:$20 sps:$4 sm:$0xff]  }
 0x161   : > { %v996_v0 = vpop.permute.xlu1 %995  ;;  %v1004_v3 = vpop.permute.xlu0 %1003 }
 0x162   : > { %v1016_v36 = vsel %vm1013_vm12, %v996_v0, %v998_v10  ;;  %v3766_v0 = vunpack.i.h.bf16 %v4937_v13 }
 0x163   : > { %3235 = vmatpush1.bf16.msk.msra.mxu0 %vm4500_vm4, %v3234_v46 }
 0x164   : > { %3238 = vmatprep.subr.msk.bf16.mxu0 %vm4487_vm3, %v3237_v2 }
 0x165   : > { %v1006_v49 = vpop.permute.xlu1 %1005  ;;  %v1002_v1 = vpop.permute.xlu0 %1001 }
 0x166   : > { %v1019_v22 = vsel %vm1013_vm12, %v1004_v3, %v1006_v49  ;;  %v1018_v54 = vsel %vm1013_vm12, %v1002_v1, %v1004_v3  ;;  %v681_v3 = vsel %vm669_vm13, %v3770_v5, %v3771_v62 }
 0x167   : > { %3241 = vmatpush1.bf16.msk.msra.mxu0 %vm4500_vm4, %v3240_v20 }
 0x168   : > { %1281 = vmatprep.subr.bf16.mxu0 %v1015_v31 }
 0x169   : > { %v1010_v4 = vpop.permute.xlu1 %1009  ;;  %v1012_v6 = vpop.permute.xlu0 %1011 }
 0x16a   : > { %1241 = vmatmul.mubr.bf16.vlgmr.msra.gmra.mrb[0].mxu0 %v4254_v50  ;;  %v1021_v29 = vsel %vm1013_vm12, %v1010_v4, %v1012_v6 }
 0x16b   : > { %1282 = vmatpush1.bf16.msra.mxu0 %v1014_v32  ;;  %1250 = vmatprep.mubr.bf16.mxu0 %v4257_v25  ;;  %v679_v32 = vsel %vm669_vm13, %v3765_v37, %v3766_v0 }
 0x16c   : > { %1283 = vmatprep.subr.bf16.mxu0 %v1017_v7 }
 0x16d   : > { %v1008_v15 = vpop.permute.xlu1 %1007  ;;  %v3774_v52 = vpop.permute.xlu0 %3773 }
 0x16e   : > { %v1020_v63 = vsel %vm1013_vm12, %v1008_v15, %v1010_v4  ;;  %v3776_v59 = vunpack.i.h.bf16 %v3774_v52  ;;  %v3775_v42 = vunpack.i.l.bf16 %v3774_v52  ;;  %v3252_v4 = vpack.c.bf16 %v676_v21, %v674_v45  ;;  %v4265_v52 = vld [vmem:[%s6340_s1 + $0x78] ss:$20 sps:$4 sm:$0xff]  }
 0x16f   : > { %1284 = vmatpush1.bf16.msra.mxu0 %v1016_v36  ;;  %v3255_v36 = vpack.c.bf16 %v681_v3, %v679_v32 }
 0x170   : > { %1285 = vmatprep.subr.bf16.mxu0 %v1019_v22  ;;  %v680_v2 = vsel %vm669_vm13, %v3776_v59, %v3770_v5  ;;  %v678_v48 = vsel %vm669_vm13, %v3775_v42, %v3765_v37 }
 0x171   : > { %v5023_v58 = vpop.permute.xlu1 %3778  ;;  %v5026_v28 = vpop.permute.xlu0 %3783  ;;  %v3258_v7 = vpack.c.bf16 %v680_v2, %v678_v48 }
 0x172   : > { %1251 = vmatmul.mubr.bf16.gmra.mrb[4].mxu0 %v4259_v53  ;;  %v3781_v20 = vunpack.i.h.bf16 %v5023_v58  ;;  %v3780_v1 = vunpack.i.l.bf16 %v5023_v58  ;;  %v3786_v50 = vunpack.i.h.bf16 %v5026_v28  ;;  %v3785_v13 = vunpack.i.l.bf16 %v5026_v28 }
 0x173   : > { %1286 = vmatpush1.bf16.msra.mxu0 %v1018_v54  ;;  %1260 = vmatprep.mubr.bf16.mxu0 %v4260_v23  ;;  %v4268_v23 = vld [vmem:[%s6340_s1 + $0xc] ss:$20 sps:$4 sm:$0xff]  }
 0x174   : > { %1287 = vmatprep.subr.bf16.mxu0 %v1021_v29  ;;  %v683_v53 = vsel %vm669_vm13, %v3780_v1, %v3781_v20  ;;  %v685_v19 = vsel %vm669_vm13, %v3785_v13, %v3786_v50 }
 0x175   : > { %v3789_v10 = vpop.permute.xlu1 %3788  ;;  %v5039_v35 = vpop.permute.xlu0 %3793  ;;  %v3261_v29 = vpack.c.bf16 %v685_v19, %v683_v53 }
 0x176   : > { %v3791_v31 = vunpack.i.h.bf16 %v3789_v10  ;;  %v3790_v25 = vunpack.i.l.bf16 %v3789_v10  ;;  %v3796_v61 = vunpack.i.h.bf16 %v5039_v35  ;;  %v3795_v22 = vunpack.i.l.bf16 %v5039_v35 }
 0x177   : > { %1288 = vmatpush1.bf16.msra.mxu0 %v1020_v63 }
 0x178   : > { %3244 = vmatprep.subr.msk.bf16.mxu0 %vm4865_vm9, %v3243_v44  ;;  %v682_v39 = vsel %vm669_vm13, %v3790_v25, %v3780_v1  ;;  %v684_v24 = vsel %vm669_vm13, %v3791_v31, %v3785_v13  ;;  %v776_v30 = vsel %vm774_vm14, %v3795_v22, %v3796_v61 }
 0x179   : > { %v3799_v46 = vpop.permute.xlu1 %3798  ;;  %v3804_v49 = vpop.permute.xlu0 %3803  ;;  %v3264_v51 = vpack.c.bf16 %v684_v24, %v682_v39 }
 0x17a   : > { %1261 = vmatmul.mubr.bf16.gmra.mrb[8].mxu0 %v4262_v11  ;;  %v3801_v12 = vunpack.i.h.bf16 %v3799_v46  ;;  %v3800_v14 = vunpack.i.l.bf16 %v3799_v46  ;;  %v3806_v41 = vunpack.i.h.bf16 %v3804_v49  ;;  %v3805_v27 = vunpack.i.l.bf16 %v3804_v49 }
 0x17b   : > { %3247 = vmatpush1.bf16.msk.msra.mxu0 %vm4886_vm10, %v3246_v34  ;;  %1270 = vmatprep.mubr.bf16.mxu0 %v4263_v26 }
 0x17c   : > { %3250 = vmatprep.subr.msk.bf16.mxu0 %vm4865_vm9, %v3249_v47  ;;  %v778_v28 = vsel %vm774_vm14, %v3800_v14, %v3801_v12  ;;  %v777_v33 = vsel %vm774_vm14, %v3806_v41, %v3800_v14  ;;  %v775_v44 = vsel %vm774_vm14, %v3805_v27, %v3795_v22 }
 0x17d   : > { %v3809_v6 = vpop.permute.xlu1 %3808  ;;  %v3814_v15 = vpop.permute.xlu0 %3813  ;;  %v3267_v62 = vpack.c.bf16 %v778_v28, %v776_v30  ;;  %v3270_v35 = vpack.c.bf16 %v777_v33, %v775_v44 }
 0x17e   : > { %v3811_v8 = vunpack.i.h.bf16 %v3809_v6  ;;  %v3810_v18 = vunpack.i.l.bf16 %v3809_v6  ;;  %v3816_v40 = vunpack.i.h.bf16 %v3814_v15  ;;  %v3815_v58 = vunpack.i.l.bf16 %v3814_v15 }
 0x17f   : > { %3253 = vmatpush1.bf16.msk.msra.mxu0 %vm4886_vm10, %v3252_v4 }
 0x180   : > { %3256 = vmatprep.subr.msk.bf16.mxu0 %vm4865_vm9, %v3255_v36  ;;  %v780_v38 = vsel %vm774_vm14, %v3810_v18, %v3811_v8  ;;  %v782_v9 = vsel %vm774_vm14, %v3815_v58, %v3816_v40 }
 0x181   : > { %v3819_v54 = vpop.permute.xlu1 %3818  ;;  %v3824_v57 = vpop.permute.xlu0 %3823  ;;  %v3273_v45 = vpack.c.bf16 %v782_v9, %v780_v38  ;;  %v4266_v9 = vld [vmem:[%s6340_s1 + $0x8] ss:$20 sps:$4 sm:$0xff]  }
 0x182   : > { %1271 = vmatmul.mubr.bf16.gmra.mrb[12].mxu0 %v4265_v52  ;;  %v3821_v10 = vunpack.i.h.bf16 %v3819_v54  ;;  %v3820_v5 = vunpack.i.l.bf16 %v3819_v54  ;;  %v3826_v11 = vunpack.i.h.bf16 %v3824_v57  ;;  %v3825_v26 = vunpack.i.l.bf16 %v3824_v57 }
 0x183   : > { %3259 = vmatpush1.bf16.msk.msra.mxu0 %vm4886_vm10, %v3258_v7  ;;  %1313 = vmatprep.mubr.bf16.mxu0 %v4268_v23 }
 0x184   : > { %3262 = vmatprep.subr.msk.bf16.mxu0 %vm4865_vm9, %v3261_v29  ;;  %v779_v0 = vsel %vm774_vm14, %v3820_v5, %v3810_v18  ;;  %v781_v46 = vsel %vm774_vm14, %v3821_v10, %v3815_v58  ;;  %v784_v50 = vsel %vm774_vm14, %v3825_v26, %v3826_v11 }
 0x185   : > { %v3829_v43 = vpop.permute.xlu1 %3828  ;;  %v3834_v42 = vpop.permute.xlu0 %3833  ;;  %v3276_v1 = vpack.c.bf16 %v781_v46, %v779_v0 }
 0x186   : > { %v3831_v63 = vunpack.i.h.bf16 %v3829_v43  ;;  %v3830_v59 = vunpack.i.l.bf16 %v3829_v43  ;;  %v3836_v37 = vunpack.i.h.bf16 %v3834_v42  ;;  %v3835_v21 = vunpack.i.l.bf16 %v3834_v42  ;;  %v4269_v43 = vld [vmem:[%s6340_s1 + $0x34] ss:$20 sps:$4 sm:$0xff]  }
 0x187   : > { %3265 = vmatpush1.bf16.msk.msra.mxu0 %vm4886_vm10, %v3264_v51 }
 0x188   : > { %3268 = vmatprep.subr.msk.bf16.mxu0 %vm4487_vm3, %v3267_v62  ;;  %v786_v47 = vsel %vm774_vm14, %v3830_v59, %v3831_v63  ;;  %v785_v13 = vsel %vm774_vm14, %v3836_v37, %v3830_v59  ;;  %v783_v25 = vsel %vm774_vm14, %v3835_v21, %v3825_v26 }
 0x189   : > { %v3839_v34 = vpop.permute.xlu1 %3838  ;;  %v3844_v3 = vpop.permute.xlu0 %3843  ;;  %v3279_v7 = vpack.c.bf16 %v786_v47, %v784_v50  ;;  %v3282_v15 = vpack.c.bf16 %v785_v13, %v783_v25 }
 0x18a   : > { %v3841_v2 = vunpack.i.h.bf16 %v3839_v34  ;;  %v3840_v48 = vunpack.i.l.bf16 %v3839_v34  ;;  %v3846_v49 = vunpack.i.h.bf16 %v3844_v3  ;;  %v3845_v20 = vunpack.i.l.bf16 %v3844_v3 }
 0x18b   : > { %3271 = vmatpush1.bf16.msk.msra.mxu0 %vm4500_vm4, %v3270_v35 }
 0x18c   : > { %3274 = vmatprep.subr.msk.bf16.mxu0 %vm4487_vm3, %v3273_v45  ;;  %v788_v12 = vsel %vm774_vm14, %v3840_v48, %v3841_v2  ;;  %v790_v14 = vsel %vm774_vm14, %v3845_v20, %v3846_v49 }
 0x18d   : > { %v3849_v31 = vpop.permute.xlu1 %3848  ;;  %v1033_v6 = vpop.permute.xlu0 %1032  ;;  %v3285_v61 = vpack.c.bf16 %v790_v14, %v788_v12 }
 0x18e   : > { %v3851_v4 = vunpack.i.h.bf16 %v3849_v31  ;;  %v3850_v32 = vunpack.i.l.bf16 %v3849_v31 }
 0x18f   : > { %3277 = vmatpush1.bf16.msk.msra.mxu0 %vm4500_vm4, %v3276_v1  ;;  %v4272_v1 = vld [vmem:[%s6340_s1 + $0x5c] ss:$20 sps:$4 sm:$0xff]  }
 0x190   : > { %3280 = vmatprep.subr.msk.bf16.mxu0 %vm4487_vm3, %v3279_v7  ;;  %v787_v52 = vsel %vm774_vm14, %v3850_v32, %v3840_v48  ;;  %v789_v53 = vsel %vm774_vm14, %v3851_v4, %v3845_v20  ;;  %v4271_v48 = vld [vmem:[%s6340_s1 + $0x30] ss:$20 sps:$4 sm:$0xff]  }
 0x191   : > { %v1035_v36 = vpop.permute.xlu1 %1034  ;;  %v1031_v19 = vpop.permute.xlu0 %1030  ;;  %v3288_v22 = vpack.c.bf16 %v789_v53, %v787_v52 }
 0x192   : > { %v1056_v24 = vsel %vm1054_vm15, %v1033_v6, %v1035_v36  ;;  %v1055_v27 = vsel %vm1054_vm15, %v1031_v19, %v1033_v6 }
 0x193   : > { %3283 = vmatpush1.bf16.msk.msra.mxu0 %vm4500_vm4, %v3282_v15 }
 0x194   : > { %3286 = vmatprep.subr.msk.bf16.mxu0 %vm4487_vm3, %v3285_v61 }
 0x195   : > { %v1039_v23 = vpop.permute.xlu1 %1038  ;;  %v1041_v39 = vpop.permute.xlu0 %1040 }
 0x196   : > { %v1058_v18 = vsel %vm1054_vm15, %v1039_v23, %v1041_v39 }
 0x197   : > { %3289 = vmatpush1.bf16.msk.msra.mxu0 %vm4500_vm4, %v3288_v22  ;;  %v4274_v22 = vld [vmem:[%s6340_s1 + $0x58] ss:$20 sps:$4 sm:$0xff]  }
 0x198   : > { %1305 = vmatprep.subr.bf16.mxu0 %v1056_v24  ;;  %v4275_v24 = vld [vmem:[%s6340_s1 + $0x84] ss:$20 sps:$4 sm:$0xff]  }
 0x199   : > { %v1037_v41 = vpop.permute.xlu1 %1036  ;;  %v1045_v8 = vpop.permute.xlu0 %1044 }
 0x19a   : > { %v1057_v58 = vsel %vm1054_vm15, %v1037_v41, %v1039_v23 }
 0x19b   : > { %1306 = vmatpush1.bf16.msra.mxu0 %v1055_v27 }
 0x19c   : > { %1307 = vmatprep.subr.bf16.mxu0 %v1058_v18 }
 0x19d   : > { %v1047_v40 = vpop.permute.xlu1 %1046  ;;  %v1043_v54 = vpop.permute.xlu0 %1042 }
 0x19e   : > { %v1060_v28 = vsel %vm1054_vm15, %v1045_v8, %v1047_v40  ;;  %v1059_v29 = vsel %vm1054_vm15, %v1043_v54, %v1045_v8 }
 0x19f   : > { %1308 = vmatpush1.bf16.msra.mxu0 %v1057_v58 }
 0x1a0   : > { %1309 = vmatprep.subr.bf16.mxu0 %v1060_v28 }
 0x1a1   : > { %v1051_v57 = vpop.permute.xlu1 %1050  ;;  %v1053_v51 = vpop.permute.xlu0 %1052 }
 0x1a2   : > { %v1062_v30 = vsel %vm1054_vm15, %v1051_v57, %v1053_v51 }
 0x1a3   : > { %1310 = vmatpush1.bf16.msra.mxu0 %v1059_v29 }
 0x1a4   : > { %1311 = vmatprep.subr.bf16.mxu0 %v1062_v30 }
 0x1a5   : > { %v1049_v33 = vpop.permute.xlu1 %1048 }
 0x1a6   : > { %v1061_v44 = vsel %vm1054_vm15, %v1049_v33, %v1051_v57  ;;  %v3854_v38 = vpop.permute.xlu0 %3853 }
 0x1a7   : > { %1312 = vmatpush1.bf16.msra.mxu0 %v1061_v44  ;;  %v3856_v62 = vunpack.i.h.bf16 %v3854_v38  ;;  %v3855_v10 = vunpack.i.l.bf16 %v3854_v38 }
 0x1a9   : > { %v3859_v5 = vpop.permute.xlu1 %3858  ;;  %v881_v26 = vsel %vm6345_vm1, %v3855_v10, %v3856_v62 }
 0x1aa   : > { %v3861_v63 = vunpack.i.h.bf16 %v3859_v5  ;;  %v3860_v59 = vunpack.i.l.bf16 %v3859_v5  ;;  %v3864_v42 = vpop.permute.xlu0 %3863  ;;  %1314 = vmatmul.mubr.bf16.vlgmr.msra.gmra.mrb[0].mxu0 %v4266_v9 }
 0x1ab   : > { %v3866_v35 = vunpack.i.h.bf16 %v3864_v42  ;;  %v3865_v11 = vunpack.i.l.bf16 %v3864_v42  ;;  %1323 = vmatprep.mubr.bf16.mxu0 %v4269_v43  ;;  %v4278_v42 = vld [vmem:[%s6340_s1 + $0x10] ss:$20 sps:$4 sm:$0xff]  }
 0x1ac   : > { %v883_v37 = vsel %vm6345_vm1, %v3860_v59, %v3861_v63 }
 0x1ad   : > { %v882_v34 = vsel %vm6345_vm1, %v3866_v35, %v3860_v59  ;;  %v880_v45 = vsel %vm6345_vm1, %v3865_v11, %v3855_v10  ;;  %v3869_v0 = vpop.permute.xlu1 %3868  ;;  %v3291_v46 = vpack.c.bf16 %v883_v37, %v881_v26  ;;  %v4277_v10 = vld [vmem:[%s6340_s1 + $0x80] ss:$20 sps:$4 sm:$0xff]   ;;  %v4279_v35 = vld [vmem:[%s6340_s1 + $0x38] ss:$20 sps:$4 sm:$0xff]   ;;  %v4281_v26 = vld [vmem:[%s6340_s1 + $0x88] ss:$20 sps:$4 sm:$0xff]  }
 0x1ae   : > { %v3294_v47 = vpack.c.bf16 %v882_v34, %v880_v45  ;;  %v3871_v21 = vunpack.i.h.bf16 %v3869_v0  ;;  %v3870_v3 = vunpack.i.l.bf16 %v3869_v0  ;;  %v3874_v2 = vpop.permute.xlu0 %3873  ;;  %v4280_v11 = vld [vmem:[%s6340_s1 + $0x60] ss:$20 sps:$4 sm:$0xff]  }
 0x1af   : > { %v3876_v49 = vunpack.i.h.bf16 %v3874_v2  ;;  %v3875_v20 = vunpack.i.l.bf16 %v3874_v2  ;;  %3292 = vmatprep.subr.msk.bf16.mxu0 %vm4865_vm9, %v3291_v46 }
 0x1b0   : > { %v885_v50 = vsel %vm6345_vm1, %v3870_v3, %v3871_v21  ;;  %3295 = vmatpush1.bf16.msk.msra.mxu0 %vm4886_vm10, %v3294_v47 }
 0x1b1   : > { %v887_v13 = vsel %vm6345_vm1, %v3875_v20, %v3876_v49  ;;  %v3879_v31 = vpop.permute.xlu1 %3878 }
 0x1b2   : > { %v3881_v25 = vunpack.i.h.bf16 %v3879_v31  ;;  %v3880_v4 = vunpack.i.l.bf16 %v3879_v31  ;;  %v3884_v32 = vpop.permute.xlu0 %3883  ;;  %1324 = vmatmul.mubr.bf16.gmra.mrb[4].mxu0 %v4271_v48  ;;  %v3297_v6 = vpack.c.bf16 %v887_v13, %v885_v50 }
 0x1b3   : > { %1333 = vmatprep.mubr.bf16.mxu0 %v4272_v1  ;;  %v3886_v14 = vunpack.i.h.bf16 %v3884_v32  ;;  %v3885_v15 = vunpack.i.l.bf16 %v3884_v32 }
 0x1b4   : > { %v884_v7 = vsel %vm6345_vm1, %v3880_v4, %v3870_v3  ;;  %v886_v12 = vsel %vm6345_vm1, %v3881_v25, %v3875_v20  ;;  %3298 = vmatprep.subr.msk.bf16.mxu0 %vm4865_vm9, %v3297_v6 }
 0x1b5   : > { %v3300_v36 = vpack.c.bf16 %v886_v12, %v884_v7  ;;  %v3889_v52 = vpop.permute.xlu1 %3888  ;;  %v889_v41 = vsel %vm6345_vm1, %v3885_v15, %v3886_v14 }
 0x1b6   : > { %v3891_v53 = vunpack.i.h.bf16 %v3889_v52  ;;  %v3890_v19 = vunpack.i.l.bf16 %v3889_v52  ;;  %v3894_v61 = vpop.permute.xlu0 %3893 }
 0x1b7   : > { %v3896_v23 = vunpack.i.h.bf16 %v3894_v61  ;;  %v3895_v39 = vunpack.i.l.bf16 %v3894_v61  ;;  %3301 = vmatpush1.bf16.msk.msra.mxu0 %vm4886_vm10, %v3300_v36 }
 0x1b8   : > { %v891_v27 = vsel %vm6345_vm1, %v3890_v19, %v3891_v53 }
 0x1b9   : > { %v890_v8 = vsel %vm6345_vm1, %v3896_v23, %v3890_v19  ;;  %v888_v18 = vsel %vm6345_vm1, %v3895_v39, %v3885_v15  ;;  %v3899_v40 = vpop.permute.xlu1 %3898  ;;  %v3303_v58 = vpack.c.bf16 %v891_v27, %v889_v41 }
 0x1ba   : > { %v3306_v54 = vpack.c.bf16 %v890_v8, %v888_v18  ;;  %v3901_v28 = vunpack.i.h.bf16 %v3899_v40  ;;  %v3900_v57 = vunpack.i.l.bf16 %v3899_v40  ;;  %v3904_v29 = vpop.permute.xlu0 %3903  ;;  %1334 = vmatmul.mubr.bf16.gmra.mrb[8].mxu0 %v4274_v22 }
 0x1bb   : > { %v3906_v51 = vunpack.i.h.bf16 %v3904_v29  ;;  %v3905_v30 = vunpack.i.l.bf16 %v3904_v29  ;;  %3304 = vmatprep.subr.msk.bf16.mxu0 %vm4865_vm9, %v3303_v58  ;;  %1343 = vmatprep.mubr.bf16.mxu0 %v4275_v24 }
 0x1bc   : > { %v893_v33 = vsel %vm6345_vm1, %v3900_v57, %v3901_v28  ;;  %3307 = vmatpush1.bf16.msk.msra.mxu0 %vm4886_vm10, %v3306_v54 }
 0x1bd   : > { %v895_v44 = vsel %vm6345_vm1, %v3905_v30, %v3906_v51  ;;  %v3909_v38 = vpop.permute.xlu1 %3908 }
 0x1be   : > { %v3911_v9 = vunpack.i.h.bf16 %v3909_v38  ;;  %v3910_v43 = vunpack.i.l.bf16 %v3909_v38  ;;  %v3309_v62 = vpack.c.bf16 %v895_v44, %v893_v33 }
 0x1c0   : > { %v892_v5 = vsel %vm6345_vm1, %v3910_v43, %v3900_v57  ;;  %v894_v63 = vsel %vm6345_vm1, %v3911_v9, %v3905_v30  ;;  %3310 = vmatprep.subr.msk.bf16.mxu0 %vm4865_vm9, %v3309_v62  ;;  %v217_v9 = vld [vmem:[%s6342_s3 + $0x10] sm:$0xff]  ;;  %v218_v43 = vld [vmem:[%s6342_s3 + $0x18] sm:$0xff]  ;;  %v219_v62 = vld [vmem:[%s6342_s3 + $0x20] sm:$0xff] }
 0x1c1   : > { %v3312_v59 = vpack.c.bf16 %v894_v63, %v892_v5  ;;  %v220_v5 = vld [vmem:[%s6342_s3 + $0x28] sm:$0xff]  ;;  %v221_v63 = vld [vmem:[%s6342_s3 + $0x30] sm:$0xff] }
 0x1c2   : > { %1344 = vmatmul.mubr.bf16.gmra.mrb[12].mxu0 %v4277_v10  ;;  %v216_v10 = vld [vmem:[%s6342_s3 + $0x8] sm:$0xff] }
 0x1c3   : > { %3313 = vmatpush1.bf16.msk.msra.mxu0 %vm4886_vm10, %v3312_v59  ;;  %1386 = vmatprep.mubr.bf16.mxu0 %v4375_v17  ;;  %v222_v59 = vld [vmem:[%s6342_s3 + $0x38] sm:$0xff] }
 0x1ca   : > { %3314 = vmatmul.mubr.msk.bf16.vlgmr.msra.gmra.mrb[0].mxu0 %vm6344_vm2, %v4278_v42 }
 0x1cb   : > { %1396 = vmatprep.mubr.bf16.mxu0 %v4375_v17 }
 0x1ce   : > { %v5301_v42 = vpop.permute.xlu1 %1589 }
 0x1d2   : > { %3315 = vmatmul.mubr.msk.bf16.gmra.mrb[4].mxu0 %vm6344_vm2, %v4279_v35 }
 0x1d3   : > { %1406 = vmatprep.mubr.bf16.mxu0 %v4375_v17 }
 0x1da   : > { %3316 = vmatmul.mubr.msk.bf16.gmra.mrb[8].mxu0 %vm6344_vm2, %v4280_v11 }
 0x1db   : > { %1416 = vmatprep.mubr.bf16.mxu0 %v4375_v17 }
 0x1e2   : > { %3317 = vmatmul.mubr.msk.bf16.gmra.mrb[12].mxu0 %vm6344_vm2, %v4281_v26 }
 0x29d   : > { %v5200_v37 = vpop.f32.mrb[0].mxu0 }
 0x29e   : > { %v1451_v34 = vmul.f32 %v5200_v37, %v5200_v37  ;;  %v5204_v45 = vpop.f32.mrb[1].mxu0 }
 0x29f   : > { %v1427_v0 = vadd.f32 %v5204_v45, %v5200_v37  ;;  %v1452_v46 = vmul.f32 %v5204_v45, %v5204_v45  ;;  %v5210_v47 = vpop.f32.mrb[2].mxu0 }
 0x2a0   : > { %v1453_v21 = vmul.f32 %v5210_v47, %v5210_v47  ;;  %v5214_v3 = vpop.f32.mrb[3].mxu0 }
 0x2a1   : > { %v1430_v2 = vadd.f32 %v5214_v3, %v5210_v47  ;;  %v1454_v48 = vmul.f32 %v5214_v3, %v5214_v3  ;;  %1428 = vadd.xlane.f32.xlu0 %v1427_v0  ;;  %v1467_v49 = vadd.f32 %v1452_v46, %v1451_v34 }
 0x2a3   : > { %1431 = vadd.xlane.f32.xlu1 %v1430_v2  ;;  %v1470_v20 = vadd.f32 %v1454_v48, %v1453_v21 }
 0x2a5   : > { %1468 = vadd.xlane.f32.xlu0 %v1467_v49  ;;  %v5220_v1 = vpop.f32.mrb[4].mxu0 }
 0x2a6   : > { %v1455_v50 = vmul.f32 %v5220_v1, %v5220_v1  ;;  %v5224_v13 = vpop.f32.mrb[5].mxu0 }
 0x2a7   : > { %v1433_v31 = vadd.f32 %v5224_v13, %v5220_v1  ;;  %v1456_v25 = vmul.f32 %v5224_v13, %v5224_v13  ;;  %v5230_v4 = vpop.f32.mrb[6].mxu0 }
 0x2a8   : > { %v1457_v32 = vmul.f32 %v5230_v4, %v5230_v4  ;;  %v5234_v6 = vpop.f32.mrb[7].mxu0 }
 0x2a9   : > { %v1436_v7 = vadd.f32 %v5234_v6, %v5230_v4  ;;  %v1458_v12 = vmul.f32 %v5234_v6, %v5234_v6  ;;  %1471 = vadd.xlane.f32.xlu0 %v1470_v20  ;;  %1434 = vadd.xlane.f32.xlu1 %v1433_v31  ;;  %v1473_v14 = vadd.f32 %v1456_v25, %v1455_v50 }
 0x2ab   : > { %v1476_v15 = vadd.f32 %v1458_v12, %v1457_v32 }
 0x2ad   : > { %1474 = vadd.xlane.f32.xlu1 %v1473_v14  ;;  %1437 = vadd.xlane.f32.xlu0 %v1436_v7  ;;  %v5240_v36 = vpop.f32.mrb[8].mxu0 }
 0x2ae   : > { %v1459_v52 = vmul.f32 %v5240_v36, %v5240_v36  ;;  %v5244_v53 = vpop.f32.mrb[9].mxu0 }
 0x2af   : > { %v1439_v19 = vadd.f32 %v5244_v53, %v5240_v36  ;;  %v1460_v61 = vmul.f32 %v5244_v53, %v5244_v53  ;;  %v5250_v22 = vpop.f32.mrb[10].mxu0 }
 0x2b0   : > { %v1461_v23 = vmul.f32 %v5250_v22, %v5250_v22  ;;  %v5254_v39 = vpop.f32.mrb[11].mxu0 }
 0x2b1   : > { %v1442_v24 = vadd.f32 %v5254_v39, %v5250_v22  ;;  %v1462_v41 = vmul.f32 %v5254_v39, %v5254_v39  ;;  %1477 = vadd.xlane.f32.xlu0 %v1476_v15  ;;  %1440 = vadd.xlane.f32.xlu1 %v1439_v19  ;;  %v1479_v27 = vadd.f32 %v1460_v61, %v1459_v52 }
 0x2b3   : > { %v1482_v8 = vadd.f32 %v1462_v41, %v1461_v23 }
 0x2b5   : > { %1480 = vadd.xlane.f32.xlu1 %v1479_v27  ;;  %1443 = vadd.xlane.f32.xlu0 %v1442_v24  ;;  %v5260_v18 = vpop.f32.mrb[12].mxu0 }
 0x2b6   : > { %v1463_v40 = vmul.f32 %v5260_v18, %v5260_v18  ;;  %v5264_v58 = vpop.f32.mrb[13].mxu0 }
 0x2b7   : > { %v1445_v54 = vadd.f32 %v5264_v58, %v5260_v18  ;;  %v1464_v28 = vmul.f32 %v5264_v58, %v5264_v58  ;;  %v5270_v57 = vpop.f32.mrb[14].mxu0 }
 0x2b8   : > { %v1465_v29 = vmul.f32 %v5270_v57, %v5270_v57  ;;  %v5274_v51 = vpop.f32.mrb[15].mxu0 }
 0x2b9   : > { %v1448_v30 = vadd.f32 %v5274_v51, %v5270_v57  ;;  %v1466_v33 = vmul.f32 %v5274_v51, %v5274_v51  ;;  %1483 = vadd.xlane.f32.xlu0 %v1482_v8  ;;  %1446 = vadd.xlane.f32.xlu1 %v1445_v54  ;;  %v1485_v44 = vadd.f32 %v1464_v28, %v1463_v40 }
 0x2bb   : > { %v1488_v38 = vadd.f32 %v1466_v33, %v1465_v29 }
 0x2bd   : > { %1486 = vadd.xlane.f32.xlu1 %v1485_v44  ;;  %1449 = vadd.xlane.f32.xlu0 %v1448_v30 }
 0x2c1   : > { %1489 = vadd.xlane.f32.xlu0 %v1488_v38 }
 0x2ce   : > { %1599 = vperm.xlu1 %3912, %v217_v9  }
 0x2d2   : > { %1604 = vperm.xlu1 %3912, %v218_v43  }
 0x2d6   : > { %1609 = vperm.xlu1 %3912, %v219_v62  }
 0x2d7   : > { %1594 = vperm.xlu0 %3913, %v216_v10  }
 0x2da   : > { %1614 = vperm.xlu1 %3912, %v220_v5  }
 0x2de   : > { %1619 = vperm.xlu1 %3912, %v221_v63  }
 0x2e2   : > { %1624 = vperm.xlu1 %3912, %v222_v59  }
 0x32e   : > { %v1429_v35 = vpop.xlane.xlu0 %1428 }
 0x32f   : > { %v1491_v11 = vmul.f32 0.00390625, %v1429_v35 }
 0x330   : > { %v1432_v26 = vpop.xlane.xlu1 %1431 }
 0x331   : > { %v1507_v0 = vmul.f32 %v1491_v11, %v1491_v11  ;;  %v5303_v2 = vmul.f32 0.00390625, %v1432_v26  ;;  %v1523_v28 = vsub.f32 %v5200_v37, %v1491_v11  ;;  %v1524_v29 = vsub.f32 %v5204_v45, %v1491_v11 }
 0x332   : > { %v1469_v34 = vpop.xlane.xlu0 %1468 }
 0x333   : > { %v1499_v46 = vmul.f32 0.00390625, %v1469_v34  ;;  %v1508_v25 = vmul.f32 %v5303_v2, %v5303_v2 }
 0x335   : > { %v1515_v21 = vsub.f32 %v1499_v46, %v1507_v0 }
 0x336   : > { %v1472_v48 = vpop.xlane.xlu0 %1471  ;;  %v1435_v49 = vpop.xlane.xlu1 %1434 }
 0x337   : > { %v1539_v20 = vadd.f32 1e-05, %v1515_v21  ;;  %v1493_v50 = vmul.f32 0.00390625, %v1435_v49  ;;  %v1500_v31 = vmul.f32 0.00390625, %v1472_v48 }
 0x339   : > { %4310 = vrsqrt.f32 %v1539_v20  ;;  %v1509_v12 = vmul.f32 %v1493_v50, %v1493_v50  ;;  %v1516_v52 = vsub.f32 %v1500_v31, %v1508_v25  ;;  %v1527_v48 = vsub.f32 %v5220_v1, %v1493_v50 }
 0x33a   : > { %v1475_v32 = vpop.xlane.xlu1 %1474  ;;  %v1438_v7 = vpop.xlane.xlu0 %1437  ;;  %v1528_v49 = vsub.f32 %v5224_v13, %v1493_v50  ;;  %v1526_v1 = vsub.f32 %v5214_v3, %v5303_v2 }
 0x33b   : > { %v1501_v14 = vmul.f32 0.00390625, %v1475_v32  ;;  %v5307_v15 = vmul.f32 0.00390625, %v1438_v7  ;;  %v1540_v40 = vadd.f32 1e-05, %v1516_v52 }
 0x33d   : > { %v1517_v19 = vsub.f32 %v1501_v14, %v1509_v12  ;;  %v1510_v41 = vmul.f32 %v5307_v15, %v5307_v15 }
 0x33e   : > { %v1478_v61 = vpop.xlane.xlu0 %1477  ;;  %v1441_v23 = vpop.xlane.xlu1 %1440 }
 0x33f   : > { %v1541_v24 = vadd.f32 1e-05, %v1517_v19  ;;  %v1502_v27 = vmul.f32 0.00390625, %v1478_v61  ;;  %v5311_v8 = vmul.f32 0.00390625, %v1441_v23 }
 0x341   : > { %4312 = vrsqrt.f32 %v1541_v24  ;;  %v1518_v54 = vsub.f32 %v1502_v27, %v1510_v41  ;;  %v1511_v9 = vmul.f32 %v5311_v8, %v5311_v8  ;;  %v1525_v24 = vsub.f32 %v5210_v47, %v5303_v2 }
 0x342   : > { %v1481_v30 = vpop.xlane.xlu1 %1480  ;;  %v1444_v33 = vpop.xlane.xlu0 %1443  ;;  %4314 = vrsqrt.f32 %v1540_v40  ;;  %v1529_v41 = vsub.f32 %v5230_v4, %v5307_v15  ;;  %v1530_v27 = vsub.f32 %v5234_v6, %v5307_v15  ;;  %v1531_v40 = vsub.f32 %v5240_v36, %v5311_v8 }
 0x343   : > { %v4311_v44 = vpop.eup %4310  ;;  %v1542_v38 = vadd.f32 1e-05, %v1518_v54  ;;  %v1503_v43 = vmul.f32 0.00390625, %v1481_v30  ;;  %v5317_v62 = vmul.f32 0.00390625, %v1444_v33 }
 0x344   : > { %v1555_v10 = vmul.f32 %v4311_v44, %v1523_v28  ;;  %v1556_v5 = vmul.f32 %v4311_v44, %v1524_v29 }
 0x345   : > { %4316 = vrsqrt.f32 %v1542_v38  ;;  %v1519_v63 = vsub.f32 %v1503_v43, %v1511_v9  ;;  %v1512_v37 = vmul.f32 %v5317_v62, %v5317_v62  ;;  %v1532_v38 = vsub.f32 %v5244_v53, %v5311_v8 }
 0x346   : > { %v1484_v59 = vpop.xlane.xlu0 %1483  ;;  %v1447_v45 = vpop.xlane.xlu1 %1446  ;;  %vm1571_vm7 = vcmp.gt.f32.partialorder %v1555_v10, 0.0  ;;  %vm1572_vm8 = vcmp.gt.f32.partialorder %v1556_v5, 0.0  ;;  %v1627_v35 = vmul.f32 %v5301_v42, %v1555_v10  ;;  %v1628_v0 = vmul.f32 %v5301_v42, %v1556_v5 }
 0x347   : > { %v1543_v11 = vadd.f32 1e-05, %v1519_v63  ;;  %v1504_v26 = vmul.f32 0.00390625, %v1484_v59  ;;  %v5322_v34 = vmul.f32 0.00390625, %v1447_v45  ;;  %v1533_v53 = vsub.f32 %v5250_v22, %v5317_v62 }
 0x348   : > { %v1643_v46 = vsel %vm1571_vm7, %v1555_v10, %v1627_v35  ;;  %v1644_v32 = vsel %vm1572_vm8, %v1556_v5, %v1628_v0  ;;  %v1534_v0 = vsub.f32 %v5254_v39, %v5317_v62 }
 0x349   : > { %4318 = vrsqrt.f32 %v1543_v11  ;;  %v1520_v21 = vsub.f32 %v1504_v26, %v1512_v37  ;;  %v1513_v20 = vmul.f32 %v5322_v34, %v5322_v34  ;;  %v3914_v19 = vpack.i.bf16 %v1644_v32, %v1643_v46 }
 0x34a   : > { %v1487_v31 = vpop.xlane.xlu1 %1486  ;;  %v1450_v25 = vpop.xlane.xlu0 %1449 }
 0x34b   : > { %v4313_v7 = vpop.eup %4312  ;;  %v1544_v12 = vadd.f32 1e-05, %v1520_v21  ;;  %v1505_v14 = vmul.f32 0.00390625, %v1487_v31  ;;  %v5329_v52 = vmul.f32 0.00390625, %v1450_v25  ;;  %3915 = vrot.lane.b32.xlu1 %v3914_v19, %s4366_s21  ;;  %v1535_v19 = vsub.f32 %v5260_v18, %v5322_v34 }
 0x34c   : > { %v1559_v61 = vmul.f32 %v4313_v7, %v1527_v48  ;;  %v1560_v23 = vmul.f32 %v4313_v7, %v1528_v49  ;;  %v4315_v50 = vpop.eup %4314 }
 0x34d   : > { %4320 = vrsqrt.f32 %v1544_v12  ;;  %v1521_v13 = vsub.f32 %v1505_v14, %v1513_v20  ;;  %v1514_v47 = vmul.f32 %v5329_v52, %v5329_v52  ;;  %v1557_v10 = vmul.f32 %v4315_v50, %v1525_v24 }
 0x34e   : > { %v5342_v54 = vpop.permute.xlu1 %1599  ;;  %v1490_v3 = vpop.xlane.xlu0 %1489  ;;  %vm1575_vm7 = vcmp.gt.f32.partialorder %v1559_v61, 0.0  ;;  %vm1576_vm8 = vcmp.gt.f32.partialorder %v1560_v23, 0.0  ;;  %v1558_v5 = vmul.f32 %v4315_v50, %v1526_v1 }
 0x34f   : > { %v4317_v2 = vpop.eup %4316  ;;  %v1545_v28 = vadd.f32 1e-05, %v1521_v13  ;;  %v1506_v29 = vmul.f32 0.00390625, %v1490_v3  ;;  %v1631_v30 = vmul.f32 %v5342_v54, %v1559_v61  ;;  %v1632_v33 = vmul.f32 %v5342_v54, %v1560_v23 }
 0x350   : > { %v1561_v4 = vmul.f32 %v4317_v2, %v1529_v41  ;;  %v1562_v6 = vmul.f32 %v4317_v2, %v1530_v27  ;;  %vm1573_vm2 = vcmp.gt.f32.partialorder %v1557_v10, 0.0  ;;  %vm1574_vm1 = vcmp.gt.f32.partialorder %v1558_v5, 0.0 }
 0x351   : > { %4322 = vrsqrt.f32 %v1545_v28  ;;  %v1522_v15 = vsub.f32 %v1506_v29, %v1514_v47  ;;  %v1647_v36 = vsel %vm1575_vm7, %v1559_v61, %v1631_v30  ;;  %v1648_v44 = vsel %vm1576_vm8, %v1560_v23, %v1632_v33 }
 0x352   : > { %v5350_v9 = vpop.permute.xlu1 %1604  ;;  %v3924_v43 = vpack.i.bf16 %v1648_v44, %v1647_v36  ;;  %vm1577_vm7 = vcmp.gt.f32.partialorder %v1561_v4, 0.0  ;;  %vm1578_vm8 = vcmp.gt.f32.partialorder %v1562_v6, 0.0  ;;  %v1536_v61 = vsub.f32 %v5264_v58, %v5322_v34 }
 0x353   : > { %v4319_v63 = vpop.eup %4318  ;;  %v1546_v37 = vadd.f32 1e-05, %v1522_v15  ;;  %v1633_v59 = vmul.f32 %v5350_v9, %v1561_v4  ;;  %v1634_v45 = vmul.f32 %v5350_v9, %v1562_v6  ;;  %v1537_v58 = vsub.f32 %v5270_v57, %v5329_v52 }
 0x354   : > { %3925 = vrot.lane.b32.xlu0 %v3924_v43, %s4366_s21  ;;  %v1563_v35 = vmul.f32 %v4319_v63, %v1531_v40  ;;  %v1564_v11 = vmul.f32 %v4319_v63, %v1532_v38  ;;  %v1538_v34 = vsub.f32 %v5274_v51, %v5329_v52 }
 0x355   : > { %4324 = vrsqrt.f32 %v1546_v37  ;;  %v1649_v8 = vsel %vm1577_vm7, %v1561_v4, %v1633_v59  ;;  %v1650_v26 = vsel %vm1578_vm8, %v1562_v6, %v1634_v45 }
 0x356   : > { %v5359_v46 = vpop.permute.xlu1 %1609  ;;  %v5361_v21 = vpop.permute.xlu0 %1594  ;;  %v3929_v48 = vpack.i.bf16 %v1650_v26, %v1649_v8  ;;  %vm1579_vm7 = vcmp.gt.f32.partialorder %v1563_v35, 0.0  ;;  %vm1580_vm8 = vcmp.gt.f32.partialorder %v1564_v11, 0.0 }
 0x357   : > { %v4321_v49 = vpop.eup %4320  ;;  %v1635_v20 = vmul.f32 %v5359_v46, %v1563_v35  ;;  %v1636_v31 = vmul.f32 %v5359_v46, %v1564_v11  ;;  %v1629_v22 = vmul.f32 %v5361_v21, %v1557_v10  ;;  %v1630_v25 = vmul.f32 %v5361_v21, %v1558_v5 }
 0x358   : > { %v1565_v32 = vmul.f32 %v4321_v49, %v1533_v53  ;;  %v1566_v39 = vmul.f32 %v4321_v49, %v1534_v0 }
 0x359   : > { %v1651_v62 = vsel %vm1579_vm7, %v1563_v35, %v1635_v20  ;;  %v1652_v7 = vsel %vm1580_vm8, %v1564_v11, %v1636_v31  ;;  %v1645_v12 = vsel %vm1573_vm2, %v1557_v10, %v1629_v22  ;;  %v1646_v14 = vsel %vm1574_vm1, %v1558_v5, %v1630_v25 }
 0x35a   : > { %v5371_v23 = vpop.permute.xlu1 %1614  ;;  %v3934_v24 = vpack.i.bf16 %v1652_v7, %v1651_v62  ;;  %v3919_v1 = vpack.i.bf16 %v1646_v14, %v1645_v12  ;;  %vm1581_vm1 = vcmp.gt.f32.partialorder %v1565_v32, 0.0  ;;  %vm1582_vm2 = vcmp.gt.f32.partialorder %v1566_v39, 0.0 }
 0x35b   : > { %v4323_v13 = vpop.eup %4322  ;;  %v1637_v50 = vmul.f32 %v5371_v23, %v1565_v32  ;;  %v1638_v41 = vmul.f32 %v5371_v23, %v1566_v39 }
 0x35c   : > { %3935 = vrot.lane.b32.xlu0 %v3934_v24, %s4366_s21  ;;  %3920 = vrot.lane.b32.xlu1 %v3919_v1, %s4366_s21  ;;  %v1567_v27 = vmul.f32 %v4323_v13, %v1535_v19  ;;  %v1568_v40 = vmul.f32 %v4323_v13, %v1536_v61 }
 0x35d   : > { %v1653_v18 = vsel %vm1581_vm1, %v1565_v32, %v1637_v50  ;;  %v1654_v47 = vsel %vm1582_vm2, %v1566_v39, %v1638_v41 }
 0x35e   : > { %v5381_v3 = vpop.permute.xlu1 %1619  ;;  %v3939_v2 = vpack.i.bf16 %v1654_v47, %v1653_v18  ;;  %vm1583_vm7 = vcmp.gt.f32.partialorder %v1567_v27, 0.0  ;;  %vm1584_vm8 = vcmp.gt.f32.partialorder %v1568_v40, 0.0 }
 0x35f   : > { %v4325_v28 = vpop.eup %4324  ;;  %v1639_v29 = vmul.f32 %v5381_v3, %v1567_v27  ;;  %v1640_v30 = vmul.f32 %v5381_v3, %v1568_v40 }
 0x360   : > { %3930 = vrot.lane.b32.xlu1 %v3929_v48, %s4366_s21  ;;  %v1569_v33 = vmul.f32 %v4325_v28, %v1537_v58  ;;  %v1570_v4 = vmul.f32 %v4325_v28, %v1538_v34 }
 0x361   : > { %v1655_v6 = vsel %vm1583_vm7, %v1567_v27, %v1639_v29  ;;  %v1656_v15 = vsel %vm1584_vm8, %v1568_v40, %v1640_v30 }
 0x362   : > { %v5386_v57 = vpop.permute.xlu1 %1624  ;;  %v3944_v36 = vpack.i.bf16 %v1656_v15, %v1655_v6  ;;  %vm1585_vm1 = vcmp.gt.f32.partialorder %v1569_v33, 0.0  ;;  %vm1586_vm2 = vcmp.gt.f32.partialorder %v1570_v4, 0.0 }
 0x363   : > { %v1641_v51 = vmul.f32 %v5386_v57, %v1569_v33  ;;  %v1642_v52 = vmul.f32 %v5386_v57, %v1570_v4 }
 0x364   : > { %3945 = vrot.lane.b32.xlu0 %v3944_v36, %s4366_s21  ;;  %3940 = vrot.lane.b32.xlu1 %v3939_v2, %s4366_s21 }
 0x365   : > { %v1657_v44 = vsel %vm1585_vm1, %v1569_v33, %v1641_v51  ;;  %v1658_v38 = vsel %vm1586_vm2, %v1570_v4, %v1642_v52 }
 0x366   : > { %v3949_v43 = vpack.i.bf16 %v1658_v38, %v1657_v44 }
 0x368   : > { %3950 = vrot.lane.b32.xlu1 %v3949_v43, %s4366_s21 }
 0x3bd   : > { %v3916_v10 = vpop.permute.xlu1 %3915 }
 0x3be   : > { %v3918_v5 = vunpack.i.h.bf16 %v3916_v10  ;;  %v3917_v63 = vunpack.i.l.bf16 %v3916_v10 }
 0x3c0   : > { %v1747_v37 = vsel %vm302_vm0, %v3918_v5, 0.0  ;;  %v1707_v59 = vsel %vm302_vm0, %v3917_v63, %v3918_v5  ;;  %v1739_v31 = vsel %vm302_vm0, 0.0, %v3917_v63 }
 0x3c1   : > { %v5395_v45 = vpack.i.bf16 %v1747_v37, %v1707_v59 }
 0x3c3   : > { %3955 = vrot.lane.b32.xlu0 %v5395_v45, %s4367_s22 }
 0x3c6   : > { %v3926_v35 = vpop.permute.xlu0 %3925 }
 0x3c7   : > { %v3928_v11 = vunpack.i.h.bf16 %v3926_v35  ;;  %v3927_v53 = vunpack.i.l.bf16 %v3926_v35  ;;  %3960 = vrot.lane.b32.xlu0 %v5395_v45, %s4368_s23 }
 0x3c9   : > { %v5400_v8 = vsel %vm302_vm0, %v3928_v11, 0.0  ;;  %v1709_v26 = vsel %vm302_vm0, %v3927_v53, %v3928_v11  ;;  %v1741_v50 = vsel %vm302_vm0, 0.0, %v3927_v53 }
 0x3ca   : > { %v5406_v0 = vpack.i.bf16 %v5400_v8, %v1709_v26 }
 0x3ce   : > { %v3921_v48 = vpop.permute.xlu1 %3920  ;;  %v3936_v39 = vpop.permute.xlu0 %3935 }
 0x3cf   : > { %v3923_v49 = vunpack.i.h.bf16 %v3921_v48  ;;  %v3922_v20 = vunpack.i.l.bf16 %v3921_v48  ;;  %v3938_v1 = vunpack.i.h.bf16 %v3936_v39  ;;  %v3937_v13 = vunpack.i.l.bf16 %v3936_v39 }
 0x3d1   : > { %v1748_v22 = vsel %vm302_vm0, %v3923_v49, 0.0  ;;  %v1708_v25 = vsel %vm302_vm0, %v3922_v20, %v3923_v49  ;;  %v1740_v32 = vsel %vm302_vm0, 0.0, %v3922_v20  ;;  %v1711_v28 = vsel %vm302_vm0, %v3937_v13, %v3938_v1 }
 0x3d2   : > { %v3931_v62 = vpop.permute.xlu1 %3930  ;;  %v5412_v7 = vpack.i.bf16 %v1740_v32, %v1739_v31  ;;  %v5414_v12 = vpack.i.bf16 %v1748_v22, %v1708_v25  ;;  %v5416_v61 = vpack.c.bf16 %v1708_v25, %v1707_v59  ;;  %v5418_v24 = vpack.c.bf16 %v1740_v32, %v1739_v31 }
 0x3d3   : > { %v3933_v14 = vunpack.i.h.bf16 %v3931_v62  ;;  %v3932_v19 = vunpack.i.l.bf16 %v3931_v62  ;;  %v1743_v29 = vsel %vm302_vm0, 0.0, %v3937_v13  ;;  %v5451_v36 = vpack.c.bf16 %v1748_v22, %v1747_v37 }
 0x3d4   : > { %3970 = vrot.lane.b32.xlu0 %v5412_v7, %s4367_s22  ;;  %3965 = vrot.lane.b32.xlu1 %v5414_v12, %s4367_s22  ;;  %v1751_v59 = vsel %vm302_vm0, %v3938_v1, 0.0  ;;  %v4284_v1 = vld [vmem:[%s6341_s2 + $0x4] ss:$20 sps:$4 sm:$0xff]  }
 0x3d5   : > { %v1710_v41 = vsel %vm302_vm0, %v3932_v19, %v3933_v14  ;;  %v1742_v27 = vsel %vm302_vm0, 0.0, %v3932_v19  ;;  %3340 = vmatprep.subr.msk.bf16.mxu1 %vm4487_vm3, %v5416_v61  ;;  %v1750_v43 = vsel %vm302_vm0, %v3933_v14, 0.0  ;;  %v5488_v49 = vpack.i.bf16 %v1751_v59, %v1711_v28  ;;  %2627 = vmatprep.mubr.bf16.mxu1 %v4284_v1 }
 0x3d6   : > { %3343 = vmatpush1.bf16.msk.msra.mxu1 %vm4500_vm4, %v5418_v24  ;;  %v3941_v40 = vpop.permute.xlu1 %3940  ;;  %v3946_v18 = vpop.permute.xlu0 %3945  ;;  %v5433_v47 = vpack.c.bf16 %v1710_v41, %v1709_v26  ;;  %v5435_v58 = vpack.c.bf16 %v1742_v27, %v1741_v50  ;;  %v5478_v26 = vpack.i.bf16 %v1750_v43, %v1710_v41  ;;  %v5490_v20 = vpack.i.bf16 %v1742_v27, %v1741_v50 }
 0x3d7   : > { %v3943_v34 = vunpack.i.h.bf16 %v3941_v40  ;;  %v3942_v2 = vunpack.i.l.bf16 %v3941_v40  ;;  %v3948_v4 = vunpack.i.h.bf16 %v3946_v18  ;;  %v3947_v6 = vunpack.i.l.bf16 %v3946_v18 }
 0x3d8   : > { %3980 = vrot.lane.b32.xlu0 %v5412_v7, %s4368_s23  ;;  %3975 = vrot.lane.b32.xlu1 %v5414_v12, %s4368_s23  ;;  %v5515_v14 = vpack.c.bf16 %v1750_v43, %v5400_v8 }
 0x3d9   : > { %v1712_v30 = vsel %vm302_vm0, %v3942_v2, %v3943_v34  ;;  %v1744_v33 = vsel %vm302_vm0, 0.0, %v3942_v2  ;;  %3346 = vmatprep.subr.msk.bf16.mxu1 %vm4487_vm3, %v5433_v47  ;;  %v1713_v10 = vsel %vm302_vm0, %v3947_v6, %v3948_v4  ;;  %v1745_v5 = vsel %vm302_vm0, 0.0, %v3947_v6 }
 0x3da   : > { %3349 = vmatpush1.bf16.msk.msra.mxu1 %vm4500_vm4, %v5435_v58  ;;  %v3951_v15 = vpop.permute.xlu1 %3950  ;;  %v5453_v51 = vpack.c.bf16 %v1712_v30, %v1711_v28  ;;  %v5455_v52 = vpack.c.bf16 %v1744_v33, %v1743_v29  ;;  %v1752_v53 = vsel %vm302_vm0, %v3943_v34, 0.0  ;;  %v5492_v31 = vpack.i.bf16 %v1744_v33, %v1743_v29 }
 0x3db   : > { %v3953_v44 = vunpack.i.h.bf16 %v3951_v15  ;;  %v3952_v38 = vunpack.i.l.bf16 %v3951_v15  ;;  %v1753_v22 = vsel %vm302_vm0, %v3948_v4, 0.0  ;;  %v5498_v25 = vpack.i.bf16 %v1752_v53, %v1712_v30 }
 0x3dc   : > { %2343 = vrot.lane.b32.xlu1 %v5451_v36, %s4369_s24  ;;  %2341 = vrot.lane.b32.xlu0 %v5416_v61, %s4369_s24  ;;  %v5508_v62 = vpack.i.bf16 %v1753_v22, %v1713_v10  ;;  %v5537_v8 = vpack.c.bf16 %v1752_v53, %v1751_v59 }
 0x3dd   : > { %v1714_v63 = vsel %vm302_vm0, %v3952_v38, %v3953_v44  ;;  %v1746_v37 = vsel %vm302_vm0, 0.0, %v3952_v38  ;;  %3352 = vmatprep.subr.msk.bf16.mxu1 %vm4487_vm3, %v5453_v51  ;;  %v1754_v48 = vsel %vm302_vm0, %v3953_v44, 0.0  ;;  %vm6360_vm0 = vcmask 769024  }
 0x3de   : > { %3355 = vmatpush1.bf16.msk.msra.mxu1 %vm4500_vm4, %v5455_v52  ;;  %v5473_v35 = vpack.c.bf16 %v1714_v63, %v1713_v10  ;;  %v5475_v11 = vpack.c.bf16 %v1746_v37, %v1745_v5  ;;  %v5500_v32 = vpack.i.bf16 %v1746_v37, %v1745_v5  ;;  %v5506_v39 = vpack.i.bf16 %v1754_v48, %v1714_v63  ;;  %vm6370_vm7 = vmmov %vm6360_vm0 }
 0x3df   : > { %v5555_v19 = vpack.c.bf16 %v1754_v48, %v1753_v22  ;;  %vm6371_vm8 = vmmov %vm6360_vm0 }
 0x3e0   : > { %2339 = vrot.lane.b32.xlu0 %v5418_v24, %s4369_s24  ;;  %3985 = vrot.lane.b32.xlu1 %v5406_v0, %s4367_s22  ;;  %vm6372_vm1 = vmmov %vm6360_vm0 }
 0x3e1   : > { %3358 = vmatprep.subr.msk.bf16.mxu1 %vm4487_vm3, %v5473_v35  ;;  %vm6373_vm2 = vmmov %vm6360_vm0 }
 0x3e2   : > { %3361 = vmatpush1.bf16.msk.msra.mxu1 %vm4500_vm4, %v5475_v11 }
 0x3e4   : > { %3995 = vrot.lane.b32.xlu0 %v5478_v26, %s4367_s22  ;;  %3990 = vrot.lane.b32.xlu1 %v5406_v0, %s4368_s23 }
 0x3e8   : > { %4005 = vrot.lane.b32.xlu0 %v5478_v26, %s4368_s23  ;;  %4000 = vrot.lane.b32.xlu1 %v5490_v20, %s4367_s22 }
 0x3ec   : > { %2349 = vrot.lane.b32.xlu0 %v5515_v14, %s4369_s24  ;;  %4010 = vrot.lane.b32.xlu1 %v5490_v20, %s4368_s23 }
 0x3f0   : > { %4015 = vrot.lane.b32.xlu0 %v5488_v49, %s4367_s22  ;;  %2347 = vrot.lane.b32.xlu1 %v5433_v47, %s4369_s24 }
 0x3f4   : > { %4020 = vrot.lane.b32.xlu0 %v5488_v49, %s4368_s23  ;;  %2345 = vrot.lane.b32.xlu1 %v5435_v58, %s4369_s24 }
 0x3f8   : > { %4030 = vrot.lane.b32.xlu0 %v5492_v31, %s4367_s22  ;;  %4025 = vrot.lane.b32.xlu1 %v5498_v25, %s4367_s22 }
 0x3fc   : > { %4040 = vrot.lane.b32.xlu0 %v5492_v31, %s4368_s23  ;;  %4035 = vrot.lane.b32.xlu1 %v5498_v25, %s4368_s23 }
 0x400   : > { %2353 = vrot.lane.b32.xlu0 %v5453_v51, %s4369_s24  ;;  %2355 = vrot.lane.b32.xlu1 %v5537_v8, %s4369_s24 }
 0x404   : > { %2351 = vrot.lane.b32.xlu0 %v5455_v52, %s4369_s24  ;;  %4045 = vrot.lane.b32.xlu1 %v5508_v62, %s4367_s22 }
 0x408   : > { %4055 = vrot.lane.b32.xlu0 %v5506_v39, %s4367_s22  ;;  %4050 = vrot.lane.b32.xlu1 %v5508_v62, %s4368_s23 }
 0x40c   : > { %4065 = vrot.lane.b32.xlu0 %v5506_v39, %s4368_s23  ;;  %4060 = vrot.lane.b32.xlu1 %v5500_v32, %s4367_s22 }
 0x410   : > { %2361 = vrot.lane.b32.xlu0 %v5555_v19, %s4369_s24  ;;  %4070 = vrot.lane.b32.xlu1 %v5500_v32, %s4368_s23 }
 0x414   : > { %2381 = vrot.lane.b32.xlu0 %v5416_v61, %s4371_s26  ;;  %2359 = vrot.lane.b32.xlu1 %v5473_v35, %s4369_s24 }
 0x418   : > { %2379 = vrot.lane.b32.xlu0 %v5418_v24, %s4371_s26  ;;  %2357 = vrot.lane.b32.xlu1 %v5475_v11, %s4369_s24 }
 0x41c   : > { %2389 = vrot.lane.b32.xlu0 %v5515_v14, %s4371_s26  ;;  %2383 = vrot.lane.b32.xlu1 %v5451_v36, %s4371_s26 }
 0x420   : > { %2393 = vrot.lane.b32.xlu0 %v5453_v51, %s4371_s26  ;;  %2387 = vrot.lane.b32.xlu1 %v5433_v47, %s4371_s26 }
 0x424   : > { %2391 = vrot.lane.b32.xlu0 %v5455_v52, %s4371_s26  ;;  %2385 = vrot.lane.b32.xlu1 %v5435_v58, %s4371_s26 }
 0x428   : > { %4075 = vrot.lane.b32.xlu0 %v5395_v45, %s4370_s25  ;;  %2395 = vrot.lane.b32.xlu1 %v5537_v8, %s4371_s26 }
 0x42c   : > { %4085 = vrot.lane.b32.xlu0 %v5412_v7, %s4370_s25  ;;  %4080 = vrot.lane.b32.xlu1 %v5414_v12, %s4370_s25 }
 0x430   : > { %4095 = vrot.lane.b32.xlu0 %v5478_v26, %s4370_s25  ;;  %4090 = vrot.lane.b32.xlu1 %v5406_v0, %s4370_s25 }
 0x434   : > { %4105 = vrot.lane.b32.xlu0 %v5488_v49, %s4370_s25  ;;  %4100 = vrot.lane.b32.xlu1 %v5490_v20, %s4370_s25 }
 0x435   : > { %v5604_v13 = vpop.permute.xlu0 %3955 }
 0x438   : > { %4115 = vrot.lane.b32.xlu0 %v5492_v31, %s4370_s25  ;;  %4110 = vrot.lane.b32.xlu1 %v5498_v25, %s4370_s25 }
 0x439   : > { %v5614_v50 = vpop.permute.xlu0 %3960 }
 0x43c   : > { %4125 = vrot.lane.b32.xlu0 %v5506_v39, %s4370_s25  ;;  %4120 = vrot.lane.b32.xlu1 %v5508_v62, %s4370_s25 }
 0x440   : > { %2401 = vrot.lane.b32.xlu0 %v5555_v19, %s4371_s26  ;;  %4130 = vrot.lane.b32.xlu1 %v5500_v32, %s4370_s25 }
 0x444   : > { %4135 = vrot.lane.b32.xlu0 %v5395_v45, %s4372_s29  ;;  %2399 = vrot.lane.b32.xlu1 %v5473_v35, %s4371_s26 }
 0x446   : > { %v5620_v41 = vpop.permute.xlu1 %3965  ;;  %v5622_v27 = vpop.permute.xlu0 %3970 }
 0x447   : > { %v3968_v1 = vunpack.i.h.bf16 %v5620_v41 }
 0x448   : > { %4145 = vrot.lane.b32.xlu0 %v5412_v7, %s4372_s29  ;;  %2397 = vrot.lane.b32.xlu1 %v5475_v11, %s4371_s26 }
 0x44a   : > { %v5628_v40 = vpop.permute.xlu1 %3975  ;;  %v5630_v18 = vpop.permute.xlu0 %3980 }
 0x44c   : > { %4155 = vrot.lane.b32.xlu0 %v5478_v26, %s4372_s29  ;;  %4140 = vrot.lane.b32.xlu1 %v5414_v12, %s4372_s29 }
 0x44e   : > { %v2344_v34 = vpop.permute.xlu1 %2343  ;;  %v2342_v2 = vpop.permute.xlu0 %2341 }
 0x44f   : > { %v2364_v28 = vsel %vm972_vm5, %v2342_v2, %v2344_v34  ;;  %v3973_v34 = vunpack.i.h.bf16 %v5622_v27 }
 0x450   : > { %4165 = vrot.lane.b32.xlu0 %v5488_v49, %s4372_s29  ;;  %4150 = vrot.lane.b32.xlu1 %v5406_v0, %s4372_s29 }
 0x451   : > { %2603 = vmatprep.subr.bf16.mxu1 %v2364_v28 }
 0x452   : > { %v2340_v29 = vpop.permute.xlu0 %2339  ;;  %v5641_v30 = vpop.permute.xlu1 %3985 }
 0x453   : > { %v2363_v33 = vsel %vm972_vm5, %v2340_v29, %v2342_v2 }
 0x454   : > { %4175 = vrot.lane.b32.xlu0 %v5492_v31, %s4372_s29  ;;  %4160 = vrot.lane.b32.xlu1 %v5490_v20, %s4372_s29 }
 0x455   : > { %2604 = vmatpush1.bf16.msra.mxu1 %v2363_v33 }
 0x456   : > { %v5648_v4 = vpop.permute.xlu0 %3995  ;;  %v5650_v6 = vpop.permute.xlu1 %3990 }
 0x457   : > { %v3997_v33 = vunpack.i.l.bf16 %v5648_v4 }
 0x458   : > { %4185 = vrot.lane.b32.xlu0 %v5506_v39, %s4372_s29  ;;  %4170 = vrot.lane.b32.xlu1 %v5498_v25, %s4372_s29 }
 0x45a   : > { %v5656_v15 = vpop.permute.xlu0 %4005  ;;  %v5658_v44 = vpop.permute.xlu1 %4000 }
 0x45c   : > { %2421 = vrot.lane.b32.xlu0 %v5416_v61, %s4373_s30  ;;  %4180 = vrot.lane.b32.xlu1 %v5508_v62, %s4372_s29 }
 0x45e   : > { %v2350_v38 = vpop.permute.xlu0 %2349  ;;  %v5664_v43 = vpop.permute.xlu1 %4010 }
 0x460   : > { %2419 = vrot.lane.b32.xlu0 %v5418_v24, %s4373_s30  ;;  %4190 = vrot.lane.b32.xlu1 %v5500_v32, %s4372_s29 }
 0x462   : > { %v5670_v10 = vpop.permute.xlu0 %4015  ;;  %v2348_v5 = vpop.permute.xlu1 %2347 }
 0x463   : > { %v2366_v63 = vsel %vm972_vm5, %v2348_v5, %v2350_v38 }
 0x464   : > { %2429 = vrot.lane.b32.xlu0 %v5515_v14, %s4373_s30  ;;  %2423 = vrot.lane.b32.xlu1 %v5451_v36, %s4373_s30 }
 0x465   : > { %2605 = vmatprep.subr.bf16.mxu1 %v2366_v63 }
 0x466   : > { %v5677_v61 = vpop.permute.xlu0 %4020  ;;  %v2346_v37 = vpop.permute.xlu1 %2345 }
 0x467   : > { %v2365_v24 = vsel %vm972_vm5, %v2346_v37, %v2348_v5 }
 0x468   : > { %2433 = vrot.lane.b32.xlu0 %v5453_v51, %s4373_s30  ;;  %2427 = vrot.lane.b32.xlu1 %v5433_v47, %s4373_s30 }
 0x469   : > { %2606 = vmatpush1.bf16.msra.mxu1 %v2365_v24 }
 0x46a   : > { %v5684_v59 = vpop.permute.xlu0 %4030  ;;  %v5686_v53 = vpop.permute.xlu1 %4025 }
 0x46c   : > { %2431 = vrot.lane.b32.xlu0 %v5455_v52, %s4373_s30  ;;  %2425 = vrot.lane.b32.xlu1 %v5435_v58, %s4373_s30 }
 0x46e   : > { %v5692_v36 = vpop.permute.xlu0 %4040  ;;  %v5694_v48 = vpop.permute.xlu1 %4035 }
 0x470   : > { %2441 = vrot.lane.b32.xlu0 %v5555_v19, %s4373_s30  ;;  %2435 = vrot.lane.b32.xlu1 %v5537_v8, %s4373_s30 }
 0x472   : > { %v2354_v47 = vpop.permute.xlu0 %2353  ;;  %v2356_v51 = vpop.permute.xlu1 %2355 }
 0x473   : > { %v2368_v22 = vsel %vm972_vm5, %v2354_v47, %v2356_v51  ;;  %v4027_v51 = vunpack.i.l.bf16 %v5686_v53 }
 0x474   : > { %4195 = vrot.lane.b32.xlu0 %v5395_v45, %s4374_s5  ;;  %2439 = vrot.lane.b32.xlu1 %v5473_v35, %s4373_s30 }
 0x475   : > { %2607 = vmatprep.subr.bf16.mxu1 %v2368_v22 }
 0x476   : > { %v2352_v58 = vpop.permute.xlu0 %2351  ;;  %v5705_v52 = vpop.permute.xlu1 %4045 }
 0x477   : > { %v2367_v14 = vsel %vm972_vm5, %v2352_v58, %v2354_v47 }
 0x478   : > { %4205 = vrot.lane.b32.xlu0 %v5412_v7, %s4374_s5  ;;  %2437 = vrot.lane.b32.xlu1 %v5475_v11, %s4373_s30 }
 0x479   : > { %2608 = vmatpush1.bf16.msra.mxu1 %v2367_v14 }
 0x47a   : > { %v5712_v8 = vpop.permute.xlu0 %4055  ;;  %v5714_v19 = vpop.permute.xlu1 %4050 }
 0x47c   : > { %4215 = vrot.lane.b32.xlu0 %v5478_v26, %s4374_s5  ;;  %4200 = vrot.lane.b32.xlu1 %v5414_v12, %s4374_s5  ;;  %v3967_v26 = vunpack.i.l.bf16 %v5620_v41  ;;  %v3958_v12 = vunpack.i.h.bf16 %v5604_v13 }
 0x47e   : > { %v5720_v45 = vpop.permute.xlu0 %4065  ;;  %v5722_v35 = vpop.permute.xlu1 %4060  ;;  %v1858_v41 = vsel %vm459_vm6, %v3967_v26, %v3968_v1  ;;  %v1857_v5 = vsel %vm459_vm6, %v3973_v34, %v3967_v26  ;;  %v4017_v1 = vunpack.i.l.bf16 %v5670_v10 }
 0x480   : > { %4225 = vrot.lane.b32.xlu0 %v5488_v49, %s4374_s5  ;;  %4210 = vrot.lane.b32.xlu1 %v5406_v0, %s4374_s5  ;;  %v3957_v49 = vunpack.i.l.bf16 %v5604_v13  ;;  %v3972_v0 = vunpack.i.l.bf16 %v5622_v27  ;;  %v3987_v13 = vunpack.i.l.bf16 %v5641_v30  ;;  %v4003_v27 = vunpack.i.h.bf16 %v5658_v44 }
 0x482   : > { %v2362_v7 = vpop.permute.xlu0 %2361  ;;  %v5728_v11 = vpop.permute.xlu1 %4070  ;;  %v1856_v38 = vsel %vm459_vm6, %v3957_v49, %v3958_v12  ;;  %v1855_v63 = vsel %vm459_vm6, %v3972_v0, %v3957_v49  ;;  %v4033_v12 = vunpack.i.h.bf16 %v5684_v59  ;;  %v4058_v0 = vunpack.i.h.bf16 %v5712_v8 }
 0x483   : > { %v3363_v24 = vpack.c.bf16 %v1858_v41, %v1856_v38  ;;  %v3366_v58 = vpack.c.bf16 %v1857_v5, %v1855_v63  ;;  %v4048_v41 = vunpack.i.h.bf16 %v5705_v52  ;;  %v3978_v38 = vunpack.i.h.bf16 %v5628_v40 }
 0x484   : > { %4235 = vrot.lane.b32.xlu0 %v5492_v31, %s4374_s5  ;;  %4220 = vrot.lane.b32.xlu1 %v5490_v20, %s4374_s5  ;;  %v3998_v31 = vunpack.i.h.bf16 %v5648_v4  ;;  %v3988_v20 = vunpack.i.h.bf16 %v5641_v30  ;;  %v4002_v4 = vunpack.i.l.bf16 %v5658_v44  ;;  %v4028_v30 = vunpack.i.h.bf16 %v5686_v53 }
 0x485   : > { %v1861_v44 = vsel %vm459_vm6, %v4003_v27, %v3997_v33  ;;  %v4032_v53 = vunpack.i.l.bf16 %v5684_v59  ;;  %v4062_v27 = vunpack.i.l.bf16 %v5722_v35  ;;  %v3977_v5 = vunpack.i.l.bf16 %v5628_v40 }
 0x486   : > { %v5740_v2 = vpop.permute.xlu0 %2381  ;;  %v2360_v28 = vpop.permute.xlu1 %2359  ;;  %v1862_v47 = vsel %vm459_vm6, %v3997_v33, %v3998_v31  ;;  %v1860_v22 = vsel %vm459_vm6, %v3987_v13, %v3988_v20  ;;  %v1859_v14 = vsel %vm459_vm6, %v4002_v4, %v3987_v13  ;;  %v1866_v34 = vsel %vm459_vm6, %v4027_v51, %v4028_v30 }
 0x487   : > { %v2370_v29 = vsel %vm972_vm5, %v2360_v28, %v2362_v7  ;;  %v4018_v7 = vunpack.i.h.bf16 %v5670_v10  ;;  %v3369_v49 = vpack.c.bf16 %v1862_v47, %v1860_v22  ;;  %v3372_v10 = vpack.c.bf16 %v1861_v44, %v1859_v14 }
 0x488   : > { %4245 = vrot.lane.b32.xlu0 %v5506_v39, %s4374_s5  ;;  %4230 = vrot.lane.b32.xlu1 %v5498_v25, %s4374_s5  ;;  %v1863_v59 = vsel %vm459_vm6, %v4032_v53, %v4017_v1  ;;  %v4047_v31 = vunpack.i.l.bf16 %v5705_v52  ;;  %v4063_v13 = vunpack.i.h.bf16 %v5722_v35  ;;  %v3963_v52 = vunpack.i.h.bf16 %v5614_v50 }
 0x489   : > { %2609 = vmatprep.subr.bf16.mxu1 %v2370_v29  ;;  %v1864_v29 = vsel %vm459_vm6, %v4017_v1, %v4018_v7  ;;  %v3962_v4 = vunpack.i.l.bf16 %v5614_v50  ;;  %v3982_v35 = vunpack.i.l.bf16 %v5630_v18  ;;  %v1962_v50 = vsel %vm564_vm11, %v3977_v5, %v3978_v38 }
 0x48a   : > { %v5757_v37 = vpop.permute.xlu0 %2379  ;;  %v2358_v39 = vpop.permute.xlu1 %2357  ;;  %v3375_v20 = vpack.c.bf16 %v1866_v34, %v1864_v29  ;;  %v1867_v22 = vsel %vm459_vm6, %v4062_v27, %v4047_v31  ;;  %v4008_v44 = vunpack.i.h.bf16 %v5656_v15  ;;  %v3993_v14 = vunpack.i.h.bf16 %v5650_v6 }
 0x48b   : > { %v2369_v25 = vsel %vm972_vm5, %v2358_v39, %v2360_v28  ;;  %v4057_v28 = vunpack.i.l.bf16 %v5712_v8  ;;  %v3983_v39 = vunpack.i.h.bf16 %v5630_v18  ;;  %v1960_v18 = vsel %vm564_vm11, %v3962_v4, %v3963_v52  ;;  %vm6363_vm5 = vmmov %vm6360_vm0 }
 0x48c   : > { %4240 = vrot.lane.b32.xlu1 %v5508_v62, %s4374_s5  ;;  %2610 = vmatpush1.bf16.msra.mxu1 %v2369_v25  ;;  %v3992_v7 = vunpack.i.l.bf16 %v5650_v6  ;;  %v4013_v1 = vunpack.i.h.bf16 %v5664_v43  ;;  %v4038_v6 = vunpack.i.h.bf16 %v5694_v48  ;;  %v4037_v29 = vunpack.i.l.bf16 %v5694_v48 }
 0x48d   : > { %3364 = vmatprep.subr.msk.bf16.mxu1 %vm4865_vm9, %v3363_v24  ;;  %v1870_v63 = vsel %vm459_vm6, %v4057_v28, %v4058_v0  ;;  %v1868_v24 = vsel %vm459_vm6, %v4047_v31, %v4048_v41  ;;  %v1961_v53 = vsel %vm564_vm11, %v3983_v39, %v3977_v5  ;;  %v4043_v38 = vunpack.i.h.bf16 %v5692_v36 }
 0x48e   : > { %v5773_v26 = vpop.permute.xlu0 %2389  ;;  %v5775_v62 = vpop.permute.xlu1 %2383  ;;  %v3381_v30 = vpack.c.bf16 %v1870_v63, %v1868_v24  ;;  %v1970_v63 = vsel %vm564_vm11, %v4037_v29, %v4038_v6  ;;  %v4068_v52 = vunpack.i.h.bf16 %v5720_v45 }
 0x490   : > { %4250 = vrot.lane.b32.xlu1 %v5500_v32, %s4374_s5  ;;  %3367 = vmatpush1.bf16.msk.msra.mxu1 %vm4886_vm10, %v3366_v58  ;;  %v1865_v32 = vsel %vm459_vm6, %v4033_v12, %v4027_v51  ;;  %v1869_v51 = vsel %vm459_vm6, %v4063_v13, %v4057_v28  ;;  %v4007_v58 = vunpack.i.l.bf16 %v5656_v15  ;;  %v1959_v12 = vsel %vm564_vm11, %v3982_v35, %v3962_v4  ;;  %vm6364_vm6 = vmmov %vm6360_vm0 }
 0x491   : > { %3370 = vmatprep.subr.msk.bf16.mxu1 %vm4865_vm9, %v3369_v49  ;;  %v3378_v25 = vpack.c.bf16 %v1865_v32, %v1863_v59  ;;  %v4012_v15 = vunpack.i.l.bf16 %v5664_v43  ;;  %v3384_v49 = vpack.c.bf16 %v1869_v51, %v1867_v22  ;;  %v3387_v28 = vpack.c.bf16 %v1962_v50, %v1960_v18 }
 0x492   : > { %v5791_v33 = vpop.permute.xlu0 %2393  ;;  %v5793_v8 = vpop.permute.xlu1 %2387  ;;  %v1964_v59 = vsel %vm564_vm11, %v3992_v7, %v3993_v14  ;;  %v1965_v41 = vsel %vm564_vm11, %v4013_v1, %v4007_v58  ;;  %v3390_v43 = vpack.c.bf16 %v1961_v53, %v1959_v12  ;;  %v4023_v32 = vunpack.i.h.bf16 %v5677_v61 }
 0x493   : > { %v1963_v31 = vsel %vm564_vm11, %v4012_v15, %v3992_v7  ;;  %v4042_v13 = vunpack.i.l.bf16 %v5692_v36  ;;  %v4067_v4 = vunpack.i.l.bf16 %v5720_v45  ;;  %v4053_v36 = vunpack.i.h.bf16 %v5714_v19 }
 0x494   : > { %3373 = vmatpush1.bf16.msk.msra.mxu1 %vm4886_vm10, %v3372_v10  ;;  %v1966_v10 = vsel %vm564_vm11, %v4007_v58, %v4008_v44  ;;  %v3396_v39 = vpack.c.bf16 %v1965_v41, %v1963_v31  ;;  %v1969_v45 = vsel %vm564_vm11, %v4043_v38, %v4037_v29  ;;  %v4073_v22 = vunpack.i.h.bf16 %v5728_v11 }
 0x495   : > { %3376 = vmatprep.subr.msk.bf16.mxu1 %vm4865_vm9, %v3375_v20  ;;  %v4022_v20 = vunpack.i.l.bf16 %v5677_v61  ;;  %v3393_v5 = vpack.c.bf16 %v1966_v10, %v1964_v59  ;;  %v4072_v50 = vunpack.i.l.bf16 %v5728_v11  ;;  %v1974_v44 = vsel %vm564_vm11, %v4067_v4, %v4068_v52  ;;  %v4285_v10 = vld [vmem:[%s6341_s2 + $0x2c] ss:$20 sps:$4 sm:$0xff]  }
 0x496   : > { %v5810_v40 = vpop.permute.xlu0 %2391  ;;  %v5812_v47 = vpop.permute.xlu1 %2385  ;;  %v1973_v1 = vsel %vm564_vm11, %v4073_v22, %v4067_v4  ;;  %v2403_v59 = vsel %vm1013_vm12, %v5757_v37, %v5740_v2  ;;  %v2406_v41 = vsel %vm1013_vm12, %v5793_v8, %v5773_v26  ;;  %v4288_v26 = vld [vmem:[%s6341_s2 + $0x54] ss:$20 sps:$4 sm:$0xff]  }
 0x497   : > { %v1968_v61 = vsel %vm564_vm11, %v4022_v20, %v4023_v32  ;;  %v1967_v35 = vsel %vm564_vm11, %v4042_v13, %v4022_v20  ;;  %v2405_v31 = vsel %vm1013_vm12, %v5812_v47, %v5793_v8 }
 0x498   : > { %3379 = vmatpush1.bf16.msk.msra.mxu1 %vm4886_vm10, %v3378_v25  ;;  %v4052_v25 = vunpack.i.l.bf16 %v5714_v19  ;;  %v3399_v51 = vpack.c.bf16 %v1970_v63, %v1968_v61  ;;  %v3402_v19 = vpack.c.bf16 %v1969_v45, %v1967_v35 }
 0x499   : > { %3382 = vmatprep.subr.msk.bf16.mxu1 %vm4865_vm9, %v3381_v30 }
 0x49a   : > { %v5830_v34 = vpop.permute.xlu0 %4075  ;;  %v5832_v0 = vpop.permute.xlu1 %2395  ;;  %v1972_v58 = vsel %vm564_vm11, %v4052_v25, %v4053_v36  ;;  %v1971_v11 = vsel %vm564_vm11, %v4072_v50, %v4052_v25  ;;  %vm6365_vm11 = vmmov %vm6360_vm0 }
 0x49b   : > { %v3405_v7 = vpack.c.bf16 %v1974_v44, %v1972_v58  ;;  %v3408_v53 = vpack.c.bf16 %v1973_v1, %v1971_v11  ;;  %v2408_v37 = vsel %vm1013_vm12, %v5791_v33, %v5832_v0  ;;  %v4078_v13 = vunpack.i.h.bf16 %v5830_v34  ;;  %v4291_v58 = vld [vmem:[%s6341_s2 + $0x7c] ss:$20 sps:$4 sm:$0xff]  }
 0x49c   : > { %3385 = vmatpush1.bf16.msk.msra.mxu1 %vm4886_vm10, %v3384_v49  ;;  %v4282_v49 = vld [vmem:[%s6341_s2] ss:$20 sps:$4 sm:$0xff]   ;;  %v4077_v8 = vunpack.i.l.bf16 %v5830_v34  ;;  %v2407_v34 = vsel %vm1013_vm12, %v5810_v40, %v5791_v33 }
 0x49d   : > { %3388 = vmatprep.subr.msk.bf16.mxu1 %vm4487_vm3, %v3387_v28  ;;  %v2404_v28 = vsel %vm1013_vm12, %v5740_v2, %v5775_v62  ;;  %v4287_v2 = vld [vmem:[%s6341_s2 + $0x28] ss:$20 sps:$4 sm:$0xff]  }
 0x49e   : > { %v5847_v48 = vpop.permute.xlu0 %4085  ;;  %v5849_v27 = vpop.permute.xlu1 %4080  ;;  %v2064_v61 = vsel %vm669_vm13, %v4077_v8, %v4078_v13 }
 0x49f   : > { %v4083_v32 = vunpack.i.h.bf16 %v5849_v27  ;;  %v4082_v20 = vunpack.i.l.bf16 %v5849_v27  ;;  %v4088_v47 = vunpack.i.h.bf16 %v5847_v48  ;;  %v4087_v27 = vunpack.i.l.bf16 %v5847_v48 }
 0x4a0   : > { %3391 = vmatpush1.bf16.msk.msra.mxu1 %vm4500_vm4, %v3390_v43 }
 0x4a1   : > { %3394 = vmatprep.subr.msk.bf16.mxu1 %vm4487_vm3, %v3393_v5  ;;  %v2063_v35 = vsel %vm669_vm13, %v4087_v27, %v4077_v8  ;;  %v2065_v36 = vsel %vm669_vm13, %v4088_v47, %v4082_v20  ;;  %v4293_v47 = vld [vmem:[%s6341_s2 + $0x78] ss:$20 sps:$4 sm:$0xff]  }
 0x4a2   : > { %v5863_v24 = vpop.permute.xlu0 %4095  ;;  %v5865_v30 = vpop.permute.xlu1 %4090 }
 0x4a3   : > { %v4098_v38 = vunpack.i.h.bf16 %v5863_v24  ;;  %v4097_v5 = vunpack.i.l.bf16 %v5863_v24  ;;  %v4093_v63 = vunpack.i.h.bf16 %v5865_v30  ;;  %v4092_v0 = vunpack.i.l.bf16 %v5865_v30 }
 0x4a4   : > { %3397 = vmatpush1.bf16.msk.msra.mxu1 %vm4500_vm4, %v3396_v39  ;;  %v2066_v39 = vsel %vm669_vm13, %v4082_v20, %v4083_v32 }
 0x4a5   : > { %3400 = vmatprep.subr.msk.bf16.mxu1 %vm4487_vm3, %v3399_v51  ;;  %v3411_v25 = vpack.c.bf16 %v2066_v39, %v2064_v61  ;;  %v2070_v24 = vsel %vm669_vm13, %v4097_v5, %v4098_v38  ;;  %v2068_v30 = vsel %vm669_vm13, %v4092_v0, %v4093_v63 }
 0x4a6   : > { %v5876_v18 = vpop.permute.xlu0 %4105  ;;  %v5878_v14 = vpop.permute.xlu1 %4100 }
 0x4a7   : > { %v4103_v33 = vunpack.i.h.bf16 %v5878_v14  ;;  %v4102_v51 = vunpack.i.l.bf16 %v5878_v14  ;;  %v3417_v14 = vpack.c.bf16 %v2070_v24, %v2068_v30  ;;  %v4108_v1 = vunpack.i.h.bf16 %v5876_v18 }
 0x4a8   : > { %3403 = vmatpush1.bf16.msk.msra.mxu1 %vm4500_vm4, %v3402_v19  ;;  %v4290_v19 = vld [vmem:[%s6341_s2 + $0x50] ss:$20 sps:$4 sm:$0xff]   ;;  %v4107_v11 = vunpack.i.l.bf16 %v5876_v18 }
 0x4a9   : > { %3406 = vmatprep.subr.msk.bf16.mxu1 %vm4487_vm3, %v3405_v7  ;;  %v3414_v7 = vpack.c.bf16 %v2065_v36, %v2063_v35 }
 0x4aa   : > { %v5886_v12 = vpop.permute.xlu0 %4115  ;;  %v5888_v15 = vpop.permute.xlu1 %4110 }
 0x4ab   : > { %v4113_v22 = vunpack.i.h.bf16 %v5888_v15  ;;  %v4112_v50 = vunpack.i.l.bf16 %v5888_v15 }
 0x4ac   : > { %3409 = vmatpush1.bf16.msk.msra.mxu1 %vm4500_vm4, %v3408_v53  ;;  %v4117_v53 = vunpack.i.l.bf16 %v5886_v12 }
 0x4ad   : > { %2668 = vmatprep.subr.bf16.mxu1 %v2404_v28  ;;  %v2069_v28 = vsel %vm669_vm13, %v4103_v33, %v4097_v5 }
 0x4ae   : > { %v5901_v6 = vpop.permute.xlu0 %4125  ;;  %v5903_v29 = vpop.permute.xlu1 %4120 }
 0x4af   : > { %2628 = vmatmul.mubr.bf16.vlgmr.msra.gmra.mrb[0].mxu1 %v4282_v49  ;;  %v4123_v18 = vunpack.i.h.bf16 %v5903_v29  ;;  %v4122_v32 = vunpack.i.l.bf16 %v5903_v29 }
 0x4b0   : > { %2669 = vmatpush1.bf16.msra.mxu1 %v2403_v59  ;;  %2637 = vmatprep.mubr.bf16.mxu1 %v4285_v10  ;;  %v2067_v10 = vsel %vm669_vm13, %v4102_v51, %v4092_v0  ;;  %v4118_v59 = vunpack.i.h.bf16 %v5886_v12  ;;  %v2072_v12 = vsel %vm669_vm13, %v4107_v11, %v4108_v1  ;;  %v4296_v0 = vld [vmem:[%s6341_s2 + $0xc] ss:$20 sps:$4 sm:$0xff]  }
 0x4b1   : > { %2670 = vmatprep.subr.bf16.mxu1 %v2406_v41  ;;  %v2074_v41 = vsel %vm669_vm13, %v4112_v50, %v4113_v22  ;;  %v3420_v20 = vpack.c.bf16 %v2069_v28, %v2067_v10  ;;  %v2076_v38 = vsel %vm669_vm13, %v4122_v32, %v4123_v18 }
 0x4b2   : > { %v2402_v62 = vpop.permute.xlu0 %2401  ;;  %v5911_v43 = vpop.permute.xlu1 %4130  ;;  %v3423_v13 = vpack.c.bf16 %v2074_v41, %v2072_v12 }
 0x4b3   : > { %v4133_v29 = vunpack.i.h.bf16 %v5911_v43  ;;  %v4132_v8 = vunpack.i.l.bf16 %v5911_v43 }
 0x4b4   : > { %2671 = vmatpush1.bf16.msra.mxu1 %v2405_v31  ;;  %v4127_v31 = vunpack.i.l.bf16 %v5901_v6 }
 0x4b5   : > { %2672 = vmatprep.subr.bf16.mxu1 %v2408_v37  ;;  %v2075_v36 = vsel %vm669_vm13, %v4132_v8, %v4122_v32 }
 0x4b6   : > { %v5935_v52 = vpop.permute.xlu0 %4135  ;;  %v2400_v4 = vpop.permute.xlu1 %2399  ;;  %v2077_v35 = vsel %vm669_vm13, %v4133_v29, %v4127_v31 }
 0x4b7   : > { %v2410_v48 = vsel %vm1013_vm12, %v2400_v4, %v2402_v62  ;;  %2638 = vmatmul.mubr.bf16.gmra.mrb[4].mxu1 %v4287_v2  ;;  %v4128_v62 = vunpack.i.h.bf16 %v5901_v6  ;;  %v2071_v2 = vsel %vm669_vm13, %v4117_v53, %v4107_v11  ;;  %v2073_v6 = vsel %vm669_vm13, %v4118_v59, %v4112_v50 }
 0x4b8   : > { %2673 = vmatpush1.bf16.msra.mxu1 %v2407_v34  ;;  %2647 = vmatprep.mubr.bf16.mxu1 %v4288_v26  ;;  %v3426_v43 = vpack.c.bf16 %v2073_v6, %v2071_v2  ;;  %v4137_v34 = vunpack.i.l.bf16 %v5935_v52 }
 0x4b9   : > { %2674 = vmatprep.subr.bf16.mxu1 %v2410_v48  ;;  %v2078_v27 = vsel %vm669_vm13, %v4127_v31, %v4128_v62  ;;  %vm6367_vm13 = vmmov %vm6360_vm0 }
 0x4ba   : > { %v5948_v40 = vpop.permute.xlu0 %4145  ;;  %v2398_v45 = vpop.permute.xlu1 %2397  ;;  %v3429_v61 = vpack.c.bf16 %v2078_v27, %v2076_v38 }
 0x4bb   : > { %v2409_v44 = vsel %vm1013_vm12, %v2398_v45, %v2400_v4  ;;  %v4138_v4 = vunpack.i.h.bf16 %v5935_v52  ;;  %v4148_v33 = vunpack.i.h.bf16 %v5948_v40  ;;  %v4147_v52 = vunpack.i.l.bf16 %v5948_v40  ;;  %vm6366_vm12 = vmmov %vm6360_vm0 }
 0x4bc   : > { %2675 = vmatpush1.bf16.msra.mxu1 %v2409_v44  ;;  %v3432_v45 = vpack.c.bf16 %v2077_v35, %v2075_v36 }
 0x4bd   : > { %3412 = vmatprep.subr.msk.bf16.mxu1 %vm4865_vm9, %v3411_v25  ;;  %v2168_v51 = vsel %vm774_vm14, %v4137_v34, %v4138_v4 }
 0x4be   : > { %v5965_v15 = vpop.permute.xlu0 %4155  ;;  %v4141_v49 = vpop.permute.xlu1 %4140 }
 0x4bf   : > { %2648 = vmatmul.mubr.bf16.gmra.mrb[8].mxu1 %v4290_v19  ;;  %v4143_v5 = vunpack.i.h.bf16 %v4141_v49  ;;  %v4142_v63 = vunpack.i.l.bf16 %v4141_v49  ;;  %v4158_v22 = vunpack.i.h.bf16 %v5965_v15  ;;  %v4157_v50 = vunpack.i.l.bf16 %v5965_v15 }
 0x4c0   : > { %3415 = vmatpush1.bf16.msk.msra.mxu1 %vm4886_vm10, %v3414_v7  ;;  %2657 = vmatprep.mubr.bf16.mxu1 %v4291_v58  ;;  %v2167_v49 = vsel %vm774_vm14, %v4147_v52, %v4137_v34 }
 0x4c1   : > { %3418 = vmatprep.subr.msk.bf16.mxu1 %vm4865_vm9, %v3417_v14  ;;  %v2170_v25 = vsel %vm774_vm14, %v4142_v63, %v4143_v5  ;;  %v2169_v58 = vsel %vm774_vm14, %v4148_v33, %v4142_v63  ;;  %v2174_v15 = vsel %vm774_vm14, %v4157_v50, %v4158_v22 }
 0x4c2   : > { %v5981_v37 = vpop.permute.xlu0 %4165  ;;  %v4151_v26 = vpop.permute.xlu1 %4150  ;;  %v3435_v7 = vpack.c.bf16 %v2170_v25, %v2168_v51  ;;  %v3438_v28 = vpack.c.bf16 %v2169_v58, %v2167_v49  ;;  %v4294_v49 = vld [vmem:[%s6341_s2 + $0x8] ss:$20 sps:$4 sm:$0xff]  }
 0x4c3   : > { %v4153_v24 = vunpack.i.h.bf16 %v4151_v26  ;;  %v4152_v30 = vunpack.i.l.bf16 %v4151_v26  ;;  %v4168_v10 = vunpack.i.h.bf16 %v5981_v37  ;;  %v4167_v59 = vunpack.i.l.bf16 %v5981_v37 }
 0x4c4   : > { %3421 = vmatpush1.bf16.msk.msra.mxu1 %vm4886_vm10, %v3420_v20 }
 0x4c5   : > { %3424 = vmatprep.subr.msk.bf16.mxu1 %vm4865_vm9, %v3423_v13  ;;  %v2172_v11 = vsel %vm774_vm14, %v4152_v30, %v4153_v24  ;;  %v2176_v37 = vsel %vm774_vm14, %v4167_v59, %v4168_v10 }
 0x4c6   : > { %v4176_v39 = vpop.permute.xlu0 %4175  ;;  %v4161_v48 = vpop.permute.xlu1 %4160  ;;  %v3441_v31 = vpack.c.bf16 %v2174_v15, %v2172_v11 }
 0x4c7   : > { %2658 = vmatmul.mubr.bf16.gmra.mrb[12].mxu1 %v4293_v47  ;;  %v4163_v14 = vunpack.i.h.bf16 %v4161_v48  ;;  %v4162_v1 = vunpack.i.l.bf16 %v4161_v48  ;;  %v4178_v26 = vunpack.i.h.bf16 %v4176_v39  ;;  %v4177_v6 = vunpack.i.l.bf16 %v4176_v39 }
 0x4c8   : > { %3427 = vmatpush1.bf16.msk.msra.mxu1 %vm4886_vm10, %v3426_v43  ;;  %2700 = vmatprep.mubr.bf16.mxu1 %v4296_v0 }
 0x4c9   : > { %3430 = vmatprep.subr.msk.bf16.mxu1 %vm4865_vm9, %v3429_v61  ;;  %v2173_v18 = vsel %vm774_vm14, %v4163_v14, %v4157_v50  ;;  %v2171_v32 = vsel %vm774_vm14, %v4162_v1, %v4152_v30  ;;  %v2175_v4 = vsel %vm774_vm14, %v4177_v6, %v4167_v59  ;;  %v4297_v59 = vld [vmem:[%s6341_s2 + $0x34] ss:$20 sps:$4 sm:$0xff]  }
 0x4ca   : > { %v4186_v44 = vpop.permute.xlu0 %4185  ;;  %v4171_v19 = vpop.permute.xlu1 %4170  ;;  %v3444_v13 = vpack.c.bf16 %v2173_v18, %v2171_v32 }
 0x4cb   : > { %v4173_v40 = vunpack.i.h.bf16 %v4171_v19  ;;  %v4172_v53 = vunpack.i.l.bf16 %v4171_v19  ;;  %v4188_v29 = vunpack.i.h.bf16 %v4186_v44  ;;  %v4187_v8 = vunpack.i.l.bf16 %v4186_v44 }
 0x4cc   : > { %3433 = vmatpush1.bf16.msk.msra.mxu1 %vm4886_vm10, %v3432_v45 }
 0x4cd   : > { %3436 = vmatprep.subr.msk.bf16.mxu1 %vm4487_vm3, %v3435_v7  ;;  %v2178_v12 = vsel %vm774_vm14, %v4172_v53, %v4173_v40  ;;  %v2177_v38 = vsel %vm774_vm14, %v4178_v26, %v4172_v53  ;;  %v2182_v34 = vsel %vm774_vm14, %v4187_v8, %v4188_v29 }
 0x4ce   : > { %v2422_v41 = vpop.permute.xlu0 %2421  ;;  %v4181_v62 = vpop.permute.xlu1 %4180  ;;  %v3447_v5 = vpack.c.bf16 %v2178_v12, %v2176_v37  ;;  %v3450_v39 = vpack.c.bf16 %v2177_v38, %v2175_v4 }
 0x4cf   : > { %v4183_v20 = vunpack.i.h.bf16 %v4181_v62  ;;  %v4182_v2 = vunpack.i.l.bf16 %v4181_v62 }
 0x4d0   : > { %3439 = vmatpush1.bf16.msk.msra.mxu1 %vm4500_vm4, %v3438_v28 }
 0x4d1   : > { %3442 = vmatprep.subr.msk.bf16.mxu1 %vm4487_vm3, %v3441_v31  ;;  %v2180_v43 = vsel %vm774_vm14, %v4182_v2, %v4183_v20 }
 0x4d2   : > { %v2420_v47 = vpop.permute.xlu0 %2419  ;;  %v4191_v27 = vpop.permute.xlu1 %4190  ;;  %v3453_v35 = vpack.c.bf16 %v2182_v34, %v2180_v43 }
 0x4d3   : > { %v4193_v63 = vunpack.i.h.bf16 %v4191_v27  ;;  %v4192_v0 = vunpack.i.l.bf16 %v4191_v27  ;;  %v2443_v22 = vsel %vm1054_vm15, %v2420_v47, %v2422_v41 }
 0x4d4   : > { %3445 = vmatpush1.bf16.msk.msra.mxu1 %vm4500_vm4, %v3444_v13 }
 0x4d5   : > { %3448 = vmatprep.subr.msk.bf16.mxu1 %vm4487_vm3, %v3447_v5  ;;  %v2181_v36 = vsel %vm774_vm14, %v4193_v63, %v4187_v8  ;;  %v2179_v25 = vsel %vm774_vm14, %v4192_v0, %v4182_v2  ;;  %v4299_v5 = vld [vmem:[%s6341_s2 + $0x30] ss:$20 sps:$4 sm:$0xff]   ;;  %vm6368_vm14 = vmmov %vm6360_vm0 }
 0x4d6   : > { %v2430_v48 = vpop.permute.xlu0 %2429  ;;  %v2424_v61 = vpop.permute.xlu1 %2423  ;;  %v3456_v24 = vpack.c.bf16 %v2181_v36, %v2179_v25  ;;  %v4300_v63 = vld [vmem:[%s6341_s2 + $0x5c] ss:$20 sps:$4 sm:$0xff]  }
 0x4d7   : > { %v2444_v52 = vsel %vm1054_vm15, %v2422_v41, %v2424_v61 }
 0x4d8   : > { %3451 = vmatpush1.bf16.msk.msra.mxu1 %vm4500_vm4, %v3450_v39 }
 0x4d9   : > { %3454 = vmatprep.subr.msk.bf16.mxu1 %vm4487_vm3, %v3453_v35  ;;  %vm6361_vm3 = vmmov %vm6360_vm0 }
 0x4da   : > { %v2434_v30 = vpop.permute.xlu0 %2433  ;;  %v2428_v33 = vpop.permute.xlu1 %2427 }
 0x4db   : > { %v2446_v50 = vsel %vm1054_vm15, %v2428_v33, %v2430_v48 }
 0x4dc   : > { %3457 = vmatpush1.bf16.msk.msra.mxu1 %vm4500_vm4, %v3456_v24  ;;  %vm6362_vm4 = vmmov %vm6360_vm0 }
 0x4dd   : > { %2692 = vmatprep.subr.bf16.mxu1 %v2444_v52 }
 0x4de   : > { %v2432_v45 = vpop.permute.xlu0 %2431  ;;  %v2426_v51 = vpop.permute.xlu1 %2425 }
 0x4df   : > { %v2445_v19 = vsel %vm1054_vm15, %v2426_v51, %v2428_v33  ;;  %v2447_v14 = vsel %vm1054_vm15, %v2432_v45, %v2434_v30 }
 0x4e0   : > { %2693 = vmatpush1.bf16.msra.mxu1 %v2443_v22 }
 0x4e1   : > { %2694 = vmatprep.subr.bf16.mxu1 %v2446_v50 }
 0x4e2   : > { %v2442_v44 = vpop.permute.xlu0 %2441  ;;  %v2436_v55 = vpop.permute.xlu1 %2435 }
 0x4e3   : > { %v2448_v58 = vsel %vm1054_vm15, %v2434_v30, %v2436_v55 }
 0x4e4   : > { %2695 = vmatpush1.bf16.msra.mxu1 %v2445_v19 }
 0x4e5   : > { %2696 = vmatprep.subr.bf16.mxu1 %v2448_v58  ;;  %v4303_v58 = vld [vmem:[%s6341_s2 + $0x84] ss:$20 sps:$4 sm:$0xff]  }
 0x4e6   : > { %v4196_v60 = vpop.permute.xlu0 %4195  ;;  %v2440_v7 = vpop.permute.xlu1 %2439 }
 0x4e7   : > { %v2450_v1 = vsel %vm1054_vm15, %v2440_v7, %v2442_v44  ;;  %v4198_v15 = vunpack.i.h.bf16 %v4196_v60  ;;  %v4197_v28 = vunpack.i.l.bf16 %v4196_v60  ;;  %v4302_v44 = vld [vmem:[%s6341_s2 + $0x58] ss:$20 sps:$4 sm:$0xff]  }
 0x4e8   : > { %2697 = vmatpush1.bf16.msra.mxu1 %v2447_v14 }
 0x4e9   : > { %2698 = vmatprep.subr.bf16.mxu1 %v2450_v1  ;;  %v2272_v12 = vsel %vm6360_vm0, %v4197_v28, %v4198_v15 }
 0x4ea   : > { %v4206_v11 = vpop.permute.xlu0 %4205  ;;  %v2438_v40 = vpop.permute.xlu1 %2437 }
 0x4eb   : > { %v2449_v53 = vsel %vm1054_vm15, %v2438_v40, %v2440_v7  ;;  %v4207_v10 = vunpack.i.l.bf16 %v4206_v11  ;;  %v4208_v31 = vunpack.i.h.bf16 %v4206_v11  ;;  %vm6369_vm15 = vmmov %vm6360_vm0 }
 0x4ec   : > { %2699 = vmatpush1.bf16.msra.mxu1 %v2449_v53 }
 0x4ed   : > { %v2271_v20 = vsel %vm6361_vm3, %v4207_v10, %v4197_v28  ;;  %vm6374_vm3 = vmmov %vm6360_vm0 }
 0x4ee   : > { %v4216_v41 = vpop.permute.xlu0 %4215  ;;  %v4201_v62 = vpop.permute.xlu1 %4200 }
 0x4ef   : > { %v4203_v18 = vunpack.i.h.bf16 %v4201_v62  ;;  %v4202_v32 = vunpack.i.l.bf16 %v4201_v62  ;;  %2701 = vmatmul.mubr.bf16.vlgmr.msra.gmra.mrb[0].mxu1 %v4294_v49  ;;  %v4218_v2 = vunpack.i.h.bf16 %v4216_v41  ;;  %v4217_v26 = vunpack.i.l.bf16 %v4216_v41 }
 0x4f0   : > { %2710 = vmatprep.mubr.bf16.mxu1 %v4297_v59 }
 0x4f1   : > { %v2273_v6 = vsel %vm6362_vm4, %v4208_v31, %v4202_v32  ;;  %v2274_v37 = vsel %vm6363_vm5, %v4202_v32, %v4203_v18  ;;  %v2278_v0 = vsel %vm6364_vm6, %v4217_v26, %v4218_v2  ;;  %v4305_v18 = vld [vmem:[%s6341_s2 + $0x80] ss:$20 sps:$4 sm:$0xff]   ;;  %v4306_v2 = vld [vmem:[%s6341_s2 + $0x10] ss:$20 sps:$4 sm:$0xff]   ;;  %vm6375_vm4 = vcmask 523264  }
 0x4f2   : > { %v3459_v13 = vpack.c.bf16 %v2274_v37, %v2272_v12  ;;  %v3462_v29 = vpack.c.bf16 %v2273_v6, %v2271_v20  ;;  %v4226_v8 = vpop.permute.xlu0 %4225  ;;  %v4211_v47 = vpop.permute.xlu1 %4210  ;;  %vm6378_vm5 = vmmov %vm6375_vm4 }
 0x4f3   : > { %v4213_v27 = vunpack.i.h.bf16 %v4211_v47  ;;  %v4212_v38 = vunpack.i.l.bf16 %v4211_v47  ;;  %v4228_v35 = vunpack.i.h.bf16 %v4226_v8  ;;  %v4227_v36 = vunpack.i.l.bf16 %v4226_v8 }
 0x4f4   : > { %3460 = vmatprep.subr.msk.bf16.mxu1 %vm4865_vm9, %v3459_v13 }
 0x4f5   : > { %v2276_v43 = vsel %vm6365_vm11, %v4212_v38, %v4213_v27  ;;  %3463 = vmatpush1.bf16.msk.msra.mxu1 %vm4886_vm10, %v3462_v29  ;;  %v2280_v55 = vsel %vm6368_vm14, %v4227_v36, %v4228_v35 }
 0x4f6   : > { %v3465_v4 = vpack.c.bf16 %v2278_v0, %v2276_v43  ;;  %v4236_v34 = vpop.permute.xlu0 %4235  ;;  %v4221_v39 = vpop.permute.xlu1 %4220 }
 0x4f7   : > { %v4223_v48 = vunpack.i.h.bf16 %v4221_v39  ;;  %v4222_v61 = vunpack.i.l.bf16 %v4221_v39  ;;  %2711 = vmatmul.mubr.bf16.gmra.mrb[4].mxu1 %v4299_v5  ;;  %v4237_v25 = vunpack.i.l.bf16 %v4236_v34  ;;  %v4238_v51 = vunpack.i.h.bf16 %v4236_v34 }
 0x4f8   : > { %3466 = vmatprep.subr.msk.bf16.mxu1 %vm4865_vm9, %v3465_v4  ;;  %2720 = vmatprep.mubr.bf16.mxu1 %v4300_v63 }
 0x4f9   : > { %v2277_v24 = vsel %vm6366_vm12, %v4223_v48, %v4217_v26  ;;  %v2275_v30 = vsel %vm6367_vm13, %v4222_v61, %v4212_v38  ;;  %v2279_v19 = vsel %vm6369_vm15, %v4237_v25, %v4227_v36  ;;  %v4309_v26 = vld [vmem:[%s6341_s2 + $0x88] ss:$20 sps:$4 sm:$0xff]  }
 0x4fa   : > { %v3468_v33 = vpack.c.bf16 %v2277_v24, %v2275_v30  ;;  %v4246_v52 = vpop.permute.xlu0 %4245  ;;  %v4231_v45 = vpop.permute.xlu1 %4230 }
 0x4fb   : > { %v4233_v22 = vunpack.i.h.bf16 %v4231_v45  ;;  %v4232_v50 = vunpack.i.l.bf16 %v4231_v45  ;;  %v4248_v60 = vunpack.i.h.bf16 %v4246_v52  ;;  %v4247_v7 = vunpack.i.l.bf16 %v4246_v52 }
 0x4fc   : > { %3469 = vmatpush1.bf16.msk.msra.mxu1 %vm4886_vm10, %v3468_v33 }
 0x4fd   : > { %v2281_v14 = vsel %vm6370_vm7, %v4238_v51, %v4232_v50  ;;  %v2282_v1 = vsel %vm6371_vm8, %v4232_v50, %v4233_v22  ;;  %v2286_v28 = vsel %vm6372_vm1, %v4247_v7, %v4248_v60 }
 0x4fe   : > { %v3471_v11 = vpack.c.bf16 %v2282_v1, %v2280_v55  ;;  %v3474_v40 = vpack.c.bf16 %v2281_v14, %v2279_v19  ;;  %v4241_v53 = vpop.permute.xlu1 %4240 }
 0x4ff   : > { %v4243_v49 = vunpack.i.h.bf16 %v4241_v53  ;;  %v4242_v15 = vunpack.i.l.bf16 %v4241_v53  ;;  %2721 = vmatmul.mubr.bf16.gmra.mrb[8].mxu1 %v4302_v44 }
 0x500   : > { %3472 = vmatprep.subr.msk.bf16.mxu1 %vm4865_vm9, %v3471_v11  ;;  %2730 = vmatprep.mubr.bf16.mxu1 %v4303_v58 }
 0x501   : > { %v2284_v10 = vsel %vm6373_vm2, %v4242_v15, %v4243_v49  ;;  %3475 = vmatpush1.bf16.msk.msra.mxu1 %vm4886_vm10, %v3474_v40 }
 0x502   : > { %v3477_v59 = vpack.c.bf16 %v2286_v28, %v2284_v10  ;;  %v4251_v41 = vpop.permute.xlu1 %4250 }
 0x503   : > { %v4253_v62 = vunpack.i.h.bf16 %v4251_v41  ;;  %v4252_v31 = vunpack.i.l.bf16 %v4251_v41 }
 0x504   : > { %3478 = vmatprep.subr.msk.bf16.mxu1 %vm4865_vm9, %v3477_v59  ;;  %vm6376_vm9 = vmmov %vm6375_vm4 }
 0x505   : > { %v2285_v32 = vsel %vm6360_vm0, %v4253_v62, %v4247_v7  ;;  %v2283_v12 = vsel %vm6374_vm3, %v4252_v31, %v4242_v15 }
 0x506   : > { %v3480_v20 = vpack.c.bf16 %v2285_v32, %v2283_v12 }
 0x507   : > { %2731 = vmatmul.mubr.bf16.gmra.mrb[12].mxu1 %v4305_v18 }
 0x508   : > { %3481 = vmatpush1.bf16.msk.msra.mxu1 %vm4886_vm10, %v3480_v20  ;;  %2773 = vmatprep.mubr.bf16.mxu1 %v4375_v17  ;;  %vm6377_vm10 = vmmov %vm6375_vm4 }
 0x50f   : > { %3482 = vmatmul.mubr.msk.bf16.vlgmr.msra.gmra.mrb[0].mxu1 %vm6375_vm4, %v4306_v2 }
 0x510   : > { %2783 = vmatprep.mubr.bf16.mxu1 %v4375_v17 }
 0x517   : > { %3483 = vmatmul.mubr.msk.bf16.gmra.mrb[4].mxu1 %vm6376_vm9, %v4307_v16 }
 0x518   : > { %2793 = vmatprep.mubr.bf16.mxu1 %v4375_v17 }
 0x51f   : > { %3484 = vmatmul.mubr.msk.bf16.gmra.mrb[8].mxu1 %vm6377_vm10, %v4308_v56 }
 0x520   : > { %2803 = vmatprep.mubr.bf16.mxu1 %v4375_v17 }
 0x527   : > { %3485 = vmatmul.mubr.msk.bf16.gmra.mrb[12].mxu1 %vm6378_vm5, %v4309_v26 }
 0x5e2   : > { %v6127_v6 = vpop.f32.mrb[0].mxu1 }
 0x5e3   : > { %v2838_v37 = vmul.f32 %v6127_v6, %v6127_v6  ;;  %v6131_v13 = vpop.f32.mrb[1].mxu1 }
 0x5e4   : > { %v2814_v29 = vadd.f32 %v6131_v13, %v6127_v6  ;;  %v2839_v8 = vmul.f32 %v6131_v13, %v6131_v13  ;;  %v6137_v17 = vpop.f32.mrb[2].mxu1 }
 0x5e5   : > { %v2840_v47 = vmul.f32 %v6137_v17, %v6137_v17  ;;  %v6141_v27 = vpop.f32.mrb[3].mxu1 }
 0x5e6   : > { %v2817_v38 = vadd.f32 %v6141_v27, %v6137_v17  ;;  %v2841_v5 = vmul.f32 %v6141_v27, %v6141_v27  ;;  %2815 = vadd.xlane.f32.xlu0 %v2814_v29  ;;  %v2854_v63 = vadd.f32 %v2839_v8, %v2838_v37 }
 0x5e8   : > { %2818 = vadd.xlane.f32.xlu1 %v2817_v38  ;;  %v2857_v0 = vadd.f32 %v2841_v5, %v2840_v47 }
 0x5ea   : > { %2858 = vadd.xlane.f32.xlu0 %v2857_v0  ;;  %v6147_v43 = vpop.f32.mrb[4].mxu1 }
 0x5eb   : > { %v2842_v4 = vmul.f32 %v6147_v43, %v6147_v43  ;;  %v6151_v34 = vpop.f32.mrb[5].mxu1 }
 0x5ec   : > { %v2820_v39 = vadd.f32 %v6151_v34, %v6147_v43  ;;  %v2843_v48 = vmul.f32 %v6151_v34, %v6151_v34  ;;  %2855 = vadd.xlane.f32.xlu1 %v2854_v63  ;;  %v6157_v61 = vpop.f32.mrb[6].mxu1 }
 0x5ed   : > { %v2844_v35 = vmul.f32 %v6157_v61, %v6157_v61  ;;  %v6161_v36 = vpop.f32.mrb[7].mxu1 }
 0x5ee   : > { %v2823_v25 = vadd.f32 %v6161_v36, %v6157_v61  ;;  %v2845_v24 = vmul.f32 %v6161_v36, %v6161_v36  ;;  %2821 = vadd.xlane.f32.xlu0 %v2820_v39  ;;  %v2860_v30 = vadd.f32 %v2843_v48, %v2842_v4 }
 0x5f0   : > { %2861 = vadd.xlane.f32.xlu1 %v2860_v30  ;;  %v2863_v33 = vadd.f32 %v2845_v24, %v2844_v35 }
 0x5f2   : > { %2824 = vadd.xlane.f32.xlu0 %v2823_v25  ;;  %v6167_v52 = vpop.f32.mrb[8].mxu1 }
 0x5f3   : > { %v2846_v45 = vmul.f32 %v6167_v52, %v6167_v52  ;;  %v6171_v51 = vpop.f32.mrb[9].mxu1 }
 0x5f4   : > { %v2826_v22 = vadd.f32 %v6171_v51, %v6167_v52  ;;  %v2847_v50 = vmul.f32 %v6171_v51, %v6171_v51  ;;  %v6177_v44 = vpop.f32.mrb[10].mxu1 }
 0x5f5   : > { %v2848_v55 = vmul.f32 %v6177_v44, %v6177_v44  ;;  %v6181_v19 = vpop.f32.mrb[11].mxu1 }
 0x5f6   : > { %v2829_v58 = vadd.f32 %v6181_v19, %v6177_v44  ;;  %v2849_v60 = vmul.f32 %v6181_v19, %v6181_v19  ;;  %2864 = vadd.xlane.f32.xlu0 %v2863_v33  ;;  %2827 = vadd.xlane.f32.xlu1 %v2826_v22  ;;  %v2866_v7 = vadd.f32 %v2847_v50, %v2846_v45 }
 0x5f8   : > { %v2869_v14 = vadd.f32 %v2849_v60, %v2848_v55 }
 0x5fa   : > { %2867 = vadd.xlane.f32.xlu1 %v2866_v7  ;;  %2830 = vadd.xlane.f32.xlu0 %v2829_v58  ;;  %v6187_v1 = vpop.f32.mrb[12].mxu1 }
 0x5fb   : > { %v2850_v11 = vmul.f32 %v6187_v1, %v6187_v1  ;;  %v6191_v40 = vpop.f32.mrb[13].mxu1 }
 0x5fc   : > { %v2832_v53 = vadd.f32 %v6191_v40, %v6187_v1  ;;  %v2851_v49 = vmul.f32 %v6191_v40, %v6191_v40  ;;  %v6197_v15 = vpop.f32.mrb[14].mxu1 }
 0x5fd   : > { %v2852_v28 = vmul.f32 %v6197_v15, %v6197_v15  ;;  %v6201_v10 = vpop.f32.mrb[15].mxu1 }
 0x5fe   : > { %v2835_v59 = vadd.f32 %v6201_v10, %v6197_v15  ;;  %v2853_v41 = vmul.f32 %v6201_v10, %v6201_v10  ;;  %2870 = vadd.xlane.f32.xlu0 %v2869_v14  ;;  %2833 = vadd.xlane.f32.xlu1 %v2832_v53  ;;  %v2872_v62 = vadd.f32 %v2851_v49, %v2850_v11 }
 0x600   : > { %v2875_v31 = vadd.f32 %v2853_v41, %v2852_v28 }
 0x602   : > { %2873 = vadd.xlane.f32.xlu1 %v2872_v62  ;;  %2836 = vadd.xlane.f32.xlu0 %v2835_v59 }
 0x606   : > { %2876 = vadd.xlane.f32.xlu0 %v2875_v31 }
 0x673   : > { %v2816_v18 = vpop.xlane.xlu0 %2815 }
 0x674   : > { %v2878_v12 = vmul.f32 0.00390625, %v2816_v18 }
 0x675   : > { %v2819_v32 = vpop.xlane.xlu1 %2818 }
 0x676   : > { %v2879_v20 = vmul.f32 0.00390625, %v2819_v32  ;;  %v2894_v29 = vmul.f32 %v2878_v12, %v2878_v12  ;;  %v2910_v58 = vsub.f32 %v6127_v6, %v2878_v12  ;;  %v2911_v7 = vsub.f32 %v6131_v13, %v2878_v12 }
 0x677   : > { %v2859_v2 = vpop.xlane.xlu0 %2858 }
 0x678   : > { %v2887_v16 = vmul.f32 0.00390625, %v2859_v2  ;;  %v2895_v56 = vmul.f32 %v2879_v20, %v2879_v20  ;;  %v2912_v14 = vsub.f32 %v6137_v17, %v2879_v20  ;;  %v2913_v11 = vsub.f32 %v6141_v27, %v2879_v20 }
 0x679   : > { %v2856_v26 = vpop.xlane.xlu1 %2855 }
 0x67a   : > { %v2903_v37 = vsub.f32 %v2887_v16, %v2895_v56  ;;  %v2886_v8 = vmul.f32 0.00390625, %v2856_v26 }
 0x67b   : > { %v2822_v47 = vpop.xlane.xlu0 %2821 }
 0x67c   : > { %v2927_v38 = vadd.f32 1e-05, %v2903_v37  ;;  %v2902_v5 = vsub.f32 %v2886_v8, %v2894_v29  ;;  %v6207_v63 = vmul.f32 0.00390625, %v2822_v47 }
 0x67d   : > { %v2862_v0 = vpop.xlane.xlu1 %2861 }
 0x67e   : > { %4326 = vrsqrt.f32 %v2927_v38  ;;  %v2926_v4 = vadd.f32 1e-05, %v2902_v5  ;;  %v2888_v39 = vmul.f32 0.00390625, %v2862_v0  ;;  %v2896_v48 = vmul.f32 %v6207_v63, %v6207_v63  ;;  %v4342_v38 = vld [vmem:[%s4417_s20 + $0x10] sm:$0xff] }
 0x67f   : > { %v2825_v35 = vpop.xlane.xlu0 %2824  ;;  %v2914_v53 = vsub.f32 %v6147_v43, %v6207_v63  ;;  %v2915_v41 = vsub.f32 %v6151_v34, %v6207_v63  ;;  %v4343_v63 = vld [vmem:[%s4417_s20 + $0x18] sm:$0xff] }
 0x680   : > { %4328 = vrsqrt.f32 %v2926_v4  ;;  %v6211_v25 = vmul.f32 0.00390625, %v2825_v35  ;;  %v2904_v24 = vsub.f32 %v2888_v39, %v2896_v48 }
 0x682   : > { %v2928_v30 = vadd.f32 1e-05, %v2904_v24  ;;  %v2897_v22 = vmul.f32 %v6211_v25, %v6211_v25  ;;  %v2916_v17 = vsub.f32 %v6157_v61, %v6211_v25  ;;  %v2917_v43 = vsub.f32 %v6161_v36, %v6211_v25 }
 0x683   : > { %v2865_v33 = vpop.xlane.xlu0 %2864  ;;  %v2828_v45 = vpop.xlane.xlu1 %2827 }
 0x684   : > { %v2889_v50 = vmul.f32 0.00390625, %v2865_v33  ;;  %v6215_v55 = vmul.f32 0.00390625, %v2828_v45  ;;  %4330 = vrsqrt.f32 %v2928_v30 }
 0x686   : > { %v2905_v60 = vsub.f32 %v2889_v50, %v2897_v22  ;;  %v2898_v6 = vmul.f32 %v6215_v55, %v6215_v55  ;;  %v2918_v34 = vsub.f32 %v6167_v52, %v6215_v55  ;;  %v2919_v26 = vsub.f32 %v6171_v51, %v6215_v55 }
 0x687   : > { %v2868_v49 = vpop.xlane.xlu1 %2867  ;;  %v2831_v28 = vpop.xlane.xlu0 %2830 }
 0x688   : > { %v4327_v59 = vpop.eup %4326  ;;  %v2929_v62 = vadd.f32 1e-05, %v2905_v60  ;;  %v2890_v31 = vmul.f32 0.00390625, %v2868_v49  ;;  %v6229_v27 = vmul.f32 0.00390625, %v2831_v28  ;;  %v4344_v60 = vld [vmem:[%s4417_s20] sm:$0xff] }
 0x689   : > { %v2944_v18 = vmul.f32 %v4327_v59, %v2912_v14  ;;  %v2945_v13 = vmul.f32 %v4327_v59, %v2913_v11  ;;  %v4345_v14 = vld [vmem:[%s4417_s20 + $0x8] sm:$0xff] }
 0x68a   : > { %v4329_v32 = vpop.eup %4328  ;;  %4332 = vrsqrt.f32 %v2929_v62  ;;  %v2906_v12 = vsub.f32 %v2890_v31, %v2898_v6  ;;  %v6241_v8 = vmul.f32 %v6229_v27, %v6229_v27 }
 0x68b   : > { %vm2960_vm6 = vcmp.gt.f32.partialorder %v2944_v18, 0.0  ;;  %vm2961_vm11 = vcmp.gt.f32.partialorder %v2945_v13, 0.0  ;;  %v2976_v20 = vmul.f32 %v2944_v18, %v5361_v21  ;;  %v2977_v2 = vmul.f32 %v2945_v13, %v5361_v21  ;;  %v2871_v61 = vpop.xlane.xlu0 %2870 }
 0x68c   : > { %v2942_v16 = vmul.f32 %v4329_v32, %v2910_v58  ;;  %v2943_v56 = vmul.f32 %v4329_v32, %v2911_v7  ;;  %v2930_v36 = vadd.f32 1e-05, %v2906_v12  ;;  %v6243_v47 = vmul.f32 0.00390625, %v2871_v61  ;;  %v4346_v12 = vld [vmem:[%s4417_s20 + $0x20] sm:$0xff] }
 0x68d   : > { %v2992_v37 = vsel %vm2960_vm6, %v2944_v18, %v2976_v20  ;;  %v2993_v29 = vsel %vm2961_vm11, %v2945_v13, %v2977_v2  ;;  %v2834_v18 = vpop.xlane.xlu1 %2833  ;;  %v4347_v2 = vld [vmem:[%s4417_s20 + $0x28] sm:$0xff] }
 0x68e   : > { %v3008_v5 = vadd.f32 %v4342_v38, %v2992_v37  ;;  %v3009_v0 = vadd.f32 %v4343_v63, %v2993_v29  ;;  %vm2958_vm12 = vcmp.gt.f32.partialorder %v2942_v16, 0.0  ;;  %vm2959_vm13 = vcmp.gt.f32.partialorder %v2943_v56, 0.0  ;;  %v4331_v4 = vpop.eup %4330  ;;  %v4348_v63 = vld [vmem:[%s4417_s20 + $0x30] sm:$0xff] }
 0x68f   : > { %v2974_v39 = vmul.f32 %v2942_v16, %v5301_v42  ;;  %v2975_v48 = vmul.f32 %v2943_v56, %v5301_v42  ;;  %4334 = vrsqrt.f32 %v2930_v36  ;;  %v2907_v35 = vsub.f32 %v6243_v47, %v6241_v8 }
 0x690   : > { %vm3024_vm14 = vcmp.gt.f32.partialorder %v3008_v5, 0.0  ;;  %vm3025_vm15 = vcmp.gt.f32.partialorder %v3009_v0, 0.0  ;;  %v3040_v25 = vmul.f32 %v3008_v5, %v5361_v21  ;;  %v3041_v24 = vmul.f32 %v3009_v0, %v5361_v21 }
 0x691   : > { %v2990_v30 = vsel %vm2958_vm12, %v2942_v16, %v2974_v39  ;;  %v2991_v33 = vsel %vm2959_vm13, %v2943_v56, %v2975_v48  ;;  %v2946_v45 = vmul.f32 %v4331_v4, %v2914_v53  ;;  %v2947_v22 = vmul.f32 %v4331_v4, %v2915_v41  ;;  %v2837_v16 = vpop.xlane.xlu0 %2836  ;;  %v4349_v4 = vld [vmem:[%s4417_s20 + $0x38] sm:$0xff] }
 0x692   : > { %v3056_v50 = vsel %vm3024_vm14, %v3008_v5, %v3040_v25  ;;  %v3057_v58 = vsel %vm3025_vm15, %v3009_v0, %v3041_v24  ;;  %v3006_v7 = vadd.f32 %v4344_v60, %v2990_v30  ;;  %v3007_v11 = vadd.f32 %v4345_v14, %v2991_v33 }
 0x693   : > { %3072 = vst [vmem:[%s6256_s6 + $0x10] sm:$0xff] %v3056_v50  ;;  %3073 = vst [vmem:[%s6256_s6 + $0x18] sm:$0xff] %v3057_v58  ;;  %vm2962_vm7 = vcmp.gt.f32.partialorder %v2946_v45, 0.0  ;;  %vm2963_vm8 = vcmp.gt.f32.partialorder %v2947_v22, 0.0  ;;  %v2978_v49 = vmul.f32 %v2946_v45, %v5342_v54  ;;  %v2979_v21 = vmul.f32 %v2947_v22, %v5342_v54  ;;  %v4350_v58 = vld [vmem:[%s4417_s20 + $0x40] sm:$0xff] }
 0x694   : > { %v4333_v28 = vpop.eup %4332  ;;  %vm3022_vm1 = vcmp.gt.f32.partialorder %v3006_v7, 0.0  ;;  %vm3023_vm2 = vcmp.gt.f32.partialorder %v3007_v11, 0.0  ;;  %v3038_v53 = vmul.f32 %v3006_v7, %v5301_v42  ;;  %v3039_v59 = vmul.f32 %v3007_v11, %v5301_v42 }
 0x695   : > { %v2994_v41 = vsel %vm2962_vm7, %v2946_v45, %v2978_v49  ;;  %v2995_v62 = vsel %vm2963_vm8, %v2947_v22, %v2979_v21  ;;  %v2948_v6 = vmul.f32 %v4333_v28, %v2916_v17  ;;  %v2949_v31 = vmul.f32 %v4333_v28, %v2917_v43  ;;  %v2877_v30 = vpop.xlane.xlu0 %2876 }
 0x696   : > { %v3054_v13 = vsel %vm3022_vm1, %v3006_v7, %v3038_v53  ;;  %v3055_v32 = vsel %vm3023_vm2, %v3007_v11, %v3039_v59  ;;  %v3010_v20 = vadd.f32 %v4346_v12, %v2994_v41  ;;  %v3011_v61 = vadd.f32 %v4347_v2, %v2995_v62  ;;  %v4351_v7 = vld [vmem:[%s4417_s20 + $0x48] sm:$0xff] }
 0x697   : > { %3070 = vst [vmem:[%s6256_s6] sm:$0xff] %v3054_v13  ;;  %3071 = vst [vmem:[%s6256_s6 + $0x8] sm:$0xff] %v3055_v32  ;;  %vm2964_vm0 = vcmp.gt.f32.partialorder %v2948_v6, 0.0  ;;  %vm2965_vm3 = vcmp.gt.f32.partialorder %v2949_v31, 0.0  ;;  %v2980_v42 = vmul.f32 %v2948_v6, %v5350_v9  ;;  %v2981_v56 = vmul.f32 %v2949_v31, %v5350_v9 }
 0x698   : > { %vm3026_vm4 = vcmp.gt.f32.partialorder %v3010_v20, 0.0  ;;  %vm3027_vm9 = vcmp.gt.f32.partialorder %v3011_v61, 0.0  ;;  %v3042_v17 = vmul.f32 %v3010_v20, %v5342_v54  ;;  %v3043_v43 = vmul.f32 %v3011_v61, %v5342_v54 }
 0x699   : > { %v4335_v36 = vpop.eup %4334  ;;  %v2996_v37 = vsel %vm2964_vm0, %v2948_v6, %v2980_v42  ;;  %v2997_v29 = vsel %vm2965_vm3, %v2949_v31, %v2981_v56  ;;  %v2931_v8 = vadd.f32 1e-05, %v2907_v35  ;;  %v6276_v47 = vmul.f32 0.00390625, %v2834_v18  ;;  %v2874_v35 = vpop.xlane.xlu1 %2873 }
 0x69a   : > { %v3058_v38 = vsel %vm3026_vm4, %v3010_v20, %v3042_v17  ;;  %v3059_v5 = vsel %vm3027_vm9, %v3011_v61, %v3043_v43  ;;  %v3012_v0 = vadd.f32 %v4348_v63, %v2996_v37  ;;  %v3013_v39 = vadd.f32 %v4349_v4, %v2997_v29  ;;  %v4353_v61 = vld [vmem:[%s4417_s20 + $0x58] sm:$0xff] }
 0x69b   : > { %3074 = vst [vmem:[%s6256_s6 + $0x20] sm:$0xff] %v3058_v38  ;;  %3075 = vst [vmem:[%s6256_s6 + $0x28] sm:$0xff] %v3059_v5  ;;  %v2950_v48 = vmul.f32 %v4335_v36, %v2918_v34  ;;  %v2951_v54 = vmul.f32 %v4335_v36, %v2919_v26  ;;  %4336 = vrsqrt.f32 %v2931_v8  ;;  %v2900_v26 = vmul.f32 %v6276_v47, %v6276_v47 }
 0x69c   : > { %vm3028_vm10 = vcmp.gt.f32.partialorder %v3012_v0, 0.0  ;;  %vm3029_vm5 = vcmp.gt.f32.partialorder %v3013_v39, 0.0  ;;  %v3044_v25 = vmul.f32 %v3012_v0, %v5350_v9  ;;  %v3045_v24 = vmul.f32 %v3013_v39, %v5350_v9 }
 0x69d   : > { %vm2966_vm6 = vcmp.gt.f32.partialorder %v2950_v48, 0.0  ;;  %vm2967_vm11 = vcmp.gt.f32.partialorder %v2951_v54, 0.0  ;;  %v2982_v52 = vmul.f32 %v2950_v48, %v5359_v46  ;;  %v2983_v51 = vmul.f32 %v2951_v54, %v5359_v46 }
 0x69e   : > { %v3060_v55 = vsel %vm3028_vm10, %v3012_v0, %v3044_v25  ;;  %v3061_v34 = vsel %vm3029_vm5, %v3013_v39, %v3045_v24  ;;  %v2892_v33 = vmul.f32 0.00390625, %v2874_v35  ;;  %v2885_v9 = vmul.f32 0.00390625, %v2837_v16  ;;  %v4355_v35 = vld [vmem:[%s4417_s20 + $0x68] sm:$0xff] }
 0x69f   : > { %3076 = vst [vmem:[%s6256_s6 + $0x30] sm:$0xff] %v3060_v55  ;;  %3077 = vst [vmem:[%s6256_s6 + $0x38] sm:$0xff] %v3061_v34  ;;  %v2998_v45 = vsel %vm2966_vm6, %v2950_v48, %v2982_v52  ;;  %v2999_v22 = vsel %vm2967_vm11, %v2951_v54, %v2983_v51  ;;  %v2893_v50 = vmul.f32 0.00390625, %v2877_v30  ;;  %v2920_v6 = vsub.f32 %v6177_v44, %v6229_v27  ;;  %v4354_v48 = vld [vmem:[%s4417_s20 + $0x60] sm:$0xff] }
 0x6a0   : > { %v3014_v60 = vadd.f32 %v4350_v58, %v2998_v45  ;;  %v3015_v14 = vadd.f32 %v4351_v7, %v2999_v22  ;;  %v2908_v11 = vsub.f32 %v2892_v33, %v2900_v26  ;;  %v2901_v49 = vmul.f32 %v2885_v9, %v2885_v9  ;;  %v4356_v26 = vld [vmem:[%s4417_s20 + $0x70] sm:$0xff]  ;;  %v4357_v45 = vld [vmem:[%s4417_s20 + $0x78] sm:$0xff] }
 0x6a1   : > { %v2921_v31 = vsub.f32 %v6181_v19, %v6229_v27  ;;  %v4352_v19 = vld [vmem:[%s4417_s20 + $0x50] sm:$0xff]  ;;  %v2922_v17 = vsub.f32 %v6187_v1, %v6276_v47  ;;  %v2923_v43 = vsub.f32 %v6191_v40, %v6276_v47  ;;  %v2924_v63 = vsub.f32 %v6197_v15, %v2885_v9 }
 0x6a2   : > { %vm3030_vm12 = vcmp.gt.f32.partialorder %v3014_v60, 0.0  ;;  %vm3031_vm13 = vcmp.gt.f32.partialorder %v3015_v14, 0.0  ;;  %v3046_v21 = vmul.f32 %v3014_v60, %v5359_v46  ;;  %v3047_v28 = vmul.f32 %v3015_v14, %v5359_v46 }
 0x6a3   : > { %v2932_v53 = vadd.f32 1e-05, %v2908_v11  ;;  %v2909_v59 = vsub.f32 %v2893_v50, %v2901_v49 }
 0x6a4   : > { %v3062_v41 = vsel %vm3030_vm12, %v3014_v60, %v3046_v21  ;;  %v3063_v62 = vsel %vm3031_vm13, %v3015_v14, %v3047_v28 }
 0x6a5   : > { %v4337_v18 = vpop.eup %4336  ;;  %3078 = vst [vmem:[%s6256_s6 + $0x40] sm:$0xff] %v3062_v41  ;;  %3079 = vst [vmem:[%s6256_s6 + $0x48] sm:$0xff] %v3063_v62  ;;  %4338 = vrsqrt.f32 %v2932_v53  ;;  %v2933_v13 = vadd.f32 1e-05, %v2909_v59 }
 0x6a6   : > { %v2952_v32 = vmul.f32 %v4337_v18, %v2920_v6  ;;  %v2953_v12 = vmul.f32 %v4337_v18, %v2921_v31 }
 0x6a7   : > { %4340 = vrsqrt.f32 %v2933_v13 }
 0x6a8   : > { %vm2968_vm14 = vcmp.gt.f32.partialorder %v2952_v32, 0.0  ;;  %vm2969_vm15 = vcmp.gt.f32.partialorder %v2953_v12, 0.0  ;;  %v2984_v46 = vmul.f32 %v2952_v32, %v5371_v23  ;;  %v2985_v20 = vmul.f32 %v2953_v12, %v5371_v23 }
 0x6aa   : > { %v3000_v44 = vsel %vm2968_vm14, %v2952_v32, %v2984_v46  ;;  %v3001_v2 = vsel %vm2969_vm15, %v2953_v12, %v2985_v20 }
 0x6ab   : > { %v3016_v27 = vadd.f32 %v4352_v19, %v3000_v44  ;;  %v3017_v16 = vadd.f32 %v4353_v61, %v3001_v2 }
 0x6ad   : > { %vm3032_vm7 = vcmp.gt.f32.partialorder %v3016_v27, 0.0  ;;  %vm3033_vm8 = vcmp.gt.f32.partialorder %v3017_v16, 0.0  ;;  %v3048_v42 = vmul.f32 %v3016_v27, %v5371_v23  ;;  %v3049_v56 = vmul.f32 %v3017_v16, %v5371_v23 }
 0x6ae   : > { %v2925_v23 = vsub.f32 %v6201_v10, %v2885_v9 }
 0x6af   : > { %v4339_v36 = vpop.eup %4338  ;;  %v3064_v37 = vsel %vm3032_vm7, %v3016_v27, %v3048_v42  ;;  %v3065_v29 = vsel %vm3033_vm8, %v3017_v16, %v3049_v56 }
 0x6b0   : > { %3080 = vst [vmem:[%s6256_s6 + $0x50] sm:$0xff] %v3064_v37  ;;  %3081 = vst [vmem:[%s6256_s6 + $0x58] sm:$0xff] %v3065_v29  ;;  %v2954_v8 = vmul.f32 %v4339_v36, %v2922_v17  ;;  %v2955_v38 = vmul.f32 %v4339_v36, %v2923_v43 }
 0x6b1   : > { %v4341_v5 = vpop.eup %4340 }
 0x6b2   : > { %vm2970_vm1 = vcmp.gt.f32.partialorder %v2954_v8, 0.0  ;;  %vm2971_vm2 = vcmp.gt.f32.partialorder %v2955_v38, 0.0  ;;  %v2986_v1 = vmul.f32 %v2954_v8, %v5381_v3  ;;  %v2987_v40 = vmul.f32 %v2955_v38, %v5381_v3 }
 0x6b3   : > { %v2956_v47 = vmul.f32 %v4341_v5, %v2924_v63  ;;  %v2957_v0 = vmul.f32 %v4341_v5, %v2925_v23 }
 0x6b4   : > { %v3002_v4 = vsel %vm2970_vm1, %v2954_v8, %v2986_v1  ;;  %v3003_v39 = vsel %vm2971_vm2, %v2955_v38, %v2987_v40 }
 0x6b5   : > { %v3018_v54 = vadd.f32 %v4354_v48, %v3002_v4  ;;  %v3019_v25 = vadd.f32 %v4355_v35, %v3003_v39  ;;  %vm2972_vm0 = vcmp.gt.f32.partialorder %v2956_v47, 0.0  ;;  %vm2973_vm3 = vcmp.gt.f32.partialorder %v2957_v0, 0.0 }
 0x6b6   : > { %v2988_v15 = vmul.f32 %v2956_v47, %v5386_v57  ;;  %v2989_v10 = vmul.f32 %v2957_v0, %v5386_v57 }
 0x6b7   : > { %vm3034_vm4 = vcmp.gt.f32.partialorder %v3018_v54, 0.0  ;;  %vm3035_vm9 = vcmp.gt.f32.partialorder %v3019_v25, 0.0  ;;  %v3050_v24 = vmul.f32 %v3018_v54, %v5381_v3  ;;  %v3051_v30 = vmul.f32 %v3019_v25, %v5381_v3 }
 0x6b8   : > { %v3004_v52 = vsel %vm2972_vm0, %v2956_v47, %v2988_v15  ;;  %v3005_v51 = vsel %vm2973_vm3, %v2957_v0, %v2989_v10 }
 0x6b9   : > { %v3066_v55 = vsel %vm3034_vm4, %v3018_v54, %v3050_v24  ;;  %v3067_v34 = vsel %vm3035_vm9, %v3019_v25, %v3051_v30  ;;  %v3020_v33 = vadd.f32 %v4356_v26, %v3004_v52  ;;  %v3021_v22 = vadd.f32 %v4357_v45, %v3005_v51 }
 0x6ba   : > { %3082 = vst [vmem:[%s6256_s6 + $0x60] sm:$0xff] %v3066_v55  ;;  %3083 = vst [vmem:[%s6256_s6 + $0x68] sm:$0xff] %v3067_v34 }
 0x6bb   : > { %vm3036_vm10 = vcmp.gt.f32.partialorder %v3020_v33, 0.0  ;;  %vm3037_vm5 = vcmp.gt.f32.partialorder %v3021_v22, 0.0  ;;  %v3052_v9 = vmul.f32 %v3020_v33, %v5386_v57  ;;  %v3053_v50 = vmul.f32 %v3021_v22, %v5386_v57 }
 0x6bd   : > { %v3068_v58 = vsel %vm3036_vm10, %v3020_v33, %v3052_v9  ;;  %v3069_v3 = vsel %vm3037_vm5, %v3021_v22, %v3053_v50 }
 0x6be   : > { %3084 = vst [vmem:[%s6256_s6 + $0x70] sm:$0xff] %v3068_v58  ;;  %3085 = vst [vmem:[%s6256_s6 + $0x78] sm:$0xff] %v3069_v3 }
 0x6bf PF: > { %s14_s15 = sadd.s32 1, %s4364_s15  }
 0x6c0   : > { %p11_p4 = scmp.ge.s32.totalorder %s14_s15, 4  }
 0x6c2   :  { %13 = sbr.rel (!%p11_p4) target bundleno = 1 (0x1), region = 66 }

</bundles_post_ra>
